<compile_context>
chip_gen: v7x
topology: tpu7x:2x2x1
jax: 0.10.0
libtpu: 0.0.40
codegen_flags: <defaults>
</compile_context>

<pallas_src>
import functools
import math

import jax
import jax.numpy as jnp
from jax.experimental import pallas as pl
from jax.experimental.pallas import tpu as pltpu


N_ATT = 1000       # hard-coded in Decoder.__init__ (Attention(..., 1000))
NREADOUT = 620     # default nreadout in Decoder.__init__


# ----------------------------- small helpers --------------------------------


def _round_up(x, m):
    return ((x + m - 1) // m) * m


def _pad_to(x, shape):
    pads = [(0, t - s) for s, t in zip(x.shape, shape)]
    return jnp.pad(x, pads)


def _pad_axis0(x, n):
    if x.shape[0] == n:
        return x
    return jnp.pad(x, [(0, n - x.shape[0])] + [(0, 0)] * (x.ndim - 1))


def _nbytes(*objs):
    return sum(math.prod(o.shape) * jnp.dtype(o.dtype).itemsize for o in objs)


def _physical_vmem_bytes():
    try:
        info = pltpu.get_tpu_info()
        v = int(getattr(info, "vmem_capacity_bytes", 0) or 0)
        if v > 0:
            return v
    except Exception:
        pass
    return 128 << 20   # conservative default (v5e/v6e physical VMEM)


def _vmem_limit_bytes(working_set_bytes):
    """Generation-aware scoped-VMEM limit: ~112 MiB ceiling on v5e/v6e
    (128 MiB physical), ~48 MiB on v7x (64 MiB physical)."""
    cap = max(_physical_vmem_bytes() - (16 << 20), 32 << 20)
    want = int(1.5 * working_set_bytes) + (16 << 20)
    return int(min(max(want, 32 << 20), cap))


def _num_tensorcores():
    try:
        info = pltpu.get_tpu_info()
        for name in ("num_cores", "core_count", "num_tensorcores",
                     "tensorcore_count", "cores_per_chip", "num_cores_per_chip"):
            v = getattr(info, name, None)
            if v:
                return int(v)
    except Exception:
        pass
    return 1


def _vocab_dim_semantics(num_tiles):
    """v7x has 2 TensorCores sharing HBM: shard the mem-bound vocab weight
    stream across them. Plain 'parallel' is a codegen no-op on 1-TC chips."""
    if num_tiles >= 2 and _num_tensorcores() >= 2:
        try:
            return (pltpu.CORE_PARALLEL,)
        except Exception:
            pass
    return ("parallel",)


def _const_spec(shape):
    """Resident block: full-array block, constant block index (1-D grids)."""
    zeros = (0,) * len(shape)
    return pl.BlockSpec(tuple(shape), lambda k: zeros)


# ----------------------------- Pallas kernels --------------------------------


def _gru_cell(x, h, wih_ref, whh_ref, bih_ref, bhh_ref):
    """PyTorch GRUCell with two weight layouts:
       * fused [in,3H] / [H,3H]  (H % 128 == 0): 2 MXU matmuls per cell,
         128-aligned lane slices of the [N,3H] result are free.
       * gate-major [3,in,H] / [3,H,H] (H < 128): no lane-offset slicing.
    f32 accumulation; the carried h stays f32."""
    wdt = wih_ref.dtype
    xw = x.astype(wdt)
    hw = h.astype(wdt)
    if len(wih_ref.shape) == 2:                         # fused, gate order (r,z,n)
        H = whh_ref.shape[0]
        gi = jnp.dot(xw, wih_ref[...], preferred_element_type=jnp.float32) + bih_ref[...]
        gh = jnp.dot(hw, whh_ref[...], preferred_element_type=jnp.float32) + bhh_ref[...]
        r = jax.nn.sigmoid(gi[:, :H] + gh[:, :H])
        z = jax.nn.sigmoid(gi[:, H:2 * H] + gh[:, H:2 * H])
        n = jnp.tanh(gi[:, 2 * H:] + r * gh[:, 2 * H:])
    else:                                               # gate-split
        def gates(i):
            gi = jnp.dot(xw, wih_ref[i], preferred_element_type=jnp.float32) + bih_ref[i]
            gh = jnp.dot(hw, whh_ref[i], preferred_element_type=jnp.float32) + bhh_ref[i]
            return gi, gh
        gi_r, gh_r = gates(0)
        gi_z, gh_z = gates(1)
        gi_n, gh_n = gates(2)
        r = jax.nn.sigmoid(gi_r + gh_r)
        z = jax.nn.sigmoid(gi_z + gh_z)
        n = jnp.tanh(gi_n + r * gh_n)
    return (1.0 - z) * n + z * h


def enc_proj_kernel(enc_ref, w_ref, b_ref, out_ref):
    """One row tile of the step-invariant s2s projection of the encoder
    context: [TR, C] @ [C, A] + b, stored in the stream dtype (bf16)."""
    acc = (jnp.dot(enc_ref[...], w_ref[...], preferred_element_type=jnp.float32)
           + b_ref[...])
    out_ref[...] = acc.astype(out_ref.dtype)


def decoder_step_kernel(
    approx_recip,
    emb_ref, hid_ref, enc_ref, encp_ref, mask_ref,
    g1_wih_ref, g1_whh_ref, g1_bih_ref, g1_bhh_ref,
    g2_wih_ref, g2_whh_ref, g2_bih_ref, g2_bhh_ref,
    h2s_w_ref, h2s_b_ref, a2o_w_ref, a2o_b_ref,
    e2o_w_ref, h2o_w_ref, c2o_w_ref, ro_b_ref,
    readout_ref, hid_out_ref,
    h1_sc, hproj_sc, m_sc, l_sc, ctx_sc,
):
    """One decode step, tiled over the source sequence (grid axis 0 = KV tile).

    k == 0    : gru1, hidden->attention projection, online-softmax init.
    every k   : attention tile (tanh chain, logits, online-softmax update)
                on a streamed [N,TS,*] slice of enc / enc_proj.
    k == last : normalize the context, gru2, fused-bias readout, write outputs.
    """
    k = pl.program_id(0)
    last = pl.num_programs(0) - 1

    @pl.when(k == 0)
    def _init():
        emb = emb_ref[...]
        h1 = _gru_cell(emb, hid_ref[...],
                       g1_wih_ref, g1_whh_ref, g1_bih_ref, g1_bhh_ref)
        h1_sc[...] = h1
        hproj_sc[...] = (jnp.dot(h1.astype(h2s_w_ref.dtype), h2s_w_ref[...],
                                 preferred_element_type=jnp.float32)
                         + h2s_b_ref[...])
        m_sc[...] = jnp.full_like(m_sc, -1e30)
        l_sc[...] = jnp.zeros_like(l_sc)
        ctx_sc[...] = jnp.zeros_like(ctx_sc)

    # --- attention over this KV tile ---------------------------------------
    enc = enc_ref[...]                                     # [N, TS, C] stream dtype
    cdt = encp_ref.dtype                                   # bf16 in the perf config
    # elementwise chain in the stream dtype (bf16 VPU/EUP on v6e/v7x);
    # logit reduction + softmax bookkeeping stay f32.
    t = jnp.tanh(encp_ref[...] + hproj_sc[...].astype(cdt)[:, None, :])
    logit = (jnp.sum(t.astype(jnp.float32) * a2o_w_ref[...], axis=-1)
             + a2o_b_ref[...])                             # [N, TS]
    # Finite fill (-1e30): same softmax as -inf for partially-masked rows;
    # a fully-masked row gives a uniform softmax instead of the reference NaN
    # (intentional divergence, only observable for zero-length sources).
    logit = jnp.where(mask_ref[...] > 0.0, logit, -1e30)

    m_prev = m_sc[...]
    m_new = jnp.maximum(m_prev, jnp.max(logit, axis=-1, keepdims=True))
    alpha = jnp.exp(m_prev - m_new)
    p = jnp.exp(logit - m_new)                             # [N, TS] f32
    l_sc[...] = alpha * l_sc[...] + jnp.sum(p, axis=-1, keepdims=True)
    # Context tile as a batched MXU matmul (q=1).
    # TODO(synk): if a bundle dump shows MXU relayout/drain dominating, switch
    # to a VPU broadcast-mul + sublane reduce over TS.
    ctx_tile = jnp.einsum("nqs,nsc->nqc", p[:, None, :].astype(enc.dtype), enc,
                          preferred_element_type=jnp.float32)[:, 0, :]
    ctx_sc[...] = alpha * ctx_sc[...] + ctx_tile
    m_sc[...] = m_new

    @pl.when(k == last)
    def _finalize():
        inv_l = pl.reciprocal(l_sc[...], approx=approx_recip)
        attn_enc = ctx_sc[...] * inv_l                     # [N, C] f32
        h2 = _gru_cell(attn_enc, h1_sc[...],
                       g2_wih_ref, g2_whh_ref, g2_bih_ref, g2_bhh_ref)
        wdt = e2o_w_ref.dtype
        pre = (jnp.dot(emb_ref[...].astype(wdt), e2o_w_ref[...],
                       preferred_element_type=jnp.float32)
               + jnp.dot(h2.astype(wdt), h2o_w_ref[...],
                         preferred_element_type=jnp.float32)
               + jnp.dot(attn_enc.astype(wdt), c2o_w_ref[...],
                         preferred_element_type=jnp.float32)
               + ro_b_ref[...])                            # folded e2o+h2o+c2o bias
        readout_ref[...] = jnp.tanh(pre)
        hid_out_ref[...] = h2


def affine_kernel(readout_ref, w_ref, b_ref, pred_ref):
    """One vocab tile of prediction = readout @ W_affine + b."""
    pred_ref[...] = (
        jnp.dot(readout_ref[...].astype(w_ref.dtype), w_ref[...],
                preferred_element_type=jnp.float32)
        + b_ref[...])


# ----------------------------- parameters ------------------------------------


def init_params(key, *, vocab, emb_dim, hid_dim, n_att=N_ATT, nreadout=NREADOUT):
    """Deterministic init matching Decoder.__init__ shapes (PyTorch layouts:
    Linear [out, in], GRUCell [3H, in])."""
    ks = jax.random.split(key, 32)
    it = iter(ks)

    def lin(in_f, out_f):
        k = 1.0 / jnp.sqrt(in_f)
        w = jax.random.uniform(next(it), (out_f, in_f), jnp.float32, -k, k)
        b = jax.random.uniform(next(it), (out_f,), jnp.float32, -k, k)
        return w, b

    def gru(in_f, hid):
        k = 1.0 / jnp.sqrt(hid)
        w_ih = jax.random.uniform(next(it), (3 * hid, in_f), jnp.float32, -k, k)
        w_hh = jax.random.uniform(next(it), (3 * hid, hid), jnp.float32, -k, k)
        b_ih = jax.random.uniform(next(it), (3 * hid,), jnp.float32, -k, k)
        b_hh = jax.random.uniform(next(it), (3 * hid,), jnp.float32, -k, k)
        return w_ih, w_hh, b_ih, b_hh

    C = 2 * hid_dim
    return {
        "embedding": jax.random.normal(next(it), (vocab, emb_dim), jnp.float32),
        "gru1": gru(emb_dim, hid_dim),
        "gru2": gru(C, hid_dim),
        "h2s": lin(hid_dim, n_att),
        "s2s": lin(C, n_att),
        "a2o": lin(n_att, 1),
        "e2o": lin(emb_dim, nreadout),
        "h2o": lin(hid_dim, nreadout),
        "c2o": lin(C, nreadout),
        "affine": lin(nreadout, vocab),
    }


def prepare_params(params, *, matmul_dtype=jnp.bfloat16, tile_v=1024, kv_tile=256):
    """One-time weight preparation, hoisted out of the per-token decode path.

    * linear weights transposed to [in, out], lane-dense output padding
      (n_att 1000->1024, nreadout 620->640, vocab -> multiple of TILE_V)
    * GRU gates fused to [in,3H]/[H,3H] when H is 128-aligned, gate-major
      [3,in,H] otherwise
    * readout biases (e2o+h2o+c2o) folded into one bias
    * all big weight streams cast to `matmul_dtype` (bf16 by default); biases,
      a2o and every accumulation stay f32.
    """
    assert kv_tile % 128 == 0, "kv_tile must be a multiple of 128 (lane width)"
    hid_dim = params["h2s"][0].shape[1]
    emb_dim = params["e2o"][0].shape[1]
    n_att = params["h2s"][0].shape[0]
    vocab, nreadout = params["affine"][0].shape

    A = _round_up(n_att, 128)                       # 1000 -> 1024
    R = _round_up(nreadout, 128)                    # 620  -> 640
    TV = min(_round_up(tile_v, 128), _round_up(vocab, 128))
    V = _round_up(vocab, TV)

    def lin_t(w, b, out_pad, in_pad=None, dtype=matmul_dtype):
        wt = jnp.transpose(w)                       # [in, out]
        in_dim = wt.shape[0] if in_pad is None else in_pad
        wt = _pad_to(wt, (in_dim, out_pad)).astype(dtype)
        br = _pad_to(b.reshape(1, -1), (1, out_pad)).astype(jnp.float32)
        return wt, br

    def gru_t(w_ih, w_hh, b_ih, b_hh):
        in_f = w_ih.shape[1]
        H = w_hh.shape[1]
        if H % 128 == 0:
            # fused gates (r,z,n): 2 matmuls/cell, lane-aligned result slices.
            return (jnp.transpose(w_ih).astype(matmul_dtype),          # [in, 3H]
                    jnp.transpose(w_hh).astype(matmul_dtype),          # [H, 3H]
                    b_ih.reshape(1, 3 * H).astype(jnp.float32),
                    b_hh.reshape(1, 3 * H).astype(jnp.float32))
        # small H: gate-major split, no lane-offset slicing.
        return (jnp.transpose(w_ih.reshape(3, H, in_f), (0, 2, 1)).astype(matmul_dtype),
                jnp.transpose(w_hh.reshape(3, H, H), (0, 2, 1)).astype(matmul_dtype),
                b_ih.reshape(3, 1, H).astype(jnp.float32),
                b_hh.reshape(3, 1, H).astype(jnp.float32))

    h2s_w, h2s_b = lin_t(*params["h2s"], out_pad=A)
    s2s_w, s2s_b = lin_t(*params["s2s"], out_pad=A)
    # a2o has output width 1 -> keep as a broadcast row [1, A] + bias [1, 1]
    a2o_w = _pad_to(params["a2o"][0], (1, A)).astype(jnp.float32)
    a2o_b = params["a2o"][1].reshape(1, 1).astype(jnp.float32)
    e2o_w, e2o_b = lin_t(*params["e2o"], out_pad=R)
    h2o_w, h2o_b = lin_t(*params["h2o"], out_pad=R)
    c2o_w, c2o_b = lin_t(*params["c2o"], out_pad=R)
    ro_b = e2o_b + h2o_b + c2o_b                    # folded readout bias [1, R]
    aff_w, aff_b = lin_t(*params["affine"], out_pad=V, in_pad=R)

    tensors = {
        "embedding": params["embedding"],
        "gru1": gru_t(*params["gru1"]),
        "gru2": gru_t(*params["gru2"]),
        "h2s": (h2s_w, h2s_b),
        "s2s": (s2s_w, s2s_b),
        "a2o": (a2o_w, a2o_b),
        "e2o_w": e2o_w, "h2o_w": h2o_w, "c2o_w": c2o_w, "ro_b": ro_b,
        "affine": (aff_w, aff_b),
    }
    meta = {"hid_dim": hid_dim, "emb_dim": emb_dim, "A": A, "R": R,
            "vocab": vocab, "V": V, "TILE_V": TV, "kv_tile": kv_tile,
            "matmul_dtype": matmul_dtype,
            "approx_recip": bool(jnp.dtype(matmul_dtype) != jnp.dtype(jnp.float32))}
    return tensors, meta


# ----------------------------- wrappers ---------------------------------------


def precompute_enc_proj(enc_context, prep):
    """s2s(enc_context): step-invariant; call ONCE per source sequence and
    reuse the (stream-dtype) result and padded enc_context for every step.
    Row-tiled grid -> automatic double-buffering of the HBM streams."""
    tensors, meta = prep
    N, S, C = enc_context.shape
    n_pad = _round_up(N, 8)
    s_pad = _round_up(S, meta["kv_tile"])
    enc_store = _pad_to(enc_context, (n_pad, s_pad, C)).astype(meta["matmul_dtype"])
    rows = n_pad * s_pad                              # multiple of 8*128 by padding
    enc_flat = enc_store.reshape(rows, C)
    s2s_w, s2s_b = tensors["s2s"]
    A = meta["A"]
    TR = 512 if rows % 512 == 0 else rows

    esz = jnp.dtype(meta["matmul_dtype"]).itemsize
    ws = 2 * TR * (C + A) * esz + _nbytes(s2s_w, s2s_b)
    proj = pl.pallas_call(
        enc_proj_kernel,
        out_shape=jax.ShapeDtypeStruct((rows, A), meta["matmul_dtype"]),
        grid=(rows // TR,),
        in_specs=[pl.BlockSpec((TR, C), lambda r: (r, 0)),
                  pl.BlockSpec((C, A), lambda r: (0, 0)),
                  pl.BlockSpec((1, A), lambda r: (0, 0))],
        out_specs=pl.BlockSpec((TR, A), lambda r: (r, 0)),
        compiler_params=pltpu.CompilerParams(
            dimension_semantics=("parallel",),
            vmem_limit_bytes=_vmem_limit_bytes(ws)),
    )(enc_flat, s2s_w, s2s_b)
    return proj.reshape(n_pad, s_pad, A), enc_store


def decoder_step_pallas(input_ids, hidden, enc_store, enc_proj, src_mask_bool, prep):
    """One decode step: gru1 -> KV-tiled attention (online softmax) ->
    gru2 -> readout, as a single pallas_call with a grid over the source."""
    tensors, meta = prep
    N = input_ids.shape[0]
    H, A, R = meta["hid_dim"], meta["A"], meta["R"]
    n_pad, s_pad, C = enc_store.shape
    TS = meta["kv_tile"]
    num_kv = s_pad // TS

    # Wrapper glue: embedding gather, dropout = identity (eval), hidden.view(N,-1),
    # batch / sequence padding, mask prep.
    # TODO(synk): in-kernel embedding gather would need a scalar-prefetch
    # pl.Element-indexed BlockSpec; kept as wrapper-side jnp.take.
    emb = jnp.take(tensors["embedding"], input_ids, axis=0)           # [N, E]
    emb = _pad_axis0(emb, n_pad)
    hid0 = _pad_axis0(hidden.reshape(N, -1), n_pad)                   # [N, H]

    # fold PyTorch's global `if mask.any()` into the mask itself; padded
    # sequence positions stay masked (0); padded batch rows are sliced off.
    mask_f = src_mask_bool.astype(jnp.float32)
    mask_f = jnp.where(jnp.any(src_mask_bool), mask_f, jnp.ones_like(mask_f))
    mask_f = _pad_to(mask_f, (n_pad, s_pad))

    g1, g2 = tensors["gru1"], tensors["gru2"]
    h2s_w, h2s_b = tensors["h2s"]
    a2o_w, a2o_b = tensors["a2o"]
    weights = (*g1, *g2, h2s_w, h2s_b, a2o_w, a2o_b,
               tensors["e2o_w"], tensors["h2o_w"], tensors["c2o_w"], tensors["ro_b"])

    inputs = (emb, hid0, enc_store, enc_proj, mask_f, *weights)
    in_specs = ([_const_spec(emb.shape),
                 _const_spec(hid0.shape),
                 pl.BlockSpec((n_pad, TS, C), lambda k: (0, k, 0)),   # streamed
                 pl.BlockSpec((n_pad, TS, A), lambda k: (0, k, 0)),   # streamed
                 pl.BlockSpec((n_pad, TS), lambda k: (0, k))]         # streamed
                + [_const_spec(w.shape) for w in weights])            # resident
    out_specs = (pl.BlockSpec((n_pad, R), lambda k: (0, 0)),
                 pl.BlockSpec((n_pad, H), lambda k: (0, 0)))
    out_shape = (jax.ShapeDtypeStruct((n_pad, R), jnp.float32),       # readout
                 jax.ShapeDtypeStruct((n_pad, H), jnp.float32))       # new hidden
    scratch = [pltpu.VMEM((n_pad, H), jnp.float32),                   # h1
               pltpu.VMEM((n_pad, A), jnp.float32),                   # h_proj
               pltpu.VMEM((n_pad, 1), jnp.float32),                   # m
               pltpu.VMEM((n_pad, 1), jnp.float32),                   # l
               pltpu.VMEM((n_pad, C), jnp.float32)]                   # ctx acc

    esz = jnp.dtype(enc_store.dtype).itemsize
    tile_bytes = n_pad * TS * (C * esz + A * esz + 4)
    resident = (_nbytes(emb, hid0, *weights)
                + n_pad * (R + H) * 4                                 # outputs
                + n_pad * (H + A + 2 + C) * 4)                        # scratch
    readout, hid_new = pl.pallas_call(
        functools.partial(decoder_step_kernel, meta["approx_recip"]),
        out_shape=out_shape,
        grid=(num_kv,),
        in_specs=in_specs,
        out_specs=out_specs,
        scratch_shapes=scratch,
        compiler_params=pltpu.CompilerParams(
            dimension_semantics=("arbitrary",),    # outputs revisited across KV tiles
            vmem_limit_bytes=_vmem_limit_bytes(resident + 2 * tile_bytes)),
    )(*inputs)
    return readout, hid_new


def affine_pallas(readout, prep):
    """prediction = readout @ W_affine + b, streamed over a vocab-tiled grid.
    CORE_PARALLEL on 2-TC chips (v7x) so both TensorCores share the stream."""
    tensors, meta = prep
    aff_w, aff_b = tensors["affine"]
    n_pad, R = readout.shape
    V, TV = meta["V"], meta["TILE_V"]
    num_tiles = V // TV

    wsz = jnp.dtype(aff_w.dtype).itemsize
    tile_bytes = R * TV * wsz + TV * 4 + n_pad * TV * 4
    return pl.pallas_call(
        affine_kernel,
        out_shape=jax.ShapeDtypeStruct((n_pad, V), jnp.float32),
        grid=(num_tiles,),
        in_specs=[
            pl.BlockSpec((n_pad, R), lambda v: (0, 0)),   # resident across tiles
            pl.BlockSpec((R, TV), lambda v: (0, v)),      # streamed weights
            pl.BlockSpec((1, TV), lambda v: (0, v)),
        ],
        out_specs=pl.BlockSpec((n_pad, TV), lambda v: (0, v)),
        compiler_params=pltpu.CompilerParams(
            dimension_semantics=_vocab_dim_semantics(num_tiles),
            vmem_limit_bytes=_vmem_limit_bytes(_nbytes(readout) + 3 * tile_bytes)),
    )(readout, aff_w, aff_b)


def decoder_forward_pallas(input_ids, hidden, enc_context, src_mask_bool, prep):
    """Full Decoder.forward. In a real decode loop precompute_enc_proj runs
    once per source sequence; only the last two calls run per token."""
    tensors, meta = prep
    N = input_ids.shape[0]
    enc_proj, enc_store = precompute_enc_proj(enc_context, prep)
    readout, hid_new = decoder_step_pallas(input_ids, hidden, enc_store,
                                           enc_proj, src_mask_bool, prep)
    pred = affine_pallas(readout, prep)
    return pred[:N, :meta["vocab"]], hid_new[:N]


# ----------------------------- pure-JAX reference -----------------------------


def decoder_forward_ref(input_ids, hidden, enc_context, src_mask_bool, params):
    N = input_ids.shape[0]
    emb = jnp.take(params["embedding"], input_ids, axis=0)
    h = hidden.reshape(N, -1)
    H = h.shape[1]

    def gru(x, h, w_ih, w_hh, b_ih, b_hh):
        gi = x @ w_ih.T + b_ih
        gh = h @ w_hh.T + b_hh
        r = jax.nn.sigmoid(gi[:, :H] + gh[:, :H])
        z = jax.nn.sigmoid(gi[:, H:2 * H] + gh[:, H:2 * H])
        n = jnp.tanh(gi[:, 2 * H:] + r * gh[:, 2 * H:])
        return (1 - z) * n + z * h

    h1 = gru(emb, h, *params["gru1"])

    s2s_w, s2s_b = params["s2s"]
    h2s_w, h2s_b = params["h2s"]
    a2o_w, a2o_b = params["a2o"]
    Nn, S, C = enc_context.shape
    attn_h = (enc_context.reshape(-1, C) @ s2s_w.T + s2s_b).reshape(Nn, S, -1)
    attn_h = attn_h + (h1 @ h2s_w.T + h2s_b)[:, None, :]
    logit = (jnp.tanh(attn_h) @ a2o_w.T + a2o_b)[..., 0]
    if bool(jnp.any(src_mask_bool)):
        logit = jnp.where(src_mask_bool, logit, -jnp.inf)
    sm = jax.nn.softmax(logit, axis=1)
    attn_enc = jnp.einsum("ns,nsc->nc", sm, enc_context)

    h2 = gru(attn_enc, h1, *params["gru2"])

    e2o_w, e2o_b = params["e2o"]
    h2o_w, h2o_b = params["h2o"]
    c2o_w, c2o_b = params["c2o"]
    aff_w, aff_b = params["affine"]
    out = jnp.tanh(emb @ e2o_w.T + e2o_b + h2 @ h2o_w.T + h2o_b
                   + attn_enc @ c2o_w.T + c2o_b)
    pred = out @ aff_w.T + aff_b
    return pred, h2


def _check(name, got, want, atol, rtol):
    err = float(jnp.max(jnp.abs(got - want)))
    assert jnp.allclose(got, want, atol=atol, rtol=rtol), f"{name}: max abs err {err}"


# ----------------------------- main -------------------------------------------


if __name__ == "__main__":
    key = jax.random.PRNGKey(0)

    def make_case(k, *, N, S, vocab, emb_dim, hid_dim):
        k_par, k_in, k_hid, k_enc, k_len = jax.random.split(k, 5)
        params = init_params(k_par, vocab=vocab, emb_dim=emb_dim, hid_dim=hid_dim)
        input_ids = jax.random.randint(k_in, (N,), 0, vocab, dtype=jnp.int32)
        hidden = jax.random.normal(k_hid, (1, N, hid_dim), jnp.float32)   # [n_layers,N,H]
        enc_context = jax.random.normal(k_enc, (N, S, 2 * hid_dim), jnp.float32)
        lengths = jax.random.randint(k_len, (N,), 1, S + 1)
        src_mask_bool = jnp.arange(S)[None, :] < lengths[:, None]         # [N, S] bool
        return params, (input_ids, hidden, enc_context, src_mask_bool)

    k_a, k_b = jax.random.split(key)

    # Case A: H=32 (gate-split GRU path), 2 KV tiles, f32 weights -> tight check.
    params_a, inp_a = make_case(k_a, N=8, S=200, vocab=64, emb_dim=32, hid_dim=32)
    ref_pred_a, ref_hid_a = decoder_forward_ref(*inp_a, params_a)
    prep_a = prepare_params(params_a, matmul_dtype=jnp.float32, tile_v=128, kv_tile=128)
    pred_a, hid_a = decoder_forward_pallas(*inp_a, prep_a)
    jax.block_until_ready((pred_a, hid_a))
    assert pred_a.shape == (8, 64) and hid_a.shape == (8, 32)
    _check("A.pred", pred_a, ref_pred_a, 1e-3, 1e-3)
    _check("A.hidden", hid_a, ref_hid_a, 1e-3, 1e-3)

    # Case B: H=128 (fused-gate GRU path), multi-tile affine grid, f32 -> tight.
    params_b, inp_b = make_case(k_b, N=8, S=160, vocab=300, emb_dim=96, hid_dim=128)
    ref_pred_b, ref_hid_b = decoder_forward_ref(*inp_b, params_b)
    prep_b = prepare_params(params_b, matmul_dtype=jnp.float32, tile_v=128, kv_tile=128)
    pred_b, hid_b = decoder_forward_pallas(*inp_b, prep_b)
    jax.block_until_ready((pred_b, hid_b))
    assert pred_b.shape == (8, 300) and hid_b.shape == (8, 128)
    _check("B.pred", pred_b, ref_pred_b, 1e-3, 1e-3)
    _check("B.hidden", hid_b, ref_hid_b, 1e-3, 1e-3)

    # Case C: same model in the default bf16 perf config (bf16 weight/stream
    # dtype, f32 accumulation + softmax) -> loose sanity check.
    prep_c = prepare_params(params_b, tile_v=128, kv_tile=128)   # bf16 default
    pred_c, hid_c = decoder_forward_pallas(*inp_b, prep_c)
    jax.block_until_ready((pred_c, hid_c))
    assert bool(jnp.all(jnp.isfinite(pred_c))) and bool(jnp.all(jnp.isfinite(hid_c)))
    _check("C.pred(bf16)", pred_c, ref_pred_b, 0.25, 0.0)
    _check("C.hidden(bf16)", hid_c, ref_hid_b, 0.25, 0.0)

    print("KERNEL_OK")
</pallas_src>

<mosaic_0001>
module attributes {stable_mosaic.version = 11 : i64} {
  func.func @enc_proj_kernel(%arg0: i32, %arg1: memref<512x64xf32, #tpu.memory_space<vmem>>, %arg2: memref<64x1024xf32, #tpu.memory_space<vmem>>, %arg3: memref<1x1024xf32, #tpu.memory_space<vmem>>, %arg4: memref<512x1024xf32, #tpu.memory_space<vmem>>) attributes {dimension_semantics = [#tpu.dimension_semantics<parallel>], iteration_bounds = array<i64: 4>, scalar_prefetch = 0 : i64, scratch_operands = 0 : i64, tpu.core_type = #tpu.core_type<tc>, window_params = [{transform_indices = @transform_0, window_bounds = array<i64: 512, 64>}, {pipeline_mode = #tpu.pipeline_mode<synchronous>, transform_indices = @transform_1, window_bounds = array<i64: 64, 1024>}, {pipeline_mode = #tpu.pipeline_mode<synchronous>, transform_indices = @transform_2, window_bounds = array<i64: 1, 1024>}, {transform_indices = @transform_3, window_bounds = array<i64: 512, 1024>}]} {
    %c0 = arith.constant 0 : index
    %c0_0 = arith.constant 0 : index
    %0 = vector.load %arg1[%c0, %c0_0] : memref<512x64xf32, #tpu.memory_space<vmem>>, vector<512x64xf32>
    %c0_1 = arith.constant 0 : index
    %c0_2 = arith.constant 0 : index
    %1 = vector.load %arg2[%c0_1, %c0_2] : memref<64x1024xf32, #tpu.memory_space<vmem>>, vector<64x1024xf32>
    %cst = arith.constant dense<0.000000e+00> : vector<512x1024xf32>
    %2 = tpu.matmul %0, %1, %cst {dimension_numbers = #tpu.dot_dimension_numbers<[1], [0], [0], [1], [0, 0, 1, 1], [], []>} : vector<512x64xf32>, vector<64x1024xf32>, vector<512x1024xf32> -> vector<512x1024xf32>
    %c0_3 = arith.constant 0 : index
    %c0_4 = arith.constant 0 : index
    %3 = vector.load %arg3[%c0_3, %c0_4] : memref<1x1024xf32, #tpu.memory_space<vmem>>, vector<1x1024xf32>
    %4 = vector.broadcast %3 : vector<1x1024xf32> to vector<512x1024xf32>
    %5 = arith.addf %2, %4 : vector<512x1024xf32>
    %c0_5 = arith.constant 0 : index
    %c0_6 = arith.constant 0 : index
    %6 = vector.load %arg4[%c0_5, %c0_6] : memref<512x1024xf32, #tpu.memory_space<vmem>>, vector<512x1024xf32>
    tpu.vector_store %arg4[%c0_5, %c0_6], %5 {strides = array<i32>} : memref<512x1024xf32, #tpu.memory_space<vmem>>, vector<512x1024xf32>,
    return
  }
  func.func @transform_0(%arg0: i32) -> (i32, i32) {
    %c0_i32 = arith.constant 0 : i32
    %c0_i32_0 = arith.constant 0 : i32
    return %arg0, %c0_i32 : i32, i32
  }
  func.func @transform_1(%arg0: i32) -> (i32, i32) {
    %c0_i32 = arith.constant 0 : i32
    %c0_i32_0 = arith.constant 0 : i32
    %c0_i32_1 = arith.constant 0 : i32
    return %c0_i32, %c0_i32_0 : i32, i32
  }
  func.func @transform_2(%arg0: i32) -> (i32, i32) {
    %c0_i32 = arith.constant 0 : i32
    %c0_i32_0 = arith.constant 0 : i32
    %c0_i32_1 = arith.constant 0 : i32
    return %c0_i32, %c0_i32_0 : i32, i32
  }
  func.func @transform_3(%arg0: i32) -> (i32, i32) {
    %c0_i32 = arith.constant 0 : i32
    %c0_i32_0 = arith.constant 0 : i32
    return %arg0, %c0_i32 : i32, i32
  }
}

</mosaic_0001>

<bundles_post_ra>
// kernel: tpu_custom_call.1
= control target key start
LH: loop header
LB: loop body
LE: loop exit
PB: predicated region body
PF: predicated region fallthrough
CT: control target
= control target key end

     0   :  { %8 = vsyncpa [#allocation3], 0  ;;  %s5481_s0 = inlined_call_operand.vmem [shape: f32[2048,64], index: 0, kind: input, shape index: {}]   ;;  %s5482_s1 = inlined_call_operand.hbm [shape: f32[64,1024], index: 1, kind: input, shape index: {}]   ;;  %s5483_s2 = inlined_call_operand.hbm [shape: f32[1,1024], index: 2, kind: input, shape index: {}]   ;;  %s5484_s3 = inlined_call_operand.hbm [shape: f32[2048,1024], index: 3, kind: output, shape index: {}]  }
   0x1   :  { %9 = vsyncpa [#allocation6], 0 }
   0x2   :  { %10 = vsyncpa [#allocation4], 0 }
   0x3   :  { %12 = vsyncpa [#allocation4 + $0x1], 0  ;;  %s3595_s12 = smov 0   ;;  %s3597_s13 = smov 0  }
   0x4   :  { %s3599_s14 = smov 0   ;;  %s3601_s15 = smov 0  }
   0x5 LB: > { %s3616_s16 = sadd.s32 4294967295, %s3565_s15   ;;  %s2970_s17 = sadd.s32 4294967294, %s3565_s15   ;;  %s3565_s15 = sphi %s3601_s15, %s5503_s15   ;;  %s3561_s14 = sphi %s3599_s14, %s5502_s14   ;;  %s3557_s13 = sphi %s3597_s13, %s5501_s13   ;;  %s3553_s12 = sphi %s3595_s12, %s5500_s12  }
   0x6   : > { %s3620_s18 = sadd.s32 1, %s3565_s15   ;;  %s93_s19 = sadd.s32 1, %s3561_s14 }
   0x7   : > { %s90_s20 = ssub.s32 %s3565_s15, %s3620_s18  ;;  %p103_p0 = scmp.ne.s32.totalorder %s3561_s14, %s3557_s13 }
   0x8   : > { %p91_p1 = scmp.eq.s32.totalorder %s90_s20, 0  ;;  %p104_p2 = scmp.eq.s32.totalorder %s3616_s16, 3 }
   0x9   : > { %p109_p3 = scmp.ne.s32.totalorder %s3557_s13, %s3553_s12  ;;  %p110_p4 = scmp.eq.s32.totalorder %s2970_s17, 3 }
   0xa   : > { %s3631_s21 = scalar_select %p91_p1, %s3561_s14, %s93_s19  }
   0xb   : > { %p3633_p5 = por %p104_p2, %p103_p0  ;;  %p3637_p6 = por %p110_p4, %p109_p3 }
   0xc   : > { %p2971_p7 = scmp.ge.s32.totalorder %s3565_s15, 1  ;;  %p117_p8 = scmp.lt.s32.totalorder %s3565_s15, 5 }
   0xd   : > { %s5488_s22 = scalar_select %p3633_p5, 1, 0 }
   0xe   : > { %s5489_s23 = scalar_select %p3637_p6, 1, 0 }
   0xf   : > { %p5485_p9 = scmp.eq.s32.totalorder %s3616_s16, 0  ;;  %p3644_p10 = pnand %p2971_p7, %p117_p8 }
  0x10   : > { %s3567_s25 = smov [#allocation2]   ;;  %s3568_s28 = smov [#allocation5]  }
  0x11   : > { %s5490_s24 = scalar_select %p3644_p10, 1, 0 }
  0x12   : > { %s129_s26 = sshll.u32 %s3567_s25, 4  ;;  %p3319_p11 = pneg %p3644_p10  ;;  %s130_s26 = int_to_ptr.vmem [resolvable:$true] %s129_s26 }
  0x13   : > { %s143_s29 = sshll.u32 %s3568_s28, 4  ;;  %s3439_s5 = scalar_lea.hbm %s5482_s1, 8192  ;;  %s3656_s29 = int_to_ptr.vmem [resolvable:$true] %s143_s29 }
  0x14   : > { %p3652_p12 = pnand %p5485_p9, %p3319_p11  ;;  %p3440_p13 = scmp.ne.s32.totalorder %s5482_s1, %s3439_s5 }
  0x15   : > { %p3446_p3 = scmp.lt.u32.totalorder %s3439_s5, %s5482_s1 }
  0x16   : > { %p3441_p0 = pneg %p3652_p12 }
  0x18   : > { %p3442_p1 = pnand %p3441_p0, %p3440_p13 }
  0x1a   : > { %p3443_p2 = pneg %p3442_p1 }
  0x1c   : > { %p3448_p4 = pnand %p3446_p3, %p3443_p2 }
  0x1e   : > { %3451 = shalt.err (!%p3448_p4)
}
  0x1f   : > { %s3452_s10 = scalar_lea.vmem %s130_s26, 8192  ;;  %p3460_p9 = scmp.lt.s32.totalorder %s130_s26, %s130_s26 }
  0x20   : > { %p3453_p7 = scmp.ne.s32.totalorder %s130_s26, %s3452_s10  ;;  %p3461_p6 = scmp.lt.s32.totalorder %s3452_s10, %s3452_s10 }
  0x22   : > { %p3455_p8 = pnand %p3453_p7, %p3441_p0  ;;  %p3462_p5 = por %p3461_p6, %p3460_p9 }
  0x24   : > { %p3456_p11 = pneg %p3455_p8 }
  0x26   : > { %p3463_p10 = pnand %p3462_p5, %p3456_p11 }
  0x28   : > { %3466 = shalt.err (!%p3463_p10)
}
  0x29   : > { %s3569_s11 = smov 1024   ;;  %s3570_s17 = smov 64  }
  0x2a   : > { %3322 = dma.hbm_to_vmem [thread:$0]  (!%p3652_p12), %s5482_s1, 8192, %s130_s26, [#allocation3], %s3569_s11, %s3569_s11, %s3570_s17  }
  0x2b   : > { %s3467_s30 = scalar_lea.hbm %s5483_s2, 128 }
  0x2c   : > { %p3468_p13 = scmp.ne.s32.totalorder %s5483_s2, %s3467_s30  ;;  %p3474_p9 = scmp.lt.u32.totalorder %s3467_s30, %s5483_s2 }
  0x2e   : > { %p3470_p5 = pnand %p3468_p13, %p3441_p0 }
  0x30   : > { %p3471_p6 = pneg %p3470_p5 }
  0x32   : > { %p3476_p10 = pnand %p3474_p9, %p3471_p6 }
  0x34   : > { %3479 = shalt.err (!%p3476_p10)
}
  0x35   : > { %s3480_s26 = scalar_lea.vmem %s3656_s29, 128  ;;  %p3488_p4 = scmp.lt.s32.totalorder %s3656_s29, %s3656_s29 }
  0x36   : > { %p3481_p1 = scmp.ne.s32.totalorder %s3656_s29, %s3480_s26  ;;  %p3489_p7 = scmp.lt.s32.totalorder %s3480_s26, %s3480_s26 }
  0x38   : > { %p3483_p2 = pnand %p3481_p1, %p3441_p0  ;;  %p3490_p8 = por %p3489_p7, %p3488_p4 }
  0x3a   : > { %p3484_p3 = pneg %p3483_p2 }
  0x3c   : > { %p3491_p11 = pnand %p3490_p8, %p3484_p3 }
  0x3e   : > { %3494 = shalt.err (!%p3491_p11)
}
  0x3f   : > { %3325 = dma.hbm_to_vmem [thread:$0]  (!%p3652_p12), %s5483_s2, 128, %s3656_s29, [#allocation6]  }
  0x40   : > { %p5492_p13 = scmp.ne.s32.totalorder %s5490_s24, 0 }
  0x41   : > { %p5493_p5 = scmp.eq.s32.totalorder (!%p5492_p13), %s3616_s16, 0 }
  0x42   : > { %165 = sbr.rel (%p5492_p13) target bundleno = 837 (0x345), region = 32 }
  0x49   : > { %3540 = dma.done.wait (%p5493_p5), [#allocation3], 8192   ;;  %p5494_p0 = pmov %p5493_p5 }
  0x4b   : > { %3542 = vsyncadd (%p5494_p0), [#allocation3], 4294959104  ;;  %p5495_p6 = pmov %p5494_p0 }
  0x4c   : > { %p5496_p9 = pmov %p5494_p0 }
  0x4d   : > { %3544 = dma.done.wait (%p5495_p6), [#allocation6], 128  }
  0x4e   : > { %3546 = vsyncadd (%p5496_p9), [#allocation6], 4294967168  ;;  %v3571_v0 = vmov 0.0   ;;  %s2979_s24 = sshll.u32 %s3616_s16, 6  ;;  %v265_v1 = vld [vmem:[#allocation2 + $0x8] sm:$0xff]  ;;  %v267_v3 = vld [vmem:[#allocation2 + $0x18] sm:$0xff] }
  0x4f   : > { %627 = vmatprep.mubr.f32.mxu0 %v3571_v0  ;;  %1076 = vmatprep.mubr.f32.mxu1 %v3571_v0  ;;  %v273_v2 = vld [vmem:[#allocation2 + $0x48] sm:$0xff]  ;;  %v275_v5 = vld [vmem:[#allocation2 + $0x58] sm:$0xff]  ;;  %v264_v6 = vld [vmem:[#allocation2] sm:$0xff]  ;;  %p3720_p12 = scmp.lt.s32.totalorder %s2979_s24, 255  ;;  %vm370_vm0 = vcmask 523264   ;;  %s190_s19 = sand.u32 1, %s3557_s13  }
  0x50   : > { %v3245_v4 = vpack.c.bf16 %v273_v2, %v265_v1  ;;  %v272_v7 = vld [vmem:[#allocation2 + $0x40] sm:$0xff]  ;;  %v3261_v8 = vpack.c.bf16 %v275_v5, %v267_v3  ;;  %v266_v10 = vld [vmem:[#allocation2 + $0x10] sm:$0xff]  ;;  %v281_v12 = vld [vmem:[#allocation2 + $0x88] sm:$0xff]  ;;  %s2978_s20 = sshll.u32 %s190_s19, 12  ;;  %s3244_s28 = sshll.u32 %s3616_s16, 16 }
  0x51   : > { %v3247_v9 = vpack.c.bf16 %v272_v7, %v264_v6  ;;  %v274_v11 = vld [vmem:[#allocation2 + $0x50] sm:$0xff]  ;;  %v289_v14 = vld [vmem:[#allocation2 + $0xc8] sm:$0xff]  ;;  %v283_v15 = vld [vmem:[#allocation2 + $0x98] sm:$0xff]  ;;  %s5505_s24 = smov (!%p3720_p12, %s2979_s24), 255  ;;  %s4026_s25 = scalar_lea.vmem [#allocation7], %s2978_s20 }
  0x52   : > { %3246 = vmatprep.subr.bf16.mxu0 %v3245_v4  ;;  %v3263_v13 = vpack.c.bf16 %v274_v11, %v266_v10  ;;  %v291_v16 = vld [vmem:[#allocation2 + $0xd8] sm:$0xff]  ;;  %3262 = vmatprep.subr.bf16.mxu1 %v3261_v8  ;;  %v3249_v17 = vpack.c.bf16 %v289_v14, %v281_v12  ;;  %v280_v19 = vld [vmem:[#allocation2 + $0x80] sm:$0xff]  ;;  %v282_v21 = vld [vmem:[#allocation2 + $0x90] sm:$0xff]  ;;  %s2980_s29 = sshll.u32 %s5505_s24, 3  ;;  %s2886_s30 = sshll.u32 %s4026_s25, 4  ;;  %s5431_s30 = int_to_ptr.vmem [resolvable:$true] %s2886_s30 }
  0x53   : > { %3248 = vmatpush1.bf16.msra.mxu0 %v3247_v9  ;;  %v3265_v18 = vpack.c.bf16 %v291_v16, %v283_v15  ;;  %v288_v20 = vld [vmem:[#allocation2 + $0xc0] sm:$0xff]  ;;  %v290_v23 = vld [vmem:[#allocation2 + $0xd0] sm:$0xff]  ;;  %v297_v24 = vld [vmem:[#allocation2 + $0x108] sm:$0xff]  ;;  %s3734_s17 = scalar_lea.vmem %s5481_s0, %s2980_s29  ;;  %s5429_s5 = scalar_lea.hbm %s5484_s3, %s3244_s28 }
  0x54   : > { %3264 = vmatpush1.bf16.msra.mxu1 %v3263_v13  ;;  %v3251_v22 = vpack.c.bf16 %v288_v20, %v280_v19  ;;  %v305_v25 = vld [vmem:[#allocation2 + $0x148] sm:$0xff]  ;;  %3250 = vmatprep.subr.bf16.mxu0 %v3249_v17  ;;  %v3267_v26 = vpack.c.bf16 %v290_v23, %v282_v21  ;;  %v299_v28 = vld [vmem:[#allocation2 + $0x118] sm:$0xff]  ;;  %v296_v30 = vld [vmem:[#allocation2 + $0x100] sm:$0xff]  ;;  %s5440_s6 = scalar_lea.sflag [#allocation4], %s190_s19  ;;  %s3495_s7 = scalar_lea.vmem %s5431_s30, 65536 }
  0x55   : > { %3266 = vmatprep.subr.bf16.mxu1 %v3265_v18  ;;  %v3253_v27 = vpack.c.bf16 %v305_v25, %v297_v24  ;;  %v307_v29 = vld [vmem:[#allocation2 + $0x158] sm:$0xff]  ;;  %v304_v32 = vld [vmem:[#allocation2 + $0x140] sm:$0xff]  ;;  %v298_v33 = vld [vmem:[#allocation2 + $0x110] sm:$0xff]  ;;  %p3496_p10 = scmp.ne.s32.totalorder %s5431_s30, %s3495_s7  ;;  %p5498_p1 = scmp.ne.s32.totalorder %s5488_s22, 0 }
  0x56   : > { %v3269_v31 = vpack.c.bf16 %v307_v29, %v299_v28  ;;  %v306_v34 = vld [vmem:[#allocation2 + $0x150] sm:$0xff]  ;;  %v3255_v35 = vpack.c.bf16 %v304_v32, %v296_v30  ;;  %v313_v36 = vld [vmem:[#allocation2 + $0x188] sm:$0xff]  ;;  %v315_v38 = vld [vmem:[#allocation2 + $0x198] sm:$0xff]  ;;  %s3572_s26 = smov [#allocation7]  }
  0x57   : > { %3252 = vmatpush1.bf16.msra.mxu0 %v3251_v22  ;;  %v321_v37 = vld [vmem:[#allocation2 + $0x1c8] sm:$0xff]  ;;  %v3271_v39 = vpack.c.bf16 %v306_v34, %v298_v33  ;;  %v323_v41 = vld [vmem:[#allocation2 + $0x1d8] sm:$0xff]  ;;  %v312_v42 = vld [vmem:[#allocation2 + $0x180] sm:$0xff]  ;;  %p3497_p2 = pnand %p3496_p10, %p5498_p1  ;;  %s3499_s8 = sshll.u32 %s3572_s26, 4  ;;  %s3500_s8 = int_to_ptr.vmem [resolvable:$false] %s3499_s8 }
  0x58   : > { %3268 = vmatpush1.bf16.msra.mxu1 %v3267_v26  ;;  %3254 = vmatprep.subr.bf16.mxu0 %v3253_v27  ;;  %v3257_v40 = vpack.c.bf16 %v321_v37, %v313_v36  ;;  %v320_v43 = vld [vmem:[#allocation2 + $0x1c0] sm:$0xff]  ;;  %v3273_v44 = vpack.c.bf16 %v323_v41, %v315_v38  ;;  %v314_v45 = vld [vmem:[#allocation2 + $0x190] sm:$0xff]  ;;  %v269_v47 = vld [vmem:[#allocation2 + $0x28] sm:$0xff]  ;;  %s3501_s9 = scalar_lea.vmem %s3500_s8, 131072  ;;  %p3502_p4 = scmp.lt.s32.totalorder %s5431_s30, %s3500_s8 }
  0x59   : > { %3270 = vmatprep.subr.bf16.mxu1 %v3269_v31  ;;  %v322_v46 = vld [vmem:[#allocation2 + $0x1d0] sm:$0xff]  ;;  %v277_v48 = vld [vmem:[#allocation2 + $0x68] sm:$0xff]  ;;  %v271_v49 = vld [vmem:[#allocation2 + $0x38] sm:$0xff]  ;;  %v3259_v50 = vpack.c.bf16 %v320_v43, %v312_v42  ;;  %p3498_p3 = pneg %p3497_p2  ;;  %p3503_p7 = scmp.lt.s32.totalorder %s3501_s9, %s3495_s7 }
  0x5a   : > { %v279_v51 = vld [vmem:[#allocation2 + $0x78] sm:$0xff]  ;;  %v3275_v52 = vpack.c.bf16 %v322_v46, %v314_v45  ;;  %v3277_v53 = vpack.c.bf16 %v277_v48, %v269_v47  ;;  %v268_v54 = vld [vmem:[#allocation2 + $0x20] sm:$0xff]  ;;  %v270_v57 = vld [vmem:[#allocation2 + $0x30] sm:$0xff] }
  0x5b   : > { %3256 = vmatpush1.bf16.msra.mxu0 %v3255_v35  ;;  %v276_v55 = vld [vmem:[#allocation2 + $0x60] sm:$0xff]  ;;  %v3293_v56 = vpack.c.bf16 %v279_v51, %v271_v49  ;;  %v278_v58 = vld [vmem:[#allocation2 + $0x70] sm:$0xff]  ;;  %v201_v62 = vld [vmem:[%s3734_s17 + $0x8] sm:$0xff]  ;;  %p3504_p8 = por %p3503_p7, %p3502_p4 }
  0x5c   : > { %3272 = vmatpush1.bf16.msra.mxu1 %v3271_v39  ;;  %3258 = vmatprep.subr.bf16.mxu0 %v3257_v40  ;;  %v200_v59 = vld [vmem:[%s3734_s17] sm:$0xff]  ;;  %v3279_v60 = vpack.c.bf16 %v276_v55, %v268_v54  ;;  %v3295_v61 = vpack.c.bf16 %v278_v58, %v270_v57  ;;  %v285_v63 = vld [vmem:[#allocation2 + $0xa8] sm:$0xff]  ;;  %v287_v2 = vld [vmem:[#allocation2 + $0xb8] sm:$0xff] }
  0x5d   : > { %3274 = vmatprep.subr.bf16.mxu1 %v3273_v44  ;;  %v293_v1 = vld [vmem:[#allocation2 + $0xe8] sm:$0xff]  ;;  %v295_v4 = vld [vmem:[#allocation2 + $0xf8] sm:$0xff]  ;;  %v284_v5 = vld [vmem:[#allocation2 + $0xa0] sm:$0xff]  ;;  %p3505_p11 = pnand %p3504_p8, %p3498_p3 }
  0x5e   : > { %v3281_v3 = vpack.c.bf16 %v293_v1, %v285_v63  ;;  %v292_v6 = vld [vmem:[#allocation2 + $0xe0] sm:$0xff]  ;;  %v3297_v7 = vpack.c.bf16 %v295_v4, %v287_v2  ;;  %v286_v9 = vld [vmem:[#allocation2 + $0xb0] sm:$0xff]  ;;  %v203_v13 = vld [vmem:[%s3734_s17 + $0x18] sm:$0xff] }
  0x5f   : > { %3260 = vmatpush1.bf16.msra.mxu0 %v3259_v50  ;;  %v3283_v8 = vpack.c.bf16 %v292_v6, %v284_v5  ;;  %v294_v10 = vld [vmem:[#allocation2 + $0xf0] sm:$0xff]  ;;  %v301_v14 = vld [vmem:[#allocation2 + $0x128] sm:$0xff]  ;;  %v303_v16 = vld [vmem:[#allocation2 + $0x138] sm:$0xff] }
  0x60   : > { %3276 = vmatpush1.bf16.msra.mxu1 %v3275_v52  ;;  %3278 = vmatprep.subr.bf16.mxu0 %v3277_v53  ;;  %v3299_v11 = vpack.c.bf16 %v294_v10, %v286_v9  ;;  %v202_v12 = vld [vmem:[%s3734_s17 + $0x10] sm:$0xff]  ;;  %v309_v15 = vld [vmem:[#allocation2 + $0x168] sm:$0xff]  ;;  %v311_v18 = vld [vmem:[#allocation2 + $0x178] sm:$0xff] }
  0x61   : > { %3294 = vmatprep.subr.bf16.mxu1 %v3293_v56  ;;  %v3285_v17 = vpack.c.bf16 %v309_v15, %v301_v14  ;;  %v300_v19 = vld [vmem:[#allocation2 + $0x120] sm:$0xff]  ;;  %v3301_v21 = vpack.c.bf16 %v311_v18, %v303_v16  ;;  %v302_v23 = vld [vmem:[#allocation2 + $0x130] sm:$0xff]  ;;  %v205_v27 = vld [vmem:[%s3734_s17 + $0x28] sm:$0xff] }
  0x62   : > { %2981 = vmatmul.mubr.msk.f32.vlgmr.msra.gmra.mrb[0].mxu0 %vm370_vm0, %v200_v59  ;;  %v308_v20 = vld [vmem:[#allocation2 + $0x160] sm:$0xff]  ;;  %v310_v24 = vld [vmem:[#allocation2 + $0x170] sm:$0xff]  ;;  %v207_v29 = vld [vmem:[%s3734_s17 + $0x38] sm:$0xff] }
  0x63   : > { %3045 = vmatmul.mubr.msk.f32.vlgmr.msra.gmra.mrb[0].mxu1 %vm370_vm0, %v200_v59  ;;  %3280 = vmatpush1.bf16.msra.mxu0 %v3279_v60  ;;  %v3287_v22 = vpack.c.bf16 %v308_v20, %v300_v19  ;;  %v3303_v25 = vpack.c.bf16 %v310_v24, %v302_v23  ;;  %v204_v26 = vld [vmem:[%s3734_s17 + $0x20] sm:$0xff]  ;;  %v206_v28 = vld [vmem:[%s3734_s17 + $0x30] sm:$0xff]  ;;  %v209_v31 = vld [vmem:[%s3734_s17 + $0x48] sm:$0xff] }
  0x64   : > { %3296 = vmatpush1.bf16.msra.mxu1 %v3295_v61  ;;  %633 = vmatprep.mubr.f32.mxu0 %v3571_v0  ;;  %v208_v30 = vld [vmem:[%s3734_s17 + $0x40] sm:$0xff]  ;;  %v210_v32 = vld [vmem:[%s3734_s17 + $0x50] sm:$0xff]  ;;  %v211_v33 = vld [vmem:[%s3734_s17 + $0x58] sm:$0xff] }
  0x65   : > { %1082 = vmatprep.mubr.f32.mxu1 %v3571_v0  ;;  %3282 = vmatprep.subr.bf16.mxu0 %v3281_v3  ;;  %v212_v34 = vld [vmem:[%s3734_s17 + $0x60] sm:$0xff]  ;;  %v213_v35 = vld [vmem:[%s3734_s17 + $0x68] sm:$0xff]  ;;  %v214_v36 = vld [vmem:[%s3734_s17 + $0x70] sm:$0xff] }
  0x66   : > { %2982 = vmatmul.mubr.msk.f32.gmra.mrb[2].mxu0 %vm370_vm0, %v201_v62  ;;  %3298 = vmatprep.subr.bf16.mxu1 %v3297_v7  ;;  %v215_v37 = vld [vmem:[%s3734_s17 + $0x78] sm:$0xff]  ;;  %v216_v38 = vld [vmem:[%s3734_s17 + $0x80] sm:$0xff]  ;;  %v217_v39 = vld [vmem:[%s3734_s17 + $0x88] sm:$0xff] }
  0x67   : > { %3046 = vmatmul.mubr.msk.f32.gmra.mrb[2].mxu1 %vm370_vm0, %v201_v62  ;;  %639 = vmatprep.mubr.f32.mxu0 %v3571_v0  ;;  %v317_v40 = vld [vmem:[#allocation2 + $0x1a8] sm:$0xff]  ;;  %v319_v42 = vld [vmem:[#allocation2 + $0x1b8] sm:$0xff]  ;;  %v316_v45 = vld [vmem:[#allocation2 + $0x1a0] sm:$0xff] }
  0x68   : > { %1088 = vmatprep.mubr.f32.mxu1 %v3571_v0  ;;  %3284 = vmatpush1.bf16.msra.mxu0 %v3283_v8  ;;  %v325_v41 = vld [vmem:[#allocation2 + $0x1e8] sm:$0xff]  ;;  %v327_v44 = vld [vmem:[#allocation2 + $0x1f8] sm:$0xff]  ;;  %v324_v46 = vld [vmem:[#allocation2 + $0x1e0] sm:$0xff] }
  0x69   : > { %3300 = vmatpush1.bf16.msra.mxu1 %v3299_v11  ;;  %3286 = vmatprep.subr.bf16.mxu0 %v3285_v17  ;;  %v3289_v43 = vpack.c.bf16 %v325_v41, %v317_v40  ;;  %v3305_v47 = vpack.c.bf16 %v327_v44, %v319_v42  ;;  %v3291_v48 = vpack.c.bf16 %v324_v46, %v316_v45  ;;  %v318_v49 = vld [vmem:[#allocation2 + $0x1b0] sm:$0xff]  ;;  %v219_v53 = vld [vmem:[%s3734_s17 + $0x98] sm:$0xff]  ;;  %v220_v54 = vld [vmem:[%s3734_s17 + $0xa0] sm:$0xff] }
  0x6a   : > { %2983 = vmatmul.mubr.msk.f32.gmra.mrb[4].mxu0 %vm370_vm0, %v202_v12  ;;  %3302 = vmatprep.subr.bf16.mxu1 %v3301_v21  ;;  %v326_v50 = vld [vmem:[#allocation2 + $0x1f0] sm:$0xff]  ;;  %v221_v55 = vld [vmem:[%s3734_s17 + $0xa8] sm:$0xff]  ;;  %v223_v57 = vld [vmem:[%s3734_s17 + $0xb8] sm:$0xff]  ;;  %v330_v21 = vlaneseq }
  0x6b   : > { %3047 = vmatmul.mubr.msk.f32.gmra.mrb[4].mxu1 %vm370_vm0, %v202_v12  ;;  %645 = vmatprep.mubr.f32.mxu0 %v3571_v0  ;;  %v3307_v51 = vpack.c.bf16 %v326_v50, %v318_v49  ;;  %v218_v52 = vld [vmem:[%s3734_s17 + $0x90] sm:$0xff]  ;;  %v224_v58 = vld [vmem:[%s3734_s17 + $0xc0] sm:$0xff]  ;;  %v225_v59 = vld [vmem:[%s3734_s17 + $0xc8] sm:$0xff] }
  0x6c   : > { %1094 = vmatprep.mubr.f32.mxu1 %v3571_v0  ;;  %3288 = vmatpush1.bf16.msra.mxu0 %v3287_v22  ;;  %v222_v56 = vld [vmem:[%s3734_s17 + $0xb0] sm:$0xff]  ;;  %v227_v61 = vld [vmem:[%s3734_s17 + $0xd8] sm:$0xff]  ;;  %v228_v62 = vld [vmem:[%s3734_s17 + $0xe0] sm:$0xff]  ;;  %v3988_v23 = vshrl.u32 %v330_v21, 7 }
  0x6d   : > { %3304 = vmatpush1.bf16.msra.mxu1 %v3303_v25  ;;  %3290 = vmatprep.subr.bf16.mxu0 %v3289_v43  ;;  %v226_v60 = vld [vmem:[%s3734_s17 + $0xd0] sm:$0xff]  ;;  %v229_v63 = vld [vmem:[%s3734_s17 + $0xe8] sm:$0xff]  ;;  %v231_v2 = vld [vmem:[%s3734_s17 + $0xf8] sm:$0xff] }
  0x6e   : > { %2984 = vmatmul.mubr.msk.f32.gmra.mrb[6].mxu0 %vm370_vm0, %v203_v13  ;;  %3306 = vmatprep.subr.bf16.mxu1 %v3305_v47  ;;  %v230_v1 = vld [vmem:[%s3734_s17 + $0xf0] sm:$0xff]  ;;  %v232_v3 = vld [vmem:[%s3734_s17 + $0x100] sm:$0xff]  ;;  %v233_v4 = vld [vmem:[%s3734_s17 + $0x108] sm:$0xff]  ;;  %v332_v25 = vsub.s32 0, %v3988_v23 }
  0x6f   : > { %3048 = vmatmul.mubr.msk.f32.gmra.mrb[6].mxu1 %vm370_vm0, %v203_v13  ;;  %651 = vmatprep.mubr.f32.mxu0 %v3571_v0  ;;  %v234_v5 = vld [vmem:[%s3734_s17 + $0x110] sm:$0xff]  ;;  %v235_v6 = vld [vmem:[%s3734_s17 + $0x118] sm:$0xff]  ;;  %v236_v7 = vld [vmem:[%s3734_s17 + $0x120] sm:$0xff] }
  0x70   : > { %1100 = vmatprep.mubr.f32.mxu1 %v3571_v0  ;;  %3292 = vmatpush1.bf16.msra.mxu0 %v3291_v48  ;;  %v237_v8 = vld [vmem:[%s3734_s17 + $0x128] sm:$0xff]  ;;  %v238_v9 = vld [vmem:[%s3734_s17 + $0x130] sm:$0xff]  ;;  %v239_v10 = vld [vmem:[%s3734_s17 + $0x138] sm:$0xff] }
  0x71   : > { %3308 = vmatpush1.bf16.msra.mxu1 %v3307_v51  ;;  %v240_v11 = vld [vmem:[%s3734_s17 + $0x140] sm:$0xff]  ;;  %v241_v12 = vld [vmem:[%s3734_s17 + $0x148] sm:$0xff]  ;;  %v242_v13 = vld [vmem:[%s3734_s17 + $0x150] sm:$0xff] }
  0x72   : > { %2985 = vmatmul.mubr.msk.f32.gmra.mrb[8].mxu0 %vm370_vm0, %v204_v26  ;;  %v243_v14 = vld [vmem:[%s3734_s17 + $0x158] sm:$0xff]  ;;  %v244_v15 = vld [vmem:[%s3734_s17 + $0x160] sm:$0xff]  ;;  %v245_v16 = vld [vmem:[%s3734_s17 + $0x168] sm:$0xff] }
  0x73   : > { %3049 = vmatmul.mubr.msk.f32.gmra.mrb[8].mxu1 %vm370_vm0, %v204_v26  ;;  %657 = vmatprep.mubr.f32.mxu0 %v3571_v0  ;;  %v246_v17 = vld [vmem:[%s3734_s17 + $0x170] sm:$0xff]  ;;  %v247_v18 = vld [vmem:[%s3734_s17 + $0x178] sm:$0xff]  ;;  %v248_v19 = vld [vmem:[%s3734_s17 + $0x180] sm:$0xff] }
  0x74   : > { %1106 = vmatprep.mubr.f32.mxu1 %v3571_v0  ;;  %v249_v20 = vld [vmem:[%s3734_s17 + $0x188] sm:$0xff]  ;;  %v250_v22 = vld [vmem:[%s3734_s17 + $0x190] sm:$0xff]  ;;  %v251_v24 = vld [vmem:[%s3734_s17 + $0x198] sm:$0xff] }
  0x75   : > { %v252_v26 = vld [vmem:[%s3734_s17 + $0x1a0] sm:$0xff]  ;;  %v254_v43 = vld [vmem:[%s3734_s17 + $0x1b0] sm:$0xff] }
  0x76   : > { %2986 = vmatmul.mubr.msk.f32.gmra.mrb[10].mxu0 %vm370_vm0, %v205_v27 }
  0x77   : > { %3050 = vmatmul.mubr.msk.f32.gmra.mrb[10].mxu1 %vm370_vm0, %v205_v27  ;;  %663 = vmatprep.mubr.f32.mxu0 %v3571_v0  ;;  %v328_v27 = vld [vmem:[#allocation5] sm:$0xff] }
  0x78   : > { %1112 = vmatprep.mubr.f32.mxu1 %v3571_v0 }
  0x7a   : > { %2987 = vmatmul.mubr.msk.f32.gmra.mrb[12].mxu0 %vm370_vm0, %v206_v28 }
  0x7b   : > { %3051 = vmatmul.mubr.msk.f32.gmra.mrb[12].mxu1 %vm370_vm0, %v206_v28  ;;  %669 = vmatprep.mubr.f32.mxu0 %v3571_v0  ;;  %v340_v28 = vsub.s32 2, %v3988_v23 }
  0x7c   : > { %1118 = vmatprep.mubr.f32.mxu1 %v3571_v0 }
  0x7e   : > { %2988 = vmatmul.mubr.msk.f32.gmra.mrb[14].mxu0 %vm370_vm0, %v207_v29 }
  0x7f   : > { %3052 = vmatmul.mubr.msk.f32.gmra.mrb[14].mxu1 %vm370_vm0, %v207_v29  ;;  %675 = vmatprep.mubr.f32.mxu0 %v3571_v0  ;;  %v336_v29 = vsub.s32 1, %v3988_v23 }
  0x80   : > { %1124 = vmatprep.mubr.f32.mxu1 %v3571_v0 }
  0x82   : > { %2989 = vmatmul.mubr.msk.f32.gmra.mrb[16].mxu0 %vm370_vm0, %v208_v30 }
  0x83   : > { %3053 = vmatmul.mubr.msk.f32.gmra.mrb[16].mxu1 %vm370_vm0, %v208_v30  ;;  %681 = vmatprep.mubr.f32.mxu0 %v3571_v0  ;;  %v344_v30 = vsub.s32 3, %v3988_v23 }
  0x84   : > { %1130 = vmatprep.mubr.f32.mxu1 %v3571_v0 }
  0x86   : > { %2990 = vmatmul.mubr.msk.f32.gmra.mrb[18].mxu0 %vm370_vm0, %v209_v31 }
  0x87   : > { %3054 = vmatmul.mubr.msk.f32.gmra.mrb[18].mxu1 %vm370_vm0, %v209_v31  ;;  %687 = vmatprep.mubr.f32.mxu0 %v3571_v0  ;;  %v4007_v31 = vrot.slane %v328_v27, %v332_v25 }
  0x88   : > { %1136 = vmatprep.mubr.f32.mxu1 %v3571_v0 }
  0x8a   : > { %2991 = vmatmul.mubr.msk.f32.gmra.mrb[20].mxu0 %vm370_vm0, %v210_v32 }
  0x8b   : > { %3055 = vmatmul.mubr.msk.f32.gmra.mrb[20].mxu1 %vm370_vm0, %v210_v32  ;;  %693 = vmatprep.mubr.f32.mxu0 %v3571_v0  ;;  %v4011_v32 = vrot.slane %v328_v27, %v340_v28 }
  0x8c   : > { %1142 = vmatprep.mubr.f32.mxu1 %v3571_v0 }
  0x8e   : > { %2992 = vmatmul.mubr.msk.f32.gmra.mrb[22].mxu0 %vm370_vm0, %v211_v33 }
  0x8f   : > { %3056 = vmatmul.mubr.msk.f32.gmra.mrb[22].mxu1 %vm370_vm0, %v211_v33  ;;  %699 = vmatprep.mubr.f32.mxu0 %v3571_v0  ;;  %v4013_v33 = vrot.slane %v328_v27, %v336_v29 }
  0x90   : > { %1148 = vmatprep.mubr.f32.mxu1 %v3571_v0 }
  0x92   : > { %2993 = vmatmul.mubr.msk.f32.gmra.mrb[24].mxu0 %vm370_vm0, %v212_v34 }
  0x93   : > { %3057 = vmatmul.mubr.msk.f32.gmra.mrb[24].mxu1 %vm370_vm0, %v212_v34  ;;  %705 = vmatprep.mubr.f32.mxu0 %v3571_v0  ;;  %v253_v34 = vld [vmem:[%s3734_s17 + $0x1a8] sm:$0xff] }
  0x94   : > { %1154 = vmatprep.mubr.f32.mxu1 %v3571_v0 }
  0x96   : > { %2994 = vmatmul.mubr.msk.f32.gmra.mrb[26].mxu0 %vm370_vm0, %v213_v35 }
  0x97   : > { %3058 = vmatmul.mubr.msk.f32.gmra.mrb[26].mxu1 %vm370_vm0, %v213_v35  ;;  %711 = vmatprep.mubr.f32.mxu0 %v3571_v0  ;;  %v4017_v35 = vrot.slane %v328_v27, %v344_v30 }
  0x98   : > { %1160 = vmatprep.mubr.f32.mxu1 %v3571_v0 }
  0x9a   : > { %2995 = vmatmul.mubr.msk.f32.gmra.mrb[28].mxu0 %vm370_vm0, %v214_v36 }
  0x9b   : > { %3059 = vmatmul.mubr.msk.f32.gmra.mrb[28].mxu1 %vm370_vm0, %v214_v36  ;;  %717 = vmatprep.mubr.f32.mxu0 %v3571_v0 }
  0x9c   : > { %1166 = vmatprep.mubr.f32.mxu1 %v3571_v0 }
  0x9e   : > { %2996 = vmatmul.mubr.msk.f32.gmra.mrb[30].mxu0 %vm370_vm0, %v215_v37 }
  0x9f   : > { %3060 = vmatmul.mubr.msk.f32.gmra.mrb[30].mxu1 %vm370_vm0, %v215_v37  ;;  %723 = vmatprep.mubr.f32.mxu0 %v3571_v0 }
  0xa0   : > { %1172 = vmatprep.mubr.f32.mxu1 %v3571_v0 }
  0xa2   : > { %2997 = vmatmul.mubr.msk.f32.gmra.mrb[32].mxu0 %vm370_vm0, %v216_v38 }
  0xa3   : > { %3061 = vmatmul.mubr.msk.f32.gmra.mrb[32].mxu1 %vm370_vm0, %v216_v38  ;;  %729 = vmatprep.mubr.f32.mxu0 %v3571_v0 }
  0xa4   : > { %1178 = vmatprep.mubr.f32.mxu1 %v3571_v0 }
  0xa6   : > { %2998 = vmatmul.mubr.msk.f32.gmra.mrb[34].mxu0 %vm370_vm0, %v217_v39 }
  0xa7   : > { %3062 = vmatmul.mubr.msk.f32.gmra.mrb[34].mxu1 %vm370_vm0, %v217_v39  ;;  %735 = vmatprep.mubr.f32.mxu0 %v3571_v0 }
  0xa8   : > { %1184 = vmatprep.mubr.f32.mxu1 %v3571_v0 }
  0xaa   : > { %2999 = vmatmul.mubr.msk.f32.gmra.mrb[36].mxu0 %vm370_vm0, %v218_v52 }
  0xab   : > { %3063 = vmatmul.mubr.msk.f32.gmra.mrb[36].mxu1 %vm370_vm0, %v218_v52  ;;  %741 = vmatprep.mubr.f32.mxu0 %v3571_v0  ;;  %v255_v52 = vld [vmem:[%s3734_s17 + $0x1b8] sm:$0xff] }
  0xac   : > { %1190 = vmatprep.mubr.f32.mxu1 %v3571_v0 }
  0xae   : > { %3000 = vmatmul.mubr.msk.f32.gmra.mrb[38].mxu0 %vm370_vm0, %v219_v53 }
  0xaf   : > { %3064 = vmatmul.mubr.msk.f32.gmra.mrb[38].mxu1 %vm370_vm0, %v219_v53  ;;  %747 = vmatprep.mubr.f32.mxu0 %v3571_v0 }
  0xb0   : > { %1196 = vmatprep.mubr.f32.mxu1 %v3571_v0 }
  0xb2   : > { %3001 = vmatmul.mubr.msk.f32.gmra.mrb[40].mxu0 %vm370_vm0, %v220_v54 }
  0xb3   : > { %3065 = vmatmul.mubr.msk.f32.gmra.mrb[40].mxu1 %vm370_vm0, %v220_v54  ;;  %753 = vmatprep.mubr.f32.mxu0 %v3571_v0 }
  0xb4   : > { %1202 = vmatprep.mubr.f32.mxu1 %v3571_v0 }
  0xb6   : > { %3002 = vmatmul.mubr.msk.f32.gmra.mrb[42].mxu0 %vm370_vm0, %v221_v55 }
  0xb7   : > { %3066 = vmatmul.mubr.msk.f32.gmra.mrb[42].mxu1 %vm370_vm0, %v221_v55  ;;  %759 = vmatprep.mubr.f32.mxu0 %v3571_v0 }
  0xb8   : > { %1208 = vmatprep.mubr.f32.mxu1 %v3571_v0 }
  0xba   : > { %3003 = vmatmul.mubr.msk.f32.gmra.mrb[44].mxu0 %vm370_vm0, %v222_v56 }
  0xbb   : > { %3067 = vmatmul.mubr.msk.f32.gmra.mrb[44].mxu1 %vm370_vm0, %v222_v56  ;;  %765 = vmatprep.mubr.f32.mxu0 %v3571_v0 }
  0xbc   : > { %1214 = vmatprep.mubr.f32.mxu1 %v3571_v0 }
  0xbe   : > { %3004 = vmatmul.mubr.msk.f32.gmra.mrb[46].mxu0 %vm370_vm0, %v223_v57 }
  0xbf   : > { %3068 = vmatmul.mubr.msk.f32.gmra.mrb[46].mxu1 %vm370_vm0, %v223_v57  ;;  %771 = vmatprep.mubr.f32.mxu0 %v3571_v0 }
  0xc0   : > { %1220 = vmatprep.mubr.f32.mxu1 %v3571_v0 }
  0xc2   : > { %3005 = vmatmul.mubr.msk.f32.gmra.mrb[48].mxu0 %vm370_vm0, %v224_v58 }
  0xc3   : > { %3069 = vmatmul.mubr.msk.f32.gmra.mrb[48].mxu1 %vm370_vm0, %v224_v58  ;;  %777 = vmatprep.mubr.f32.mxu0 %v3571_v0 }
  0xc4   : > { %1226 = vmatprep.mubr.f32.mxu1 %v3571_v0 }
  0xc6   : > { %3006 = vmatmul.mubr.msk.f32.gmra.mrb[50].mxu0 %vm370_vm0, %v225_v59 }
  0xc7   : > { %3070 = vmatmul.mubr.msk.f32.gmra.mrb[50].mxu1 %vm370_vm0, %v225_v59  ;;  %783 = vmatprep.mubr.f32.mxu0 %v3571_v0 }
  0xc8   : > { %1232 = vmatprep.mubr.f32.mxu1 %v3571_v0 }
  0xca   : > { %3007 = vmatmul.mubr.msk.f32.gmra.mrb[52].mxu0 %vm370_vm0, %v226_v60 }
  0xcb   : > { %3071 = vmatmul.mubr.msk.f32.gmra.mrb[52].mxu1 %vm370_vm0, %v226_v60  ;;  %789 = vmatprep.mubr.f32.mxu0 %v3571_v0 }
  0xcc   : > { %1238 = vmatprep.mubr.f32.mxu1 %v3571_v0 }
  0xce   : > { %3008 = vmatmul.mubr.msk.f32.gmra.mrb[54].mxu0 %vm370_vm0, %v227_v61 }
  0xcf   : > { %3072 = vmatmul.mubr.msk.f32.gmra.mrb[54].mxu1 %vm370_vm0, %v227_v61  ;;  %795 = vmatprep.mubr.f32.mxu0 %v3571_v0  ;;  %v256_v61 = vld [vmem:[%s3734_s17 + $0x1c0] sm:$0xff] }
  0xd0   : > { %1244 = vmatprep.mubr.f32.mxu1 %v3571_v0 }
  0xd2   : > { %3009 = vmatmul.mubr.msk.f32.gmra.mrb[56].mxu0 %vm370_vm0, %v228_v62 }
  0xd3   : > { %3073 = vmatmul.mubr.msk.f32.gmra.mrb[56].mxu1 %vm370_vm0, %v228_v62  ;;  %801 = vmatprep.mubr.f32.mxu0 %v3571_v0 }
  0xd4   : > { %1250 = vmatprep.mubr.f32.mxu1 %v3571_v0 }
  0xd6   : > { %3010 = vmatmul.mubr.msk.f32.gmra.mrb[58].mxu0 %vm370_vm0, %v229_v63 }
  0xd7   : > { %3074 = vmatmul.mubr.msk.f32.gmra.mrb[58].mxu1 %vm370_vm0, %v229_v63  ;;  %807 = vmatprep.mubr.f32.mxu0 %v3571_v0 }
  0xd8   : > { %1256 = vmatprep.mubr.f32.mxu1 %v3571_v0 }
  0xda   : > { %3011 = vmatmul.mubr.msk.f32.gmra.mrb[60].mxu0 %vm370_vm0, %v230_v1 }
  0xdb   : > { %3075 = vmatmul.mubr.msk.f32.gmra.mrb[60].mxu1 %vm370_vm0, %v230_v1  ;;  %813 = vmatprep.mubr.f32.mxu0 %v3571_v0 }
  0xdc   : > { %1262 = vmatprep.mubr.f32.mxu1 %v3571_v0 }
  0xde   : > { %3012 = vmatmul.mubr.msk.f32.gmra.mrb[62].mxu0 %vm370_vm0, %v231_v2 }
  0xdf   : > { %3076 = vmatmul.mubr.msk.f32.gmra.mrb[62].mxu1 %vm370_vm0, %v231_v2  ;;  %819 = vmatprep.mubr.f32.mxu0 %v3571_v0 }
  0xe0   : > { %1268 = vmatprep.mubr.f32.mxu1 %v3571_v0 }
  0xe2   : > { %3013 = vmatmul.mubr.msk.f32.gmra.mrb[64].mxu0 %vm370_vm0, %v232_v3 }
  0xe3   : > { %3077 = vmatmul.mubr.msk.f32.gmra.mrb[64].mxu1 %vm370_vm0, %v232_v3  ;;  %825 = vmatprep.mubr.f32.mxu0 %v3571_v0 }
  0xe4   : > { %1274 = vmatprep.mubr.f32.mxu1 %v3571_v0 }
  0xe6   : > { %3014 = vmatmul.mubr.msk.f32.gmra.mrb[66].mxu0 %vm370_vm0, %v233_v4 }
  0xe7   : > { %3078 = vmatmul.mubr.msk.f32.gmra.mrb[66].mxu1 %vm370_vm0, %v233_v4  ;;  %831 = vmatprep.mubr.f32.mxu0 %v3571_v0 }
  0xe8   : > { %1280 = vmatprep.mubr.f32.mxu1 %v3571_v0 }
  0xea   : > { %3015 = vmatmul.mubr.msk.f32.gmra.mrb[68].mxu0 %vm370_vm0, %v234_v5 }
  0xeb   : > { %3079 = vmatmul.mubr.msk.f32.gmra.mrb[68].mxu1 %vm370_vm0, %v234_v5  ;;  %837 = vmatprep.mubr.f32.mxu0 %v3571_v0 }
  0xec   : > { %1286 = vmatprep.mubr.f32.mxu1 %v3571_v0 }
  0xee   : > { %3016 = vmatmul.mubr.msk.f32.gmra.mrb[70].mxu0 %vm370_vm0, %v235_v6 }
  0xef   : > { %3080 = vmatmul.mubr.msk.f32.gmra.mrb[70].mxu1 %vm370_vm0, %v235_v6  ;;  %843 = vmatprep.mubr.f32.mxu0 %v3571_v0 }
  0xf0   : > { %1292 = vmatprep.mubr.f32.mxu1 %v3571_v0 }
  0xf2   : > { %3017 = vmatmul.mubr.msk.f32.gmra.mrb[72].mxu0 %vm370_vm0, %v236_v7 }
  0xf3   : > { %3081 = vmatmul.mubr.msk.f32.gmra.mrb[72].mxu1 %vm370_vm0, %v236_v7  ;;  %849 = vmatprep.mubr.f32.mxu0 %v3571_v0  ;;  %v257_v7 = vld [vmem:[%s3734_s17 + $0x1c8] sm:$0xff] }
  0xf4   : > { %1298 = vmatprep.mubr.f32.mxu1 %v3571_v0 }
  0xf6   : > { %3018 = vmatmul.mubr.msk.f32.gmra.mrb[74].mxu0 %vm370_vm0, %v237_v8 }
  0xf7   : > { %3082 = vmatmul.mubr.msk.f32.gmra.mrb[74].mxu1 %vm370_vm0, %v237_v8  ;;  %855 = vmatprep.mubr.f32.mxu0 %v3571_v0 }
  0xf8   : > { %1304 = vmatprep.mubr.f32.mxu1 %v3571_v0 }
  0xfa   : > { %3019 = vmatmul.mubr.msk.f32.gmra.mrb[76].mxu0 %vm370_vm0, %v238_v9 }
  0xfb   : > { %3083 = vmatmul.mubr.msk.f32.gmra.mrb[76].mxu1 %vm370_vm0, %v238_v9  ;;  %861 = vmatprep.mubr.f32.mxu0 %v3571_v0 }
  0xfc   : > { %1310 = vmatprep.mubr.f32.mxu1 %v3571_v0 }
  0xfe   : > { %3020 = vmatmul.mubr.msk.f32.gmra.mrb[78].mxu0 %vm370_vm0, %v239_v10 }
  0xff   : > { %3084 = vmatmul.mubr.msk.f32.gmra.mrb[78].mxu1 %vm370_vm0, %v239_v10  ;;  %867 = vmatprep.mubr.f32.mxu0 %v3571_v0 }
 0x100   : > { %1316 = vmatprep.mubr.f32.mxu1 %v3571_v0 }
 0x102   : > { %3021 = vmatmul.mubr.msk.f32.gmra.mrb[80].mxu0 %vm370_vm0, %v240_v11 }
 0x103   : > { %3085 = vmatmul.mubr.msk.f32.gmra.mrb[80].mxu1 %vm370_vm0, %v240_v11  ;;  %873 = vmatprep.mubr.f32.mxu0 %v3571_v0 }
 0x104   : > { %1322 = vmatprep.mubr.f32.mxu1 %v3571_v0 }
 0x106   : > { %3022 = vmatmul.mubr.msk.f32.gmra.mrb[82].mxu0 %vm370_vm0, %v241_v12 }
 0x107   : > { %3086 = vmatmul.mubr.msk.f32.gmra.mrb[82].mxu1 %vm370_vm0, %v241_v12  ;;  %879 = vmatprep.mubr.f32.mxu0 %v3571_v0 }
 0x108   : > { %1328 = vmatprep.mubr.f32.mxu1 %v3571_v0 }
 0x10a   : > { %3023 = vmatmul.mubr.msk.f32.gmra.mrb[84].mxu0 %vm370_vm0, %v242_v13 }
 0x10b   : > { %3087 = vmatmul.mubr.msk.f32.gmra.mrb[84].mxu1 %vm370_vm0, %v242_v13  ;;  %885 = vmatprep.mubr.f32.mxu0 %v3571_v0 }
 0x10c   : > { %1334 = vmatprep.mubr.f32.mxu1 %v3571_v0 }
 0x10e   : > { %3024 = vmatmul.mubr.msk.f32.gmra.mrb[86].mxu0 %vm370_vm0, %v243_v14 }
 0x10f   : > { %3088 = vmatmul.mubr.msk.f32.gmra.mrb[86].mxu1 %vm370_vm0, %v243_v14  ;;  %891 = vmatprep.mubr.f32.mxu0 %v3571_v0 }
 0x110   : > { %1340 = vmatprep.mubr.f32.mxu1 %v3571_v0 }
 0x112   : > { %3025 = vmatmul.mubr.msk.f32.gmra.mrb[88].mxu0 %vm370_vm0, %v244_v15 }
 0x113   : > { %3089 = vmatmul.mubr.msk.f32.gmra.mrb[88].mxu1 %vm370_vm0, %v244_v15  ;;  %897 = vmatprep.mubr.f32.mxu0 %v3571_v0 }
 0x114   : > { %1346 = vmatprep.mubr.f32.mxu1 %v3571_v0 }
 0x116   : > { %3026 = vmatmul.mubr.msk.f32.gmra.mrb[90].mxu0 %vm370_vm0, %v245_v16 }
 0x117   : > { %3090 = vmatmul.mubr.msk.f32.gmra.mrb[90].mxu1 %vm370_vm0, %v245_v16  ;;  %903 = vmatprep.mubr.f32.mxu0 %v3571_v0  ;;  %v258_v16 = vld [vmem:[%s3734_s17 + $0x1d0] sm:$0xff] }
 0x118   : > { %1352 = vmatprep.mubr.f32.mxu1 %v3571_v0 }
 0x11a   : > { %3027 = vmatmul.mubr.msk.f32.gmra.mrb[92].mxu0 %vm370_vm0, %v246_v17 }
 0x11b   : > { %3091 = vmatmul.mubr.msk.f32.gmra.mrb[92].mxu1 %vm370_vm0, %v246_v17  ;;  %909 = vmatprep.mubr.f32.mxu0 %v3571_v0 }
 0x11c   : > { %1358 = vmatprep.mubr.f32.mxu1 %v3571_v0 }
 0x11e   : > { %3028 = vmatmul.mubr.msk.f32.gmra.mrb[94].mxu0 %vm370_vm0, %v247_v18 }
 0x11f   : > { %3092 = vmatmul.mubr.msk.f32.gmra.mrb[94].mxu1 %vm370_vm0, %v247_v18  ;;  %915 = vmatprep.mubr.f32.mxu0 %v3571_v0 }
 0x120   : > { %1364 = vmatprep.mubr.f32.mxu1 %v3571_v0 }
 0x122   : > { %3029 = vmatmul.mubr.msk.f32.gmra.mrb[96].mxu0 %vm370_vm0, %v248_v19 }
 0x123   : > { %3093 = vmatmul.mubr.msk.f32.gmra.mrb[96].mxu1 %vm370_vm0, %v248_v19  ;;  %921 = vmatprep.mubr.f32.mxu0 %v3571_v0 }
 0x124   : > { %1370 = vmatprep.mubr.f32.mxu1 %v3571_v0 }
 0x126   : > { %3030 = vmatmul.mubr.msk.f32.gmra.mrb[98].mxu0 %vm370_vm0, %v249_v20 }
 0x127   : > { %3094 = vmatmul.mubr.msk.f32.gmra.mrb[98].mxu1 %vm370_vm0, %v249_v20  ;;  %927 = vmatprep.mubr.f32.mxu0 %v3571_v0 }
 0x128   : > { %1376 = vmatprep.mubr.f32.mxu1 %v3571_v0 }
 0x12a   : > { %3031 = vmatmul.mubr.msk.f32.gmra.mrb[100].mxu0 %vm370_vm0, %v250_v22 }
 0x12b   : > { %3095 = vmatmul.mubr.msk.f32.gmra.mrb[100].mxu1 %vm370_vm0, %v250_v22  ;;  %933 = vmatprep.mubr.f32.mxu0 %v3571_v0 }
 0x12c   : > { %1382 = vmatprep.mubr.f32.mxu1 %v3571_v0 }
 0x12e   : > { %3032 = vmatmul.mubr.msk.f32.gmra.mrb[102].mxu0 %vm370_vm0, %v251_v24 }
 0x12f   : > { %3096 = vmatmul.mubr.msk.f32.gmra.mrb[102].mxu1 %vm370_vm0, %v251_v24  ;;  %939 = vmatprep.mubr.f32.mxu0 %v3571_v0 }
 0x130   : > { %1388 = vmatprep.mubr.f32.mxu1 %v3571_v0 }
 0x132   : > { %3033 = vmatmul.mubr.msk.f32.gmra.mrb[104].mxu0 %vm370_vm0, %v252_v26 }
 0x133   : > { %3097 = vmatmul.mubr.msk.f32.gmra.mrb[104].mxu1 %vm370_vm0, %v252_v26  ;;  %945 = vmatprep.mubr.f32.mxu0 %v3571_v0  ;;  %v259_v26 = vld [vmem:[%s3734_s17 + $0x1d8] sm:$0xff] }
 0x134   : > { %1394 = vmatprep.mubr.f32.mxu1 %v3571_v0 }
 0x135   : > { %v629_v36 = vpop.f32.mrb[0].mxu0 }
 0x136   : > { %v630_v37 = vadd.f32 %v629_v36, %v4007_v31  ;;  %v1078_v38 = vpop.f32.mrb[0].mxu1  ;;  %v631_v39 = vpop.f32.mrb[1].mxu0  ;;  %3034 = vmatmul.mubr.msk.f32.gmra.mrb[106].mxu0 %vm370_vm0, %v253_v34 }
 0x137   : > { %v1079_v40 = vadd.f32 %v1078_v38, %v4011_v32  ;;  %v632_v41 = vadd.f32 %v631_v39, %v4013_v33  ;;  %v1080_v42 = vpop.f32.mrb[1].mxu1  ;;  %3098 = vmatmul.mubr.msk.f32.gmra.mrb[106].mxu1 %vm370_vm0, %v253_v34  ;;  %951 = vmatprep.mubr.f32.mxu0 %v3571_v0  ;;  %v260_v39 = vld [vmem:[%s3734_s17 + $0x1e0] sm:$0xff] }
 0x138   : > { %2359 = vst [vmem:[%s4026_s25] sm:$0xff] %v630_v37  ;;  %v1081_v44 = vadd.f32 %v1080_v42, %v4017_v35  ;;  %1400 = vmatprep.mubr.f32.mxu1 %v3571_v0 }
 0x139   : > { %2361 = vst [vmem:[%s4026_s25 + $0x10] sm:$0xff] %v1079_v40  ;;  %2360 = vst [vmem:[%s4026_s25 + $0x8] sm:$0xff] %v632_v41  ;;  %v635_v45 = vpop.f32.mrb[2].mxu0 }
 0x13a   : > { %2362 = vst [vmem:[%s4026_s25 + $0x18] sm:$0xff] %v1081_v44  ;;  %v636_v46 = vadd.f32 %v635_v45, %v4007_v31  ;;  %v1084_v47 = vpop.f32.mrb[2].mxu1  ;;  %v637_v48 = vpop.f32.mrb[3].mxu0  ;;  %3035 = vmatmul.mubr.msk.f32.gmra.mrb[108].mxu0 %vm370_vm0, %v254_v43 }
 0x13b   : > { %v1085_v49 = vadd.f32 %v1084_v47, %v4011_v32  ;;  %v638_v50 = vadd.f32 %v637_v48, %v4013_v33  ;;  %v1086_v51 = vpop.f32.mrb[3].mxu1  ;;  %3099 = vmatmul.mubr.msk.f32.gmra.mrb[108].mxu1 %vm370_vm0, %v254_v43  ;;  %957 = vmatprep.mubr.f32.mxu0 %v3571_v0  ;;  %v261_v48 = vld [vmem:[%s3734_s17 + $0x1e8] sm:$0xff] }
 0x13c   : > { %2367 = vst [vmem:[%s4026_s25 + $0x40] sm:$0xff] %v636_v46  ;;  %v1087_v53 = vadd.f32 %v1086_v51, %v4017_v35  ;;  %1406 = vmatprep.mubr.f32.mxu1 %v3571_v0 }
 0x13d   : > { %2369 = vst [vmem:[%s4026_s25 + $0x50] sm:$0xff] %v1085_v49  ;;  %2368 = vst [vmem:[%s4026_s25 + $0x48] sm:$0xff] %v638_v50  ;;  %v641_v54 = vpop.f32.mrb[4].mxu0 }
 0x13e   : > { %2370 = vst [vmem:[%s4026_s25 + $0x58] sm:$0xff] %v1087_v53  ;;  %v642_v55 = vadd.f32 %v641_v54, %v4007_v31  ;;  %v1090_v56 = vpop.f32.mrb[4].mxu1  ;;  %v643_v57 = vpop.f32.mrb[5].mxu0  ;;  %3036 = vmatmul.mubr.msk.f32.gmra.mrb[110].mxu0 %vm370_vm0, %v255_v52 }
 0x13f   : > { %v1091_v58 = vadd.f32 %v1090_v56, %v4011_v32  ;;  %v644_v59 = vadd.f32 %v643_v57, %v4013_v33  ;;  %v1092_v60 = vpop.f32.mrb[5].mxu1  ;;  %3100 = vmatmul.mubr.msk.f32.gmra.mrb[110].mxu1 %vm370_vm0, %v255_v52  ;;  %963 = vmatprep.mubr.f32.mxu0 %v3571_v0  ;;  %v262_v57 = vld [vmem:[%s3734_s17 + $0x1f0] sm:$0xff] }
 0x140   : > { %2375 = vst [vmem:[%s4026_s25 + $0x80] sm:$0xff] %v642_v55  ;;  %v1093_v62 = vadd.f32 %v1092_v60, %v4017_v35  ;;  %1412 = vmatprep.mubr.f32.mxu1 %v3571_v0 }
 0x141   : > { %2377 = vst [vmem:[%s4026_s25 + $0x90] sm:$0xff] %v1091_v58  ;;  %2376 = vst [vmem:[%s4026_s25 + $0x88] sm:$0xff] %v644_v59  ;;  %v647_v63 = vpop.f32.mrb[6].mxu0 }
 0x142   : > { %2378 = vst [vmem:[%s4026_s25 + $0x98] sm:$0xff] %v1093_v62  ;;  %v648_v1 = vadd.f32 %v647_v63, %v4007_v31  ;;  %v1096_v2 = vpop.f32.mrb[6].mxu1  ;;  %v649_v3 = vpop.f32.mrb[7].mxu0  ;;  %3037 = vmatmul.mubr.msk.f32.gmra.mrb[112].mxu0 %vm370_vm0, %v256_v61 }
 0x143   : > { %v1097_v4 = vadd.f32 %v1096_v2, %v4011_v32  ;;  %v650_v5 = vadd.f32 %v649_v3, %v4013_v33  ;;  %v1098_v6 = vpop.f32.mrb[7].mxu1  ;;  %3101 = vmatmul.mubr.msk.f32.gmra.mrb[112].mxu1 %vm370_vm0, %v256_v61  ;;  %969 = vmatprep.mubr.f32.mxu0 %v3571_v0  ;;  %v263_v3 = vld [vmem:[%s3734_s17 + $0x1f8] sm:$0xff] }
 0x144   : > { %2383 = vst [vmem:[%s4026_s25 + $0xc0] sm:$0xff] %v648_v1  ;;  %v1099_v8 = vadd.f32 %v1098_v6, %v4017_v35  ;;  %1418 = vmatprep.mubr.f32.mxu1 %v3571_v0 }
 0x145   : > { %2385 = vst [vmem:[%s4026_s25 + $0xd0] sm:$0xff] %v1097_v4  ;;  %2384 = vst [vmem:[%s4026_s25 + $0xc8] sm:$0xff] %v650_v5  ;;  %v653_v9 = vpop.f32.mrb[8].mxu0 }
 0x146   : > { %2386 = vst [vmem:[%s4026_s25 + $0xd8] sm:$0xff] %v1099_v8  ;;  %v654_v10 = vadd.f32 %v653_v9, %v4007_v31  ;;  %v1102_v11 = vpop.f32.mrb[8].mxu1  ;;  %v655_v12 = vpop.f32.mrb[9].mxu0  ;;  %3038 = vmatmul.mubr.msk.f32.gmra.mrb[114].mxu0 %vm370_vm0, %v257_v7 }
 0x147   : > { %v1103_v13 = vadd.f32 %v1102_v11, %v4011_v32  ;;  %v656_v14 = vadd.f32 %v655_v12, %v4013_v33  ;;  %v1104_v15 = vpop.f32.mrb[9].mxu1  ;;  %3102 = vmatmul.mubr.msk.f32.gmra.mrb[114].mxu1 %vm370_vm0, %v257_v7  ;;  %975 = vmatprep.mubr.f32.mxu0 %v3571_v0 }
 0x148   : > { %2391 = vst [vmem:[%s4026_s25 + $0x100] sm:$0xff] %v654_v10  ;;  %v1105_v17 = vadd.f32 %v1104_v15, %v4017_v35  ;;  %1424 = vmatprep.mubr.f32.mxu1 %v3571_v0 }
 0x149   : > { %2393 = vst [vmem:[%s4026_s25 + $0x110] sm:$0xff] %v1103_v13  ;;  %2392 = vst [vmem:[%s4026_s25 + $0x108] sm:$0xff] %v656_v14  ;;  %v659_v18 = vpop.f32.mrb[10].mxu0 }
 0x14a   : > { %2394 = vst [vmem:[%s4026_s25 + $0x118] sm:$0xff] %v1105_v17  ;;  %v660_v19 = vadd.f32 %v659_v18, %v4007_v31  ;;  %v1108_v20 = vpop.f32.mrb[10].mxu1  ;;  %v661_v21 = vpop.f32.mrb[11].mxu0  ;;  %3039 = vmatmul.mubr.msk.f32.gmra.mrb[116].mxu0 %vm370_vm0, %v258_v16  ;;  %v3374_v17 = vld [vmem:[%s3734_s17] sm:$0xff] }
 0x14b   : > { %v1109_v22 = vadd.f32 %v1108_v20, %v4011_v32  ;;  %v662_v24 = vadd.f32 %v661_v21, %v4013_v33  ;;  %v1110_v25 = vpop.f32.mrb[11].mxu1  ;;  %3103 = vmatmul.mubr.msk.f32.gmra.mrb[116].mxu1 %vm370_vm0, %v258_v16  ;;  %981 = vmatprep.mubr.f32.mxu0 %v3571_v0 }
 0x14c   : > { %2399 = vst [vmem:[%s4026_s25 + $0x140] sm:$0xff] %v660_v19  ;;  %v1111_v27 = vadd.f32 %v1110_v25, %v4017_v35  ;;  %1430 = vmatprep.mubr.f32.mxu1 %v3571_v0 }
 0x14d   : > { %2401 = vst [vmem:[%s4026_s25 + $0x150] sm:$0xff] %v1109_v22  ;;  %2400 = vst [vmem:[%s4026_s25 + $0x148] sm:$0xff] %v662_v24  ;;  %v665_v28 = vpop.f32.mrb[12].mxu0 }
 0x14e   : > { %2402 = vst [vmem:[%s4026_s25 + $0x158] sm:$0xff] %v1111_v27  ;;  %v666_v29 = vadd.f32 %v665_v28, %v4007_v31  ;;  %v1114_v30 = vpop.f32.mrb[12].mxu1  ;;  %v667_v34 = vpop.f32.mrb[13].mxu0  ;;  %3040 = vmatmul.mubr.msk.f32.gmra.mrb[118].mxu0 %vm370_vm0, %v259_v26  ;;  %v3375_v27 = vld [vmem:[%s3734_s17 + $0x8] sm:$0xff] }
 0x14f   : > { %v1115_v36 = vadd.f32 %v1114_v30, %v4011_v32  ;;  %v668_v37 = vadd.f32 %v667_v34, %v4013_v33  ;;  %v1116_v38 = vpop.f32.mrb[13].mxu1  ;;  %3104 = vmatmul.mubr.msk.f32.gmra.mrb[118].mxu1 %vm370_vm0, %v259_v26  ;;  %987 = vmatprep.mubr.f32.mxu0 %v3571_v0 }
 0x150   : > { %2407 = vst [vmem:[%s4026_s25 + $0x180] sm:$0xff] %v666_v29  ;;  %v1117_v40 = vadd.f32 %v1116_v38, %v4017_v35  ;;  %1436 = vmatprep.mubr.f32.mxu1 %v3571_v0 }
 0x151   : > { %2409 = vst [vmem:[%s4026_s25 + $0x190] sm:$0xff] %v1115_v36  ;;  %2408 = vst [vmem:[%s4026_s25 + $0x188] sm:$0xff] %v668_v37  ;;  %v671_v41 = vpop.f32.mrb[14].mxu0 }
 0x152   : > { %2410 = vst [vmem:[%s4026_s25 + $0x198] sm:$0xff] %v1117_v40  ;;  %v672_v42 = vadd.f32 %v671_v41, %v4007_v31  ;;  %v1120_v43 = vpop.f32.mrb[14].mxu1  ;;  %v673_v44 = vpop.f32.mrb[15].mxu0  ;;  %3041 = vmatmul.mubr.msk.f32.gmra.mrb[120].mxu0 %vm370_vm0, %v260_v39  ;;  %v3376_v40 = vld [vmem:[%s3734_s17 + $0x10] sm:$0xff] }
 0x153   : > { %v1121_v45 = vadd.f32 %v1120_v43, %v4011_v32  ;;  %v674_v46 = vadd.f32 %v673_v44, %v4013_v33  ;;  %v1122_v47 = vpop.f32.mrb[15].mxu1  ;;  %3105 = vmatmul.mubr.msk.f32.gmra.mrb[120].mxu1 %vm370_vm0, %v260_v39  ;;  %993 = vmatprep.mubr.f32.mxu0 %v3571_v0 }
 0x154   : > { %2415 = vst [vmem:[%s4026_s25 + $0x1c0] sm:$0xff] %v672_v42  ;;  %v1123_v49 = vadd.f32 %v1122_v47, %v4017_v35  ;;  %1442 = vmatprep.mubr.f32.mxu1 %v3571_v0 }
 0x155   : > { %2417 = vst [vmem:[%s4026_s25 + $0x1d0] sm:$0xff] %v1121_v45  ;;  %2416 = vst [vmem:[%s4026_s25 + $0x1c8] sm:$0xff] %v674_v46  ;;  %v677_v50 = vpop.f32.mrb[16].mxu0 }
 0x156   : > { %2418 = vst [vmem:[%s4026_s25 + $0x1d8] sm:$0xff] %v1123_v49  ;;  %v678_v51 = vadd.f32 %v677_v50, %v4007_v31  ;;  %v1126_v52 = vpop.f32.mrb[16].mxu1  ;;  %v679_v53 = vpop.f32.mrb[17].mxu0  ;;  %3042 = vmatmul.mubr.msk.f32.gmra.mrb[122].mxu0 %vm370_vm0, %v261_v48  ;;  %v3377_v49 = vld [vmem:[%s3734_s17 + $0x18] sm:$0xff] }
 0x157   : > { %v1127_v54 = vadd.f32 %v1126_v52, %v4011_v32  ;;  %v680_v55 = vadd.f32 %v679_v53, %v4013_v33  ;;  %v1128_v56 = vpop.f32.mrb[17].mxu1  ;;  %3106 = vmatmul.mubr.msk.f32.gmra.mrb[122].mxu1 %vm370_vm0, %v261_v48  ;;  %999 = vmatprep.mubr.f32.mxu0 %v3571_v0 }
 0x158   : > { %2423 = vst [vmem:[%s4026_s25 + $0x200] sm:$0xff] %v678_v51  ;;  %v1129_v58 = vadd.f32 %v1128_v56, %v4017_v35  ;;  %1448 = vmatprep.mubr.f32.mxu1 %v3571_v0 }
 0x159   : > { %2425 = vst [vmem:[%s4026_s25 + $0x210] sm:$0xff] %v1127_v54  ;;  %2424 = vst [vmem:[%s4026_s25 + $0x208] sm:$0xff] %v680_v55  ;;  %v683_v59 = vpop.f32.mrb[18].mxu0 }
 0x15a   : > { %2426 = vst [vmem:[%s4026_s25 + $0x218] sm:$0xff] %v1129_v58  ;;  %v684_v60 = vadd.f32 %v683_v59, %v4007_v31  ;;  %v1132_v61 = vpop.f32.mrb[18].mxu1  ;;  %v685_v62 = vpop.f32.mrb[19].mxu0  ;;  %3043 = vmatmul.mubr.msk.f32.gmra.mrb[124].mxu0 %vm370_vm0, %v262_v57  ;;  %v3378_v58 = vld [vmem:[%s3734_s17 + $0x20] sm:$0xff] }
 0x15b   : > { %v1133_v63 = vadd.f32 %v1132_v61, %v4011_v32  ;;  %v686_v1 = vadd.f32 %v685_v62, %v4013_v33  ;;  %v1134_v2 = vpop.f32.mrb[19].mxu1  ;;  %3107 = vmatmul.mubr.msk.f32.gmra.mrb[124].mxu1 %vm370_vm0, %v262_v57  ;;  %1005 = vmatprep.mubr.f32.mxu0 %v3571_v0 }
 0x15c   : > { %2431 = vst [vmem:[%s4026_s25 + $0x240] sm:$0xff] %v684_v60  ;;  %v1135_v4 = vadd.f32 %v1134_v2, %v4017_v35  ;;  %1454 = vmatprep.mubr.f32.mxu1 %v3571_v0 }
 0x15d   : > { %2433 = vst [vmem:[%s4026_s25 + $0x250] sm:$0xff] %v1133_v63  ;;  %2432 = vst [vmem:[%s4026_s25 + $0x248] sm:$0xff] %v686_v1  ;;  %v689_v5 = vpop.f32.mrb[20].mxu0 }
 0x15e   : > { %2434 = vst [vmem:[%s4026_s25 + $0x258] sm:$0xff] %v1135_v4  ;;  %v690_v6 = vadd.f32 %v689_v5, %v4007_v31  ;;  %v1138_v7 = vpop.f32.mrb[20].mxu1  ;;  %v691_v8 = vpop.f32.mrb[21].mxu0  ;;  %3044 = vmatmul.mubr.msk.f32.gmra.mrb[126].mxu0 %vm370_vm0, %v263_v3  ;;  %v3379_v4 = vld [vmem:[%s3734_s17 + $0x28] sm:$0xff] }
 0x15f   : > { %v1139_v9 = vadd.f32 %v1138_v7, %v4011_v32  ;;  %v692_v10 = vadd.f32 %v691_v8, %v4013_v33  ;;  %v1140_v11 = vpop.f32.mrb[21].mxu1  ;;  %3108 = vmatmul.mubr.msk.f32.gmra.mrb[126].mxu1 %vm370_vm0, %v263_v3  ;;  %1525 = vmatprep.mubr.f32.mxu0 %v3571_v0 }
 0x160   : > { %2439 = vst [vmem:[%s4026_s25 + $0x280] sm:$0xff] %v690_v6  ;;  %v1141_v12 = vadd.f32 %v1140_v11, %v4017_v35  ;;  %1974 = vmatprep.mubr.f32.mxu1 %v3571_v0 }
 0x161   : > { %2441 = vst [vmem:[%s4026_s25 + $0x290] sm:$0xff] %v1139_v9  ;;  %2440 = vst [vmem:[%s4026_s25 + $0x288] sm:$0xff] %v692_v10  ;;  %v695_v13 = vpop.f32.mrb[22].mxu0 }
 0x162   : > { %2442 = vst [vmem:[%s4026_s25 + $0x298] sm:$0xff] %v1141_v12  ;;  %v696_v14 = vadd.f32 %v695_v13, %v4007_v31  ;;  %v1144_v15 = vpop.f32.mrb[22].mxu1  ;;  %v697_v16 = vpop.f32.mrb[23].mxu0  ;;  %3109 = vmatmul.mubr.msk.f32.vlgmr.msra.gmra.mrb[128].mxu0 %vm370_vm0, %v3374_v17  ;;  %v3380_v13 = vld [vmem:[%s3734_s17 + $0x30] sm:$0xff] }
 0x163   : > { %v1145_v18 = vadd.f32 %v1144_v15, %v4011_v32  ;;  %v698_v19 = vadd.f32 %v697_v16, %v4013_v33  ;;  %v1146_v20 = vpop.f32.mrb[23].mxu1  ;;  %3173 = vmatmul.mubr.msk.f32.vlgmr.msra.gmra.mrb[128].mxu1 %vm370_vm0, %v3374_v17  ;;  %1531 = vmatprep.mubr.f32.mxu0 %v3571_v0 }
 0x164   : > { %2447 = vst [vmem:[%s4026_s25 + $0x2c0] sm:$0xff] %v696_v14  ;;  %v1147_v21 = vadd.f32 %v1146_v20, %v4017_v35  ;;  %1980 = vmatprep.mubr.f32.mxu1 %v3571_v0 }
 0x165   : > { %2449 = vst [vmem:[%s4026_s25 + $0x2d0] sm:$0xff] %v1145_v18  ;;  %2448 = vst [vmem:[%s4026_s25 + $0x2c8] sm:$0xff] %v698_v19  ;;  %v701_v22 = vpop.f32.mrb[24].mxu0 }
 0x166   : > { %2450 = vst [vmem:[%s4026_s25 + $0x2d8] sm:$0xff] %v1147_v21  ;;  %v702_v24 = vadd.f32 %v701_v22, %v4007_v31  ;;  %v1150_v25 = vpop.f32.mrb[24].mxu1  ;;  %v703_v26 = vpop.f32.mrb[25].mxu0  ;;  %3110 = vmatmul.mubr.msk.f32.gmra.mrb[130].mxu0 %vm370_vm0, %v3375_v27  ;;  %v3381_v22 = vld [vmem:[%s3734_s17 + $0x38] sm:$0xff] }
 0x167   : > { %v1151_v28 = vadd.f32 %v1150_v25, %v4011_v32  ;;  %v704_v29 = vadd.f32 %v703_v26, %v4013_v33  ;;  %v1152_v30 = vpop.f32.mrb[25].mxu1  ;;  %3174 = vmatmul.mubr.msk.f32.gmra.mrb[130].mxu1 %vm370_vm0, %v3375_v27  ;;  %1537 = vmatprep.mubr.f32.mxu0 %v3571_v0 }
 0x168   : > { %2455 = vst [vmem:[%s4026_s25 + $0x300] sm:$0xff] %v702_v24  ;;  %v1153_v34 = vadd.f32 %v1152_v30, %v4017_v35  ;;  %1986 = vmatprep.mubr.f32.mxu1 %v3571_v0 }
 0x169   : > { %2457 = vst [vmem:[%s4026_s25 + $0x310] sm:$0xff] %v1151_v28  ;;  %2456 = vst [vmem:[%s4026_s25 + $0x308] sm:$0xff] %v704_v29  ;;  %v707_v36 = vpop.f32.mrb[26].mxu0 }
 0x16a   : > { %2458 = vst [vmem:[%s4026_s25 + $0x318] sm:$0xff] %v1153_v34  ;;  %v708_v37 = vadd.f32 %v707_v36, %v4007_v31  ;;  %v1156_v38 = vpop.f32.mrb[26].mxu1  ;;  %v709_v39 = vpop.f32.mrb[27].mxu0  ;;  %3111 = vmatmul.mubr.msk.f32.gmra.mrb[132].mxu0 %vm370_vm0, %v3376_v40  ;;  %v3382_v36 = vld [vmem:[%s3734_s17 + $0x40] sm:$0xff] }
 0x16b   : > { %v1157_v41 = vadd.f32 %v1156_v38, %v4011_v32  ;;  %v710_v42 = vadd.f32 %v709_v39, %v4013_v33  ;;  %v1158_v43 = vpop.f32.mrb[27].mxu1  ;;  %3175 = vmatmul.mubr.msk.f32.gmra.mrb[132].mxu1 %vm370_vm0, %v3376_v40  ;;  %1543 = vmatprep.mubr.f32.mxu0 %v3571_v0 }
 0x16c   : > { %2463 = vst [vmem:[%s4026_s25 + $0x340] sm:$0xff] %v708_v37  ;;  %v1159_v44 = vadd.f32 %v1158_v43, %v4017_v35  ;;  %1992 = vmatprep.mubr.f32.mxu1 %v3571_v0 }
 0x16d   : > { %2465 = vst [vmem:[%s4026_s25 + $0x350] sm:$0xff] %v1157_v41  ;;  %2464 = vst [vmem:[%s4026_s25 + $0x348] sm:$0xff] %v710_v42  ;;  %v713_v45 = vpop.f32.mrb[28].mxu0 }
 0x16e   : > { %2466 = vst [vmem:[%s4026_s25 + $0x358] sm:$0xff] %v1159_v44  ;;  %v714_v46 = vadd.f32 %v713_v45, %v4007_v31  ;;  %v1162_v47 = vpop.f32.mrb[28].mxu1  ;;  %v715_v48 = vpop.f32.mrb[29].mxu0  ;;  %3112 = vmatmul.mubr.msk.f32.gmra.mrb[134].mxu0 %vm370_vm0, %v3377_v49  ;;  %v3383_v45 = vld [vmem:[%s3734_s17 + $0x48] sm:$0xff] }
 0x16f   : > { %v1163_v50 = vadd.f32 %v1162_v47, %v4011_v32  ;;  %v716_v51 = vadd.f32 %v715_v48, %v4013_v33  ;;  %v1164_v52 = vpop.f32.mrb[29].mxu1  ;;  %3176 = vmatmul.mubr.msk.f32.gmra.mrb[134].mxu1 %vm370_vm0, %v3377_v49  ;;  %1549 = vmatprep.mubr.f32.mxu0 %v3571_v0 }
 0x170   : > { %2471 = vst [vmem:[%s4026_s25 + $0x380] sm:$0xff] %v714_v46  ;;  %v1165_v53 = vadd.f32 %v1164_v52, %v4017_v35  ;;  %1998 = vmatprep.mubr.f32.mxu1 %v3571_v0 }
 0x171   : > { %2473 = vst [vmem:[%s4026_s25 + $0x390] sm:$0xff] %v1163_v50  ;;  %2472 = vst [vmem:[%s4026_s25 + $0x388] sm:$0xff] %v716_v51  ;;  %v719_v54 = vpop.f32.mrb[30].mxu0 }
 0x172   : > { %2474 = vst [vmem:[%s4026_s25 + $0x398] sm:$0xff] %v1165_v53  ;;  %v720_v55 = vadd.f32 %v719_v54, %v4007_v31  ;;  %v1168_v56 = vpop.f32.mrb[30].mxu1  ;;  %v721_v57 = vpop.f32.mrb[31].mxu0  ;;  %3113 = vmatmul.mubr.msk.f32.gmra.mrb[136].mxu0 %vm370_vm0, %v3378_v58  ;;  %v3384_v54 = vld [vmem:[%s3734_s17 + $0x50] sm:$0xff] }
 0x173   : > { %v1169_v59 = vadd.f32 %v1168_v56, %v4011_v32  ;;  %v722_v60 = vadd.f32 %v721_v57, %v4013_v33  ;;  %v1170_v61 = vpop.f32.mrb[31].mxu1  ;;  %3177 = vmatmul.mubr.msk.f32.gmra.mrb[136].mxu1 %vm370_vm0, %v3378_v58  ;;  %1555 = vmatprep.mubr.f32.mxu0 %v3571_v0 }
 0x174   : > { %2479 = vst [vmem:[%s4026_s25 + $0x3c0] sm:$0xff] %v720_v55  ;;  %v1171_v62 = vadd.f32 %v1170_v61, %v4017_v35  ;;  %2004 = vmatprep.mubr.f32.mxu1 %v3571_v0 }
 0x175   : > { %2481 = vst [vmem:[%s4026_s25 + $0x3d0] sm:$0xff] %v1169_v59  ;;  %2480 = vst [vmem:[%s4026_s25 + $0x3c8] sm:$0xff] %v722_v60  ;;  %v725_v63 = vpop.f32.mrb[32].mxu0 }
 0x176   : > { %2482 = vst [vmem:[%s4026_s25 + $0x3d8] sm:$0xff] %v1171_v62  ;;  %v726_v1 = vadd.f32 %v725_v63, %v4007_v31  ;;  %v1174_v2 = vpop.f32.mrb[32].mxu1  ;;  %v727_v3 = vpop.f32.mrb[33].mxu0  ;;  %3114 = vmatmul.mubr.msk.f32.gmra.mrb[138].mxu0 %vm370_vm0, %v3379_v4  ;;  %v3385_v63 = vld [vmem:[%s3734_s17 + $0x58] sm:$0xff] }
 0x177   : > { %v1175_v5 = vadd.f32 %v1174_v2, %v4011_v32  ;;  %v728_v6 = vadd.f32 %v727_v3, %v4013_v33  ;;  %v1176_v7 = vpop.f32.mrb[33].mxu1  ;;  %3178 = vmatmul.mubr.msk.f32.gmra.mrb[138].mxu1 %vm370_vm0, %v3379_v4  ;;  %1561 = vmatprep.mubr.f32.mxu0 %v3571_v0 }
 0x178   : > { %2487 = vst [vmem:[%s4026_s25 + $0x400] sm:$0xff] %v726_v1  ;;  %v1177_v8 = vadd.f32 %v1176_v7, %v4017_v35  ;;  %2010 = vmatprep.mubr.f32.mxu1 %v3571_v0 }
 0x179   : > { %2489 = vst [vmem:[%s4026_s25 + $0x410] sm:$0xff] %v1175_v5  ;;  %2488 = vst [vmem:[%s4026_s25 + $0x408] sm:$0xff] %v728_v6  ;;  %v731_v9 = vpop.f32.mrb[34].mxu0 }
 0x17a   : > { %2490 = vst [vmem:[%s4026_s25 + $0x418] sm:$0xff] %v1177_v8  ;;  %v732_v10 = vadd.f32 %v731_v9, %v4007_v31  ;;  %v1180_v11 = vpop.f32.mrb[34].mxu1  ;;  %v733_v12 = vpop.f32.mrb[35].mxu0  ;;  %3115 = vmatmul.mubr.msk.f32.gmra.mrb[140].mxu0 %vm370_vm0, %v3380_v13  ;;  %v3386_v9 = vld [vmem:[%s3734_s17 + $0x60] sm:$0xff] }
 0x17b   : > { %v1181_v14 = vadd.f32 %v1180_v11, %v4011_v32  ;;  %v734_v15 = vadd.f32 %v733_v12, %v4013_v33  ;;  %v1182_v16 = vpop.f32.mrb[35].mxu1  ;;  %3179 = vmatmul.mubr.msk.f32.gmra.mrb[140].mxu1 %vm370_vm0, %v3380_v13  ;;  %1567 = vmatprep.mubr.f32.mxu0 %v3571_v0 }
 0x17c   : > { %2495 = vst [vmem:[%s4026_s25 + $0x440] sm:$0xff] %v732_v10  ;;  %v1183_v17 = vadd.f32 %v1182_v16, %v4017_v35  ;;  %2016 = vmatprep.mubr.f32.mxu1 %v3571_v0 }
 0x17d   : > { %2497 = vst [vmem:[%s4026_s25 + $0x450] sm:$0xff] %v1181_v14  ;;  %2496 = vst [vmem:[%s4026_s25 + $0x448] sm:$0xff] %v734_v15  ;;  %v737_v18 = vpop.f32.mrb[36].mxu0 }
 0x17e   : > { %2498 = vst [vmem:[%s4026_s25 + $0x458] sm:$0xff] %v1183_v17  ;;  %v738_v19 = vadd.f32 %v737_v18, %v4007_v31  ;;  %v1186_v20 = vpop.f32.mrb[36].mxu1  ;;  %v739_v21 = vpop.f32.mrb[37].mxu0  ;;  %3116 = vmatmul.mubr.msk.f32.gmra.mrb[142].mxu0 %vm370_vm0, %v3381_v22  ;;  %v3387_v18 = vld [vmem:[%s3734_s17 + $0x68] sm:$0xff] }
 0x17f   : > { %v1187_v24 = vadd.f32 %v1186_v20, %v4011_v32  ;;  %v740_v25 = vadd.f32 %v739_v21, %v4013_v33  ;;  %v1188_v26 = vpop.f32.mrb[37].mxu1  ;;  %3180 = vmatmul.mubr.msk.f32.gmra.mrb[142].mxu1 %vm370_vm0, %v3381_v22  ;;  %1573 = vmatprep.mubr.f32.mxu0 %v3571_v0 }
 0x180   : > { %2503 = vst [vmem:[%s4026_s25 + $0x480] sm:$0xff] %v738_v19  ;;  %v1189_v27 = vadd.f32 %v1188_v26, %v4017_v35  ;;  %2022 = vmatprep.mubr.f32.mxu1 %v3571_v0 }
 0x181   : > { %2505 = vst [vmem:[%s4026_s25 + $0x490] sm:$0xff] %v1187_v24  ;;  %2504 = vst [vmem:[%s4026_s25 + $0x488] sm:$0xff] %v740_v25  ;;  %v743_v28 = vpop.f32.mrb[38].mxu0 }
 0x182   : > { %2506 = vst [vmem:[%s4026_s25 + $0x498] sm:$0xff] %v1189_v27  ;;  %v744_v29 = vadd.f32 %v743_v28, %v4007_v31  ;;  %v1192_v30 = vpop.f32.mrb[38].mxu1  ;;  %v745_v34 = vpop.f32.mrb[39].mxu0  ;;  %3117 = vmatmul.mubr.msk.f32.gmra.mrb[144].mxu0 %vm370_vm0, %v3382_v36  ;;  %v3388_v28 = vld [vmem:[%s3734_s17 + $0x70] sm:$0xff] }
 0x183   : > { %v1193_v37 = vadd.f32 %v1192_v30, %v4011_v32  ;;  %v746_v38 = vadd.f32 %v745_v34, %v4013_v33  ;;  %v1194_v39 = vpop.f32.mrb[39].mxu1  ;;  %3181 = vmatmul.mubr.msk.f32.gmra.mrb[144].mxu1 %vm370_vm0, %v3382_v36  ;;  %1579 = vmatprep.mubr.f32.mxu0 %v3571_v0 }
 0x184   : > { %2511 = vst [vmem:[%s4026_s25 + $0x4c0] sm:$0xff] %v744_v29  ;;  %v1195_v40 = vadd.f32 %v1194_v39, %v4017_v35  ;;  %2028 = vmatprep.mubr.f32.mxu1 %v3571_v0 }
 0x185   : > { %2513 = vst [vmem:[%s4026_s25 + $0x4d0] sm:$0xff] %v1193_v37  ;;  %2512 = vst [vmem:[%s4026_s25 + $0x4c8] sm:$0xff] %v746_v38  ;;  %v749_v41 = vpop.f32.mrb[40].mxu0 }
 0x186   : > { %2514 = vst [vmem:[%s4026_s25 + $0x4d8] sm:$0xff] %v1195_v40  ;;  %v750_v42 = vadd.f32 %v749_v41, %v4007_v31  ;;  %v1198_v43 = vpop.f32.mrb[40].mxu1  ;;  %v751_v44 = vpop.f32.mrb[41].mxu0  ;;  %3118 = vmatmul.mubr.msk.f32.gmra.mrb[146].mxu0 %vm370_vm0, %v3383_v45  ;;  %v3389_v41 = vld [vmem:[%s3734_s17 + $0x78] sm:$0xff] }
 0x187   : > { %v1199_v46 = vadd.f32 %v1198_v43, %v4011_v32  ;;  %v752_v47 = vadd.f32 %v751_v44, %v4013_v33  ;;  %v1200_v48 = vpop.f32.mrb[41].mxu1  ;;  %3182 = vmatmul.mubr.msk.f32.gmra.mrb[146].mxu1 %vm370_vm0, %v3383_v45  ;;  %1585 = vmatprep.mubr.f32.mxu0 %v3571_v0 }
 0x188   : > { %2519 = vst [vmem:[%s4026_s25 + $0x500] sm:$0xff] %v750_v42  ;;  %v1201_v49 = vadd.f32 %v1200_v48, %v4017_v35  ;;  %2034 = vmatprep.mubr.f32.mxu1 %v3571_v0 }
 0x189   : > { %2521 = vst [vmem:[%s4026_s25 + $0x510] sm:$0xff] %v1199_v46  ;;  %2520 = vst [vmem:[%s4026_s25 + $0x508] sm:$0xff] %v752_v47  ;;  %v755_v50 = vpop.f32.mrb[42].mxu0 }
 0x18a   : > { %2522 = vst [vmem:[%s4026_s25 + $0x518] sm:$0xff] %v1201_v49  ;;  %v756_v51 = vadd.f32 %v755_v50, %v4007_v31  ;;  %v1204_v52 = vpop.f32.mrb[42].mxu1  ;;  %v757_v53 = vpop.f32.mrb[43].mxu0  ;;  %3119 = vmatmul.mubr.msk.f32.gmra.mrb[148].mxu0 %vm370_vm0, %v3384_v54  ;;  %v3390_v50 = vld [vmem:[%s3734_s17 + $0x80] sm:$0xff] }
 0x18b   : > { %v1205_v55 = vadd.f32 %v1204_v52, %v4011_v32  ;;  %v758_v56 = vadd.f32 %v757_v53, %v4013_v33  ;;  %v1206_v57 = vpop.f32.mrb[43].mxu1  ;;  %3183 = vmatmul.mubr.msk.f32.gmra.mrb[148].mxu1 %vm370_vm0, %v3384_v54  ;;  %1591 = vmatprep.mubr.f32.mxu0 %v3571_v0 }
 0x18c   : > { %2527 = vst [vmem:[%s4026_s25 + $0x540] sm:$0xff] %v756_v51  ;;  %v1207_v58 = vadd.f32 %v1206_v57, %v4017_v35  ;;  %2040 = vmatprep.mubr.f32.mxu1 %v3571_v0 }
 0x18d   : > { %2529 = vst [vmem:[%s4026_s25 + $0x550] sm:$0xff] %v1205_v55  ;;  %2528 = vst [vmem:[%s4026_s25 + $0x548] sm:$0xff] %v758_v56  ;;  %v761_v59 = vpop.f32.mrb[44].mxu0 }
 0x18e   : > { %2530 = vst [vmem:[%s4026_s25 + $0x558] sm:$0xff] %v1207_v58  ;;  %v762_v60 = vadd.f32 %v761_v59, %v4007_v31  ;;  %v1210_v61 = vpop.f32.mrb[44].mxu1  ;;  %v763_v62 = vpop.f32.mrb[45].mxu0  ;;  %3120 = vmatmul.mubr.msk.f32.gmra.mrb[150].mxu0 %vm370_vm0, %v3385_v63  ;;  %v3391_v59 = vld [vmem:[%s3734_s17 + $0x88] sm:$0xff] }
 0x18f   : > { %v1211_v1 = vadd.f32 %v1210_v61, %v4011_v32  ;;  %v764_v2 = vadd.f32 %v763_v62, %v4013_v33  ;;  %v1212_v3 = vpop.f32.mrb[45].mxu1  ;;  %3184 = vmatmul.mubr.msk.f32.gmra.mrb[150].mxu1 %vm370_vm0, %v3385_v63  ;;  %1597 = vmatprep.mubr.f32.mxu0 %v3571_v0 }
 0x190   : > { %2535 = vst [vmem:[%s4026_s25 + $0x580] sm:$0xff] %v762_v60  ;;  %v1213_v4 = vadd.f32 %v1212_v3, %v4017_v35  ;;  %2046 = vmatprep.mubr.f32.mxu1 %v3571_v0 }
 0x191   : > { %2537 = vst [vmem:[%s4026_s25 + $0x590] sm:$0xff] %v1211_v1  ;;  %2536 = vst [vmem:[%s4026_s25 + $0x588] sm:$0xff] %v764_v2  ;;  %v767_v5 = vpop.f32.mrb[46].mxu0 }
 0x192   : > { %2538 = vst [vmem:[%s4026_s25 + $0x598] sm:$0xff] %v1213_v4  ;;  %v768_v6 = vadd.f32 %v767_v5, %v4007_v31  ;;  %v1216_v7 = vpop.f32.mrb[46].mxu1  ;;  %v769_v8 = vpop.f32.mrb[47].mxu0  ;;  %3121 = vmatmul.mubr.msk.f32.gmra.mrb[152].mxu0 %vm370_vm0, %v3386_v9  ;;  %v3392_v5 = vld [vmem:[%s3734_s17 + $0x90] sm:$0xff] }
 0x193   : > { %v1217_v10 = vadd.f32 %v1216_v7, %v4011_v32  ;;  %v770_v11 = vadd.f32 %v769_v8, %v4013_v33  ;;  %v1218_v12 = vpop.f32.mrb[47].mxu1  ;;  %3185 = vmatmul.mubr.msk.f32.gmra.mrb[152].mxu1 %vm370_vm0, %v3386_v9  ;;  %1603 = vmatprep.mubr.f32.mxu0 %v3571_v0 }
 0x194   : > { %2543 = vst [vmem:[%s4026_s25 + $0x5c0] sm:$0xff] %v768_v6  ;;  %v1219_v13 = vadd.f32 %v1218_v12, %v4017_v35  ;;  %2052 = vmatprep.mubr.f32.mxu1 %v3571_v0 }
 0x195   : > { %2545 = vst [vmem:[%s4026_s25 + $0x5d0] sm:$0xff] %v1217_v10  ;;  %2544 = vst [vmem:[%s4026_s25 + $0x5c8] sm:$0xff] %v770_v11  ;;  %v773_v14 = vpop.f32.mrb[48].mxu0 }
 0x196   : > { %2546 = vst [vmem:[%s4026_s25 + $0x5d8] sm:$0xff] %v1219_v13  ;;  %v774_v15 = vadd.f32 %v773_v14, %v4007_v31  ;;  %v1222_v16 = vpop.f32.mrb[48].mxu1  ;;  %v775_v17 = vpop.f32.mrb[49].mxu0  ;;  %3122 = vmatmul.mubr.msk.f32.gmra.mrb[154].mxu0 %vm370_vm0, %v3387_v18  ;;  %v3393_v14 = vld [vmem:[%s3734_s17 + $0x98] sm:$0xff] }
 0x197   : > { %v1223_v19 = vadd.f32 %v1222_v16, %v4011_v32  ;;  %v776_v20 = vadd.f32 %v775_v17, %v4013_v33  ;;  %v1224_v21 = vpop.f32.mrb[49].mxu1  ;;  %3186 = vmatmul.mubr.msk.f32.gmra.mrb[154].mxu1 %vm370_vm0, %v3387_v18  ;;  %1609 = vmatprep.mubr.f32.mxu0 %v3571_v0 }
 0x198   : > { %2551 = vst [vmem:[%s4026_s25 + $0x600] sm:$0xff] %v774_v15  ;;  %v1225_v22 = vadd.f32 %v1224_v21, %v4017_v35  ;;  %2058 = vmatprep.mubr.f32.mxu1 %v3571_v0 }
 0x199   : > { %2553 = vst [vmem:[%s4026_s25 + $0x610] sm:$0xff] %v1223_v19  ;;  %2552 = vst [vmem:[%s4026_s25 + $0x608] sm:$0xff] %v776_v20  ;;  %v779_v24 = vpop.f32.mrb[50].mxu0 }
 0x19a   : > { %2554 = vst [vmem:[%s4026_s25 + $0x618] sm:$0xff] %v1225_v22  ;;  %v780_v25 = vadd.f32 %v779_v24, %v4007_v31  ;;  %v1228_v26 = vpop.f32.mrb[50].mxu1  ;;  %v781_v27 = vpop.f32.mrb[51].mxu0  ;;  %3123 = vmatmul.mubr.msk.f32.gmra.mrb[156].mxu0 %vm370_vm0, %v3388_v28  ;;  %v3394_v24 = vld [vmem:[%s3734_s17 + $0xa0] sm:$0xff] }
 0x19b   : > { %v1229_v29 = vadd.f32 %v1228_v26, %v4011_v32  ;;  %v782_v30 = vadd.f32 %v781_v27, %v4013_v33  ;;  %v1230_v34 = vpop.f32.mrb[51].mxu1  ;;  %3187 = vmatmul.mubr.msk.f32.gmra.mrb[156].mxu1 %vm370_vm0, %v3388_v28  ;;  %1615 = vmatprep.mubr.f32.mxu0 %v3571_v0 }
 0x19c   : > { %2559 = vst [vmem:[%s4026_s25 + $0x640] sm:$0xff] %v780_v25  ;;  %v1231_v36 = vadd.f32 %v1230_v34, %v4017_v35  ;;  %2064 = vmatprep.mubr.f32.mxu1 %v3571_v0 }
 0x19d   : > { %2561 = vst [vmem:[%s4026_s25 + $0x650] sm:$0xff] %v1229_v29  ;;  %2560 = vst [vmem:[%s4026_s25 + $0x648] sm:$0xff] %v782_v30  ;;  %v785_v37 = vpop.f32.mrb[52].mxu0 }
 0x19e   : > { %2562 = vst [vmem:[%s4026_s25 + $0x658] sm:$0xff] %v1231_v36  ;;  %v786_v38 = vadd.f32 %v785_v37, %v4007_v31  ;;  %v1234_v39 = vpop.f32.mrb[52].mxu1  ;;  %v787_v40 = vpop.f32.mrb[53].mxu0  ;;  %3124 = vmatmul.mubr.msk.f32.gmra.mrb[158].mxu0 %vm370_vm0, %v3389_v41  ;;  %v3395_v37 = vld [vmem:[%s3734_s17 + $0xa8] sm:$0xff] }
 0x19f   : > { %v1235_v42 = vadd.f32 %v1234_v39, %v4011_v32  ;;  %v788_v43 = vadd.f32 %v787_v40, %v4013_v33  ;;  %v1236_v44 = vpop.f32.mrb[53].mxu1  ;;  %3188 = vmatmul.mubr.msk.f32.gmra.mrb[158].mxu1 %vm370_vm0, %v3389_v41  ;;  %1621 = vmatprep.mubr.f32.mxu0 %v3571_v0 }
 0x1a0   : > { %2567 = vst [vmem:[%s4026_s25 + $0x680] sm:$0xff] %v786_v38  ;;  %v1237_v45 = vadd.f32 %v1236_v44, %v4017_v35  ;;  %2070 = vmatprep.mubr.f32.mxu1 %v3571_v0 }
 0x1a1   : > { %2569 = vst [vmem:[%s4026_s25 + $0x690] sm:$0xff] %v1235_v42  ;;  %2568 = vst [vmem:[%s4026_s25 + $0x688] sm:$0xff] %v788_v43  ;;  %v791_v46 = vpop.f32.mrb[54].mxu0 }
 0x1a2   : > { %2570 = vst [vmem:[%s4026_s25 + $0x698] sm:$0xff] %v1237_v45  ;;  %v792_v47 = vadd.f32 %v791_v46, %v4007_v31  ;;  %v1240_v48 = vpop.f32.mrb[54].mxu1  ;;  %v793_v49 = vpop.f32.mrb[55].mxu0  ;;  %3125 = vmatmul.mubr.msk.f32.gmra.mrb[160].mxu0 %vm370_vm0, %v3390_v50  ;;  %v3396_v46 = vld [vmem:[%s3734_s17 + $0xb0] sm:$0xff] }
 0x1a3   : > { %v1241_v51 = vadd.f32 %v1240_v48, %v4011_v32  ;;  %v794_v52 = vadd.f32 %v793_v49, %v4013_v33  ;;  %v1242_v53 = vpop.f32.mrb[55].mxu1  ;;  %3189 = vmatmul.mubr.msk.f32.gmra.mrb[160].mxu1 %vm370_vm0, %v3390_v50  ;;  %1627 = vmatprep.mubr.f32.mxu0 %v3571_v0 }
 0x1a4   : > { %2575 = vst [vmem:[%s4026_s25 + $0x6c0] sm:$0xff] %v792_v47  ;;  %v1243_v54 = vadd.f32 %v1242_v53, %v4017_v35  ;;  %2076 = vmatprep.mubr.f32.mxu1 %v3571_v0 }
 0x1a5   : > { %2577 = vst [vmem:[%s4026_s25 + $0x6d0] sm:$0xff] %v1241_v51  ;;  %2576 = vst [vmem:[%s4026_s25 + $0x6c8] sm:$0xff] %v794_v52  ;;  %v797_v55 = vpop.f32.mrb[56].mxu0 }
 0x1a6   : > { %2578 = vst [vmem:[%s4026_s25 + $0x6d8] sm:$0xff] %v1243_v54  ;;  %v798_v56 = vadd.f32 %v797_v55, %v4007_v31  ;;  %v1246_v57 = vpop.f32.mrb[56].mxu1  ;;  %v799_v58 = vpop.f32.mrb[57].mxu0  ;;  %3126 = vmatmul.mubr.msk.f32.gmra.mrb[162].mxu0 %vm370_vm0, %v3391_v59  ;;  %v3397_v55 = vld [vmem:[%s3734_s17 + $0xb8] sm:$0xff] }
 0x1a7   : > { %v1247_v60 = vadd.f32 %v1246_v57, %v4011_v32  ;;  %v800_v61 = vadd.f32 %v799_v58, %v4013_v33  ;;  %v1248_v62 = vpop.f32.mrb[57].mxu1  ;;  %3190 = vmatmul.mubr.msk.f32.gmra.mrb[162].mxu1 %vm370_vm0, %v3391_v59  ;;  %1633 = vmatprep.mubr.f32.mxu0 %v3571_v0 }
 0x1a8   : > { %2583 = vst [vmem:[%s4026_s25 + $0x700] sm:$0xff] %v798_v56  ;;  %v1249_v63 = vadd.f32 %v1248_v62, %v4017_v35  ;;  %2082 = vmatprep.mubr.f32.mxu1 %v3571_v0 }
 0x1a9   : > { %2585 = vst [vmem:[%s4026_s25 + $0x710] sm:$0xff] %v1247_v60  ;;  %2584 = vst [vmem:[%s4026_s25 + $0x708] sm:$0xff] %v800_v61  ;;  %v803_v1 = vpop.f32.mrb[58].mxu0 }
 0x1aa   : > { %2586 = vst [vmem:[%s4026_s25 + $0x718] sm:$0xff] %v1249_v63  ;;  %v804_v2 = vadd.f32 %v803_v1, %v4007_v31  ;;  %v1252_v3 = vpop.f32.mrb[58].mxu1  ;;  %v805_v4 = vpop.f32.mrb[59].mxu0  ;;  %3127 = vmatmul.mubr.msk.f32.gmra.mrb[164].mxu0 %vm370_vm0, %v3392_v5  ;;  %v3398_v1 = vld [vmem:[%s3734_s17 + $0xc0] sm:$0xff] }
 0x1ab   : > { %v1253_v6 = vadd.f32 %v1252_v3, %v4011_v32  ;;  %v806_v7 = vadd.f32 %v805_v4, %v4013_v33  ;;  %v1254_v8 = vpop.f32.mrb[59].mxu1  ;;  %3191 = vmatmul.mubr.msk.f32.gmra.mrb[164].mxu1 %vm370_vm0, %v3392_v5  ;;  %1639 = vmatprep.mubr.f32.mxu0 %v3571_v0 }
 0x1ac   : > { %2591 = vst [vmem:[%s4026_s25 + $0x740] sm:$0xff] %v804_v2  ;;  %v1255_v9 = vadd.f32 %v1254_v8, %v4017_v35  ;;  %2088 = vmatprep.mubr.f32.mxu1 %v3571_v0 }
 0x1ad   : > { %2593 = vst [vmem:[%s4026_s25 + $0x750] sm:$0xff] %v1253_v6  ;;  %2592 = vst [vmem:[%s4026_s25 + $0x748] sm:$0xff] %v806_v7  ;;  %v809_v10 = vpop.f32.mrb[60].mxu0 }
 0x1ae   : > { %2594 = vst [vmem:[%s4026_s25 + $0x758] sm:$0xff] %v1255_v9  ;;  %v810_v11 = vadd.f32 %v809_v10, %v4007_v31  ;;  %v1258_v12 = vpop.f32.mrb[60].mxu1  ;;  %v811_v13 = vpop.f32.mrb[61].mxu0  ;;  %3128 = vmatmul.mubr.msk.f32.gmra.mrb[166].mxu0 %vm370_vm0, %v3393_v14  ;;  %v3399_v10 = vld [vmem:[%s3734_s17 + $0xc8] sm:$0xff] }
 0x1af   : > { %v1259_v15 = vadd.f32 %v1258_v12, %v4011_v32  ;;  %v812_v16 = vadd.f32 %v811_v13, %v4013_v33  ;;  %v1260_v17 = vpop.f32.mrb[61].mxu1  ;;  %3192 = vmatmul.mubr.msk.f32.gmra.mrb[166].mxu1 %vm370_vm0, %v3393_v14  ;;  %1645 = vmatprep.mubr.f32.mxu0 %v3571_v0 }
 0x1b0   : > { %2599 = vst [vmem:[%s4026_s25 + $0x780] sm:$0xff] %v810_v11  ;;  %v1261_v18 = vadd.f32 %v1260_v17, %v4017_v35  ;;  %2094 = vmatprep.mubr.f32.mxu1 %v3571_v0 }
 0x1b1   : > { %2601 = vst [vmem:[%s4026_s25 + $0x790] sm:$0xff] %v1259_v15  ;;  %2600 = vst [vmem:[%s4026_s25 + $0x788] sm:$0xff] %v812_v16  ;;  %v815_v19 = vpop.f32.mrb[62].mxu0 }
 0x1b2   : > { %2602 = vst [vmem:[%s4026_s25 + $0x798] sm:$0xff] %v1261_v18  ;;  %v816_v20 = vadd.f32 %v815_v19, %v4007_v31  ;;  %v1264_v21 = vpop.f32.mrb[62].mxu1  ;;  %v817_v22 = vpop.f32.mrb[63].mxu0  ;;  %3129 = vmatmul.mubr.msk.f32.gmra.mrb[168].mxu0 %vm370_vm0, %v3394_v24  ;;  %v3400_v19 = vld [vmem:[%s3734_s17 + $0xd0] sm:$0xff] }
 0x1b3   : > { %v1265_v25 = vadd.f32 %v1264_v21, %v4011_v32  ;;  %v818_v26 = vadd.f32 %v817_v22, %v4013_v33  ;;  %v1266_v27 = vpop.f32.mrb[63].mxu1  ;;  %3193 = vmatmul.mubr.msk.f32.gmra.mrb[168].mxu1 %vm370_vm0, %v3394_v24  ;;  %1651 = vmatprep.mubr.f32.mxu0 %v3571_v0 }
 0x1b4   : > { %2607 = vst [vmem:[%s4026_s25 + $0x7c0] sm:$0xff] %v816_v20  ;;  %v1267_v28 = vadd.f32 %v1266_v27, %v4017_v35  ;;  %2100 = vmatprep.mubr.f32.mxu1 %v3571_v0 }
 0x1b5   : > { %2609 = vst [vmem:[%s4026_s25 + $0x7d0] sm:$0xff] %v1265_v25  ;;  %2608 = vst [vmem:[%s4026_s25 + $0x7c8] sm:$0xff] %v818_v26  ;;  %v821_v29 = vpop.f32.mrb[64].mxu0 }
 0x1b6   : > { %2610 = vst [vmem:[%s4026_s25 + $0x7d8] sm:$0xff] %v1267_v28  ;;  %v822_v30 = vadd.f32 %v821_v29, %v4007_v31  ;;  %v1270_v34 = vpop.f32.mrb[64].mxu1  ;;  %v823_v36 = vpop.f32.mrb[65].mxu0  ;;  %3130 = vmatmul.mubr.msk.f32.gmra.mrb[170].mxu0 %vm370_vm0, %v3395_v37  ;;  %v3401_v29 = vld [vmem:[%s3734_s17 + $0xd8] sm:$0xff] }
 0x1b7   : > { %v1271_v38 = vadd.f32 %v1270_v34, %v4011_v32  ;;  %v824_v39 = vadd.f32 %v823_v36, %v4013_v33  ;;  %v1272_v40 = vpop.f32.mrb[65].mxu1  ;;  %3194 = vmatmul.mubr.msk.f32.gmra.mrb[170].mxu1 %vm370_vm0, %v3395_v37  ;;  %1657 = vmatprep.mubr.f32.mxu0 %v3571_v0 }
 0x1b8   : > { %2615 = vst [vmem:[%s4026_s25 + $0x800] sm:$0xff] %v822_v30  ;;  %v1273_v41 = vadd.f32 %v1272_v40, %v4017_v35  ;;  %2106 = vmatprep.mubr.f32.mxu1 %v3571_v0 }
 0x1b9   : > { %2617 = vst [vmem:[%s4026_s25 + $0x810] sm:$0xff] %v1271_v38  ;;  %2616 = vst [vmem:[%s4026_s25 + $0x808] sm:$0xff] %v824_v39  ;;  %v827_v42 = vpop.f32.mrb[66].mxu0 }
 0x1ba   : > { %2618 = vst [vmem:[%s4026_s25 + $0x818] sm:$0xff] %v1273_v41  ;;  %v828_v43 = vadd.f32 %v827_v42, %v4007_v31  ;;  %v1276_v44 = vpop.f32.mrb[66].mxu1  ;;  %v829_v45 = vpop.f32.mrb[67].mxu0  ;;  %3131 = vmatmul.mubr.msk.f32.gmra.mrb[172].mxu0 %vm370_vm0, %v3396_v46  ;;  %v3402_v42 = vld [vmem:[%s3734_s17 + $0xe0] sm:$0xff] }
 0x1bb   : > { %v1277_v47 = vadd.f32 %v1276_v44, %v4011_v32  ;;  %v830_v48 = vadd.f32 %v829_v45, %v4013_v33  ;;  %v1278_v49 = vpop.f32.mrb[67].mxu1  ;;  %3195 = vmatmul.mubr.msk.f32.gmra.mrb[172].mxu1 %vm370_vm0, %v3396_v46  ;;  %1663 = vmatprep.mubr.f32.mxu0 %v3571_v0 }
 0x1bc   : > { %2623 = vst [vmem:[%s4026_s25 + $0x840] sm:$0xff] %v828_v43  ;;  %v1279_v50 = vadd.f32 %v1278_v49, %v4017_v35  ;;  %2112 = vmatprep.mubr.f32.mxu1 %v3571_v0 }
 0x1bd   : > { %2625 = vst [vmem:[%s4026_s25 + $0x850] sm:$0xff] %v1277_v47  ;;  %2624 = vst [vmem:[%s4026_s25 + $0x848] sm:$0xff] %v830_v48  ;;  %v833_v51 = vpop.f32.mrb[68].mxu0 }
 0x1be   : > { %2626 = vst [vmem:[%s4026_s25 + $0x858] sm:$0xff] %v1279_v50  ;;  %v834_v52 = vadd.f32 %v833_v51, %v4007_v31  ;;  %v1282_v53 = vpop.f32.mrb[68].mxu1  ;;  %v835_v54 = vpop.f32.mrb[69].mxu0  ;;  %3132 = vmatmul.mubr.msk.f32.gmra.mrb[174].mxu0 %vm370_vm0, %v3397_v55  ;;  %v3403_v51 = vld [vmem:[%s3734_s17 + $0xe8] sm:$0xff] }
 0x1bf   : > { %v1283_v56 = vadd.f32 %v1282_v53, %v4011_v32  ;;  %v836_v57 = vadd.f32 %v835_v54, %v4013_v33  ;;  %v1284_v58 = vpop.f32.mrb[69].mxu1  ;;  %3196 = vmatmul.mubr.msk.f32.gmra.mrb[174].mxu1 %vm370_vm0, %v3397_v55  ;;  %1669 = vmatprep.mubr.f32.mxu0 %v3571_v0 }
 0x1c0   : > { %2631 = vst [vmem:[%s4026_s25 + $0x880] sm:$0xff] %v834_v52  ;;  %v1285_v59 = vadd.f32 %v1284_v58, %v4017_v35  ;;  %2118 = vmatprep.mubr.f32.mxu1 %v3571_v0 }
 0x1c1   : > { %2633 = vst [vmem:[%s4026_s25 + $0x890] sm:$0xff] %v1283_v56  ;;  %2632 = vst [vmem:[%s4026_s25 + $0x888] sm:$0xff] %v836_v57  ;;  %v839_v60 = vpop.f32.mrb[70].mxu0 }
 0x1c2   : > { %2634 = vst [vmem:[%s4026_s25 + $0x898] sm:$0xff] %v1285_v59  ;;  %v840_v61 = vadd.f32 %v839_v60, %v4007_v31  ;;  %v1288_v62 = vpop.f32.mrb[70].mxu1  ;;  %v841_v63 = vpop.f32.mrb[71].mxu0  ;;  %3133 = vmatmul.mubr.msk.f32.gmra.mrb[176].mxu0 %vm370_vm0, %v3398_v1  ;;  %v3404_v60 = vld [vmem:[%s3734_s17 + $0xf0] sm:$0xff] }
 0x1c3   : > { %v1289_v2 = vadd.f32 %v1288_v62, %v4011_v32  ;;  %v842_v3 = vadd.f32 %v841_v63, %v4013_v33  ;;  %v1290_v4 = vpop.f32.mrb[71].mxu1  ;;  %3197 = vmatmul.mubr.msk.f32.gmra.mrb[176].mxu1 %vm370_vm0, %v3398_v1  ;;  %1675 = vmatprep.mubr.f32.mxu0 %v3571_v0 }
 0x1c4   : > { %2639 = vst [vmem:[%s4026_s25 + $0x8c0] sm:$0xff] %v840_v61  ;;  %v1291_v5 = vadd.f32 %v1290_v4, %v4017_v35  ;;  %2124 = vmatprep.mubr.f32.mxu1 %v3571_v0 }
 0x1c5   : > { %2641 = vst [vmem:[%s4026_s25 + $0x8d0] sm:$0xff] %v1289_v2  ;;  %2640 = vst [vmem:[%s4026_s25 + $0x8c8] sm:$0xff] %v842_v3  ;;  %v845_v6 = vpop.f32.mrb[72].mxu0 }
 0x1c6   : > { %2642 = vst [vmem:[%s4026_s25 + $0x8d8] sm:$0xff] %v1291_v5  ;;  %v846_v7 = vadd.f32 %v845_v6, %v4007_v31  ;;  %v1294_v8 = vpop.f32.mrb[72].mxu1  ;;  %v847_v9 = vpop.f32.mrb[73].mxu0  ;;  %3134 = vmatmul.mubr.msk.f32.gmra.mrb[178].mxu0 %vm370_vm0, %v3399_v10  ;;  %v3405_v6 = vld [vmem:[%s3734_s17 + $0xf8] sm:$0xff] }
 0x1c7   : > { %v1295_v11 = vadd.f32 %v1294_v8, %v4011_v32  ;;  %v848_v12 = vadd.f32 %v847_v9, %v4013_v33  ;;  %v1296_v13 = vpop.f32.mrb[73].mxu1  ;;  %3198 = vmatmul.mubr.msk.f32.gmra.mrb[178].mxu1 %vm370_vm0, %v3399_v10  ;;  %1681 = vmatprep.mubr.f32.mxu0 %v3571_v0 }
 0x1c8   : > { %2647 = vst [vmem:[%s4026_s25 + $0x900] sm:$0xff] %v846_v7  ;;  %v1297_v14 = vadd.f32 %v1296_v13, %v4017_v35  ;;  %2130 = vmatprep.mubr.f32.mxu1 %v3571_v0 }
 0x1c9   : > { %2649 = vst [vmem:[%s4026_s25 + $0x910] sm:$0xff] %v1295_v11  ;;  %2648 = vst [vmem:[%s4026_s25 + $0x908] sm:$0xff] %v848_v12  ;;  %v851_v15 = vpop.f32.mrb[74].mxu0 }
 0x1ca   : > { %2650 = vst [vmem:[%s4026_s25 + $0x918] sm:$0xff] %v1297_v14  ;;  %v852_v16 = vadd.f32 %v851_v15, %v4007_v31  ;;  %v1300_v17 = vpop.f32.mrb[74].mxu1  ;;  %v853_v18 = vpop.f32.mrb[75].mxu0  ;;  %3135 = vmatmul.mubr.msk.f32.gmra.mrb[180].mxu0 %vm370_vm0, %v3400_v19  ;;  %v3406_v15 = vld [vmem:[%s3734_s17 + $0x100] sm:$0xff] }
 0x1cb   : > { %v1301_v20 = vadd.f32 %v1300_v17, %v4011_v32  ;;  %v854_v21 = vadd.f32 %v853_v18, %v4013_v33  ;;  %v1302_v22 = vpop.f32.mrb[75].mxu1  ;;  %3199 = vmatmul.mubr.msk.f32.gmra.mrb[180].mxu1 %vm370_vm0, %v3400_v19  ;;  %1687 = vmatprep.mubr.f32.mxu0 %v3571_v0 }
 0x1cc   : > { %2655 = vst [vmem:[%s4026_s25 + $0x940] sm:$0xff] %v852_v16  ;;  %v1303_v24 = vadd.f32 %v1302_v22, %v4017_v35  ;;  %2136 = vmatprep.mubr.f32.mxu1 %v3571_v0 }
 0x1cd   : > { %2657 = vst [vmem:[%s4026_s25 + $0x950] sm:$0xff] %v1301_v20  ;;  %2656 = vst [vmem:[%s4026_s25 + $0x948] sm:$0xff] %v854_v21  ;;  %v857_v25 = vpop.f32.mrb[76].mxu0 }
 0x1ce   : > { %2658 = vst [vmem:[%s4026_s25 + $0x958] sm:$0xff] %v1303_v24  ;;  %v858_v26 = vadd.f32 %v857_v25, %v4007_v31  ;;  %v1306_v27 = vpop.f32.mrb[76].mxu1  ;;  %v859_v28 = vpop.f32.mrb[77].mxu0  ;;  %3136 = vmatmul.mubr.msk.f32.gmra.mrb[182].mxu0 %vm370_vm0, %v3401_v29  ;;  %v3407_v25 = vld [vmem:[%s3734_s17 + $0x108] sm:$0xff] }
 0x1cf   : > { %v1307_v30 = vadd.f32 %v1306_v27, %v4011_v32  ;;  %v860_v34 = vadd.f32 %v859_v28, %v4013_v33  ;;  %v1308_v36 = vpop.f32.mrb[77].mxu1  ;;  %3200 = vmatmul.mubr.msk.f32.gmra.mrb[182].mxu1 %vm370_vm0, %v3401_v29  ;;  %1693 = vmatprep.mubr.f32.mxu0 %v3571_v0 }
 0x1d0   : > { %2663 = vst [vmem:[%s4026_s25 + $0x980] sm:$0xff] %v858_v26  ;;  %v1309_v37 = vadd.f32 %v1308_v36, %v4017_v35  ;;  %2142 = vmatprep.mubr.f32.mxu1 %v3571_v0 }
 0x1d1   : > { %2665 = vst [vmem:[%s4026_s25 + $0x990] sm:$0xff] %v1307_v30  ;;  %2664 = vst [vmem:[%s4026_s25 + $0x988] sm:$0xff] %v860_v34  ;;  %v863_v38 = vpop.f32.mrb[78].mxu0 }
 0x1d2   : > { %2666 = vst [vmem:[%s4026_s25 + $0x998] sm:$0xff] %v1309_v37  ;;  %v864_v39 = vadd.f32 %v863_v38, %v4007_v31  ;;  %v1312_v40 = vpop.f32.mrb[78].mxu1  ;;  %v865_v41 = vpop.f32.mrb[79].mxu0  ;;  %3137 = vmatmul.mubr.msk.f32.gmra.mrb[184].mxu0 %vm370_vm0, %v3402_v42  ;;  %v3408_v38 = vld [vmem:[%s3734_s17 + $0x110] sm:$0xff] }
 0x1d3   : > { %v1313_v43 = vadd.f32 %v1312_v40, %v4011_v32  ;;  %v866_v44 = vadd.f32 %v865_v41, %v4013_v33  ;;  %v1314_v45 = vpop.f32.mrb[79].mxu1  ;;  %3201 = vmatmul.mubr.msk.f32.gmra.mrb[184].mxu1 %vm370_vm0, %v3402_v42  ;;  %1699 = vmatprep.mubr.f32.mxu0 %v3571_v0 }
 0x1d4   : > { %2671 = vst [vmem:[%s4026_s25 + $0x9c0] sm:$0xff] %v864_v39  ;;  %v1315_v46 = vadd.f32 %v1314_v45, %v4017_v35  ;;  %2148 = vmatprep.mubr.f32.mxu1 %v3571_v0 }
 0x1d5   : > { %2673 = vst [vmem:[%s4026_s25 + $0x9d0] sm:$0xff] %v1313_v43  ;;  %2672 = vst [vmem:[%s4026_s25 + $0x9c8] sm:$0xff] %v866_v44  ;;  %v869_v47 = vpop.f32.mrb[80].mxu0 }
 0x1d6   : > { %2674 = vst [vmem:[%s4026_s25 + $0x9d8] sm:$0xff] %v1315_v46  ;;  %v870_v48 = vadd.f32 %v869_v47, %v4007_v31  ;;  %v1318_v49 = vpop.f32.mrb[80].mxu1  ;;  %v871_v50 = vpop.f32.mrb[81].mxu0  ;;  %3138 = vmatmul.mubr.msk.f32.gmra.mrb[186].mxu0 %vm370_vm0, %v3403_v51  ;;  %v3409_v47 = vld [vmem:[%s3734_s17 + $0x118] sm:$0xff] }
 0x1d7   : > { %v1319_v52 = vadd.f32 %v1318_v49, %v4011_v32  ;;  %v872_v53 = vadd.f32 %v871_v50, %v4013_v33  ;;  %v1320_v54 = vpop.f32.mrb[81].mxu1  ;;  %3202 = vmatmul.mubr.msk.f32.gmra.mrb[186].mxu1 %vm370_vm0, %v3403_v51  ;;  %1705 = vmatprep.mubr.f32.mxu0 %v3571_v0 }
 0x1d8   : > { %2679 = vst [vmem:[%s4026_s25 + $0xa00] sm:$0xff] %v870_v48  ;;  %v1321_v55 = vadd.f32 %v1320_v54, %v4017_v35  ;;  %2154 = vmatprep.mubr.f32.mxu1 %v3571_v0 }
 0x1d9   : > { %2681 = vst [vmem:[%s4026_s25 + $0xa10] sm:$0xff] %v1319_v52  ;;  %2680 = vst [vmem:[%s4026_s25 + $0xa08] sm:$0xff] %v872_v53  ;;  %v875_v56 = vpop.f32.mrb[82].mxu0 }
 0x1da   : > { %2682 = vst [vmem:[%s4026_s25 + $0xa18] sm:$0xff] %v1321_v55  ;;  %v876_v57 = vadd.f32 %v875_v56, %v4007_v31  ;;  %v1324_v58 = vpop.f32.mrb[82].mxu1  ;;  %v877_v59 = vpop.f32.mrb[83].mxu0  ;;  %3139 = vmatmul.mubr.msk.f32.gmra.mrb[188].mxu0 %vm370_vm0, %v3404_v60  ;;  %v3410_v56 = vld [vmem:[%s3734_s17 + $0x120] sm:$0xff] }
 0x1db   : > { %v1325_v61 = vadd.f32 %v1324_v58, %v4011_v32  ;;  %v878_v62 = vadd.f32 %v877_v59, %v4013_v33  ;;  %v1326_v63 = vpop.f32.mrb[83].mxu1  ;;  %3203 = vmatmul.mubr.msk.f32.gmra.mrb[188].mxu1 %vm370_vm0, %v3404_v60  ;;  %1711 = vmatprep.mubr.f32.mxu0 %v3571_v0 }
 0x1dc   : > { %2687 = vst [vmem:[%s4026_s25 + $0xa40] sm:$0xff] %v876_v57  ;;  %v1327_v1 = vadd.f32 %v1326_v63, %v4017_v35  ;;  %2160 = vmatprep.mubr.f32.mxu1 %v3571_v0 }
 0x1dd   : > { %2689 = vst [vmem:[%s4026_s25 + $0xa50] sm:$0xff] %v1325_v61  ;;  %2688 = vst [vmem:[%s4026_s25 + $0xa48] sm:$0xff] %v878_v62  ;;  %v881_v2 = vpop.f32.mrb[84].mxu0 }
 0x1de   : > { %2690 = vst [vmem:[%s4026_s25 + $0xa58] sm:$0xff] %v1327_v1  ;;  %v882_v3 = vadd.f32 %v881_v2, %v4007_v31  ;;  %v1330_v4 = vpop.f32.mrb[84].mxu1  ;;  %v883_v5 = vpop.f32.mrb[85].mxu0  ;;  %3140 = vmatmul.mubr.msk.f32.gmra.mrb[190].mxu0 %vm370_vm0, %v3405_v6  ;;  %v3411_v2 = vld [vmem:[%s3734_s17 + $0x128] sm:$0xff] }
 0x1df   : > { %v1331_v7 = vadd.f32 %v1330_v4, %v4011_v32  ;;  %v884_v8 = vadd.f32 %v883_v5, %v4013_v33  ;;  %v1332_v9 = vpop.f32.mrb[85].mxu1  ;;  %3204 = vmatmul.mubr.msk.f32.gmra.mrb[190].mxu1 %vm370_vm0, %v3405_v6  ;;  %1717 = vmatprep.mubr.f32.mxu0 %v3571_v0 }
 0x1e0   : > { %2695 = vst [vmem:[%s4026_s25 + $0xa80] sm:$0xff] %v882_v3  ;;  %v1333_v10 = vadd.f32 %v1332_v9, %v4017_v35  ;;  %2166 = vmatprep.mubr.f32.mxu1 %v3571_v0 }
 0x1e1   : > { %2697 = vst [vmem:[%s4026_s25 + $0xa90] sm:$0xff] %v1331_v7  ;;  %2696 = vst [vmem:[%s4026_s25 + $0xa88] sm:$0xff] %v884_v8  ;;  %v887_v11 = vpop.f32.mrb[86].mxu0 }
 0x1e2   : > { %2698 = vst [vmem:[%s4026_s25 + $0xa98] sm:$0xff] %v1333_v10  ;;  %v888_v12 = vadd.f32 %v887_v11, %v4007_v31  ;;  %v1336_v13 = vpop.f32.mrb[86].mxu1  ;;  %v889_v14 = vpop.f32.mrb[87].mxu0  ;;  %3141 = vmatmul.mubr.msk.f32.gmra.mrb[192].mxu0 %vm370_vm0, %v3406_v15  ;;  %v3412_v11 = vld [vmem:[%s3734_s17 + $0x130] sm:$0xff] }
 0x1e3   : > { %v1337_v16 = vadd.f32 %v1336_v13, %v4011_v32  ;;  %v890_v17 = vadd.f32 %v889_v14, %v4013_v33  ;;  %v1338_v18 = vpop.f32.mrb[87].mxu1  ;;  %3205 = vmatmul.mubr.msk.f32.gmra.mrb[192].mxu1 %vm370_vm0, %v3406_v15  ;;  %1723 = vmatprep.mubr.f32.mxu0 %v3571_v0 }
 0x1e4   : > { %2703 = vst [vmem:[%s4026_s25 + $0xac0] sm:$0xff] %v888_v12  ;;  %v1339_v19 = vadd.f32 %v1338_v18, %v4017_v35  ;;  %2172 = vmatprep.mubr.f32.mxu1 %v3571_v0 }
 0x1e5   : > { %2705 = vst [vmem:[%s4026_s25 + $0xad0] sm:$0xff] %v1337_v16  ;;  %2704 = vst [vmem:[%s4026_s25 + $0xac8] sm:$0xff] %v890_v17  ;;  %v893_v20 = vpop.f32.mrb[88].mxu0 }
 0x1e6   : > { %2706 = vst [vmem:[%s4026_s25 + $0xad8] sm:$0xff] %v1339_v19  ;;  %v894_v21 = vadd.f32 %v893_v20, %v4007_v31  ;;  %v1342_v22 = vpop.f32.mrb[88].mxu1  ;;  %v895_v24 = vpop.f32.mrb[89].mxu0  ;;  %3142 = vmatmul.mubr.msk.f32.gmra.mrb[194].mxu0 %vm370_vm0, %v3407_v25  ;;  %v3413_v20 = vld [vmem:[%s3734_s17 + $0x138] sm:$0xff] }
 0x1e7   : > { %v1343_v26 = vadd.f32 %v1342_v22, %v4011_v32  ;;  %v896_v27 = vadd.f32 %v895_v24, %v4013_v33  ;;  %v1344_v28 = vpop.f32.mrb[89].mxu1  ;;  %3206 = vmatmul.mubr.msk.f32.gmra.mrb[194].mxu1 %vm370_vm0, %v3407_v25  ;;  %1729 = vmatprep.mubr.f32.mxu0 %v3571_v0 }
 0x1e8   : > { %2711 = vst [vmem:[%s4026_s25 + $0xb00] sm:$0xff] %v894_v21  ;;  %v1345_v29 = vadd.f32 %v1344_v28, %v4017_v35  ;;  %2178 = vmatprep.mubr.f32.mxu1 %v3571_v0 }
 0x1e9   : > { %2713 = vst [vmem:[%s4026_s25 + $0xb10] sm:$0xff] %v1343_v26  ;;  %2712 = vst [vmem:[%s4026_s25 + $0xb08] sm:$0xff] %v896_v27  ;;  %v899_v30 = vpop.f32.mrb[90].mxu0 }
 0x1ea   : > { %2714 = vst [vmem:[%s4026_s25 + $0xb18] sm:$0xff] %v1345_v29  ;;  %v900_v34 = vadd.f32 %v899_v30, %v4007_v31  ;;  %v1348_v36 = vpop.f32.mrb[90].mxu1  ;;  %v901_v37 = vpop.f32.mrb[91].mxu0  ;;  %3143 = vmatmul.mubr.msk.f32.gmra.mrb[196].mxu0 %vm370_vm0, %v3408_v38  ;;  %v3414_v30 = vld [vmem:[%s3734_s17 + $0x140] sm:$0xff] }
 0x1eb   : > { %v1349_v39 = vadd.f32 %v1348_v36, %v4011_v32  ;;  %v902_v40 = vadd.f32 %v901_v37, %v4013_v33  ;;  %v1350_v41 = vpop.f32.mrb[91].mxu1  ;;  %3207 = vmatmul.mubr.msk.f32.gmra.mrb[196].mxu1 %vm370_vm0, %v3408_v38  ;;  %1735 = vmatprep.mubr.f32.mxu0 %v3571_v0 }
 0x1ec   : > { %2719 = vst [vmem:[%s4026_s25 + $0xb40] sm:$0xff] %v900_v34  ;;  %v1351_v42 = vadd.f32 %v1350_v41, %v4017_v35  ;;  %2184 = vmatprep.mubr.f32.mxu1 %v3571_v0 }
 0x1ed   : > { %2721 = vst [vmem:[%s4026_s25 + $0xb50] sm:$0xff] %v1349_v39  ;;  %2720 = vst [vmem:[%s4026_s25 + $0xb48] sm:$0xff] %v902_v40  ;;  %v905_v43 = vpop.f32.mrb[92].mxu0 }
 0x1ee   : > { %2722 = vst [vmem:[%s4026_s25 + $0xb58] sm:$0xff] %v1351_v42  ;;  %v906_v44 = vadd.f32 %v905_v43, %v4007_v31  ;;  %v1354_v45 = vpop.f32.mrb[92].mxu1  ;;  %v907_v46 = vpop.f32.mrb[93].mxu0  ;;  %3144 = vmatmul.mubr.msk.f32.gmra.mrb[198].mxu0 %vm370_vm0, %v3409_v47  ;;  %v3415_v43 = vld [vmem:[%s3734_s17 + $0x148] sm:$0xff] }
 0x1ef   : > { %v1355_v48 = vadd.f32 %v1354_v45, %v4011_v32  ;;  %v908_v49 = vadd.f32 %v907_v46, %v4013_v33  ;;  %v1356_v50 = vpop.f32.mrb[93].mxu1  ;;  %3208 = vmatmul.mubr.msk.f32.gmra.mrb[198].mxu1 %vm370_vm0, %v3409_v47  ;;  %1741 = vmatprep.mubr.f32.mxu0 %v3571_v0 }
 0x1f0   : > { %2727 = vst [vmem:[%s4026_s25 + $0xb80] sm:$0xff] %v906_v44  ;;  %v1357_v51 = vadd.f32 %v1356_v50, %v4017_v35  ;;  %2190 = vmatprep.mubr.f32.mxu1 %v3571_v0 }
 0x1f1   : > { %2729 = vst [vmem:[%s4026_s25 + $0xb90] sm:$0xff] %v1355_v48  ;;  %2728 = vst [vmem:[%s4026_s25 + $0xb88] sm:$0xff] %v908_v49  ;;  %v911_v52 = vpop.f32.mrb[94].mxu0 }
 0x1f2   : > { %2730 = vst [vmem:[%s4026_s25 + $0xb98] sm:$0xff] %v1357_v51  ;;  %v912_v53 = vadd.f32 %v911_v52, %v4007_v31  ;;  %v1360_v54 = vpop.f32.mrb[94].mxu1  ;;  %v913_v55 = vpop.f32.mrb[95].mxu0  ;;  %3145 = vmatmul.mubr.msk.f32.gmra.mrb[200].mxu0 %vm370_vm0, %v3410_v56  ;;  %v3416_v52 = vld [vmem:[%s3734_s17 + $0x150] sm:$0xff] }
 0x1f3   : > { %v1361_v57 = vadd.f32 %v1360_v54, %v4011_v32  ;;  %v914_v58 = vadd.f32 %v913_v55, %v4013_v33  ;;  %v1362_v59 = vpop.f32.mrb[95].mxu1  ;;  %3209 = vmatmul.mubr.msk.f32.gmra.mrb[200].mxu1 %vm370_vm0, %v3410_v56  ;;  %1747 = vmatprep.mubr.f32.mxu0 %v3571_v0 }
 0x1f4   : > { %2735 = vst [vmem:[%s4026_s25 + $0xbc0] sm:$0xff] %v912_v53  ;;  %v1363_v60 = vadd.f32 %v1362_v59, %v4017_v35  ;;  %2196 = vmatprep.mubr.f32.mxu1 %v3571_v0 }
 0x1f5   : > { %2737 = vst [vmem:[%s4026_s25 + $0xbd0] sm:$0xff] %v1361_v57  ;;  %2736 = vst [vmem:[%s4026_s25 + $0xbc8] sm:$0xff] %v914_v58  ;;  %v917_v61 = vpop.f32.mrb[96].mxu0 }
 0x1f6   : > { %2738 = vst [vmem:[%s4026_s25 + $0xbd8] sm:$0xff] %v1363_v60  ;;  %v918_v62 = vadd.f32 %v917_v61, %v4007_v31  ;;  %v1366_v63 = vpop.f32.mrb[96].mxu1  ;;  %v919_v1 = vpop.f32.mrb[97].mxu0  ;;  %3146 = vmatmul.mubr.msk.f32.gmra.mrb[202].mxu0 %vm370_vm0, %v3411_v2  ;;  %v3417_v61 = vld [vmem:[%s3734_s17 + $0x158] sm:$0xff] }
 0x1f7   : > { %v1367_v3 = vadd.f32 %v1366_v63, %v4011_v32  ;;  %v920_v4 = vadd.f32 %v919_v1, %v4013_v33  ;;  %v1368_v5 = vpop.f32.mrb[97].mxu1  ;;  %3210 = vmatmul.mubr.msk.f32.gmra.mrb[202].mxu1 %vm370_vm0, %v3411_v2  ;;  %1753 = vmatprep.mubr.f32.mxu0 %v3571_v0 }
 0x1f8   : > { %2743 = vst [vmem:[%s4026_s25 + $0xc00] sm:$0xff] %v918_v62  ;;  %v1369_v6 = vadd.f32 %v1368_v5, %v4017_v35  ;;  %2202 = vmatprep.mubr.f32.mxu1 %v3571_v0 }
 0x1f9   : > { %2745 = vst [vmem:[%s4026_s25 + $0xc10] sm:$0xff] %v1367_v3  ;;  %2744 = vst [vmem:[%s4026_s25 + $0xc08] sm:$0xff] %v920_v4  ;;  %v923_v7 = vpop.f32.mrb[98].mxu0 }
 0x1fa   : > { %2746 = vst [vmem:[%s4026_s25 + $0xc18] sm:$0xff] %v1369_v6  ;;  %v924_v8 = vadd.f32 %v923_v7, %v4007_v31  ;;  %v1372_v9 = vpop.f32.mrb[98].mxu1  ;;  %v925_v10 = vpop.f32.mrb[99].mxu0  ;;  %3147 = vmatmul.mubr.msk.f32.gmra.mrb[204].mxu0 %vm370_vm0, %v3412_v11  ;;  %v3418_v7 = vld [vmem:[%s3734_s17 + $0x160] sm:$0xff] }
 0x1fb   : > { %v1373_v12 = vadd.f32 %v1372_v9, %v4011_v32  ;;  %v926_v13 = vadd.f32 %v925_v10, %v4013_v33  ;;  %v1374_v14 = vpop.f32.mrb[99].mxu1  ;;  %3211 = vmatmul.mubr.msk.f32.gmra.mrb[204].mxu1 %vm370_vm0, %v3412_v11  ;;  %1759 = vmatprep.mubr.f32.mxu0 %v3571_v0 }
 0x1fc   : > { %2751 = vst [vmem:[%s4026_s25 + $0xc40] sm:$0xff] %v924_v8  ;;  %v1375_v15 = vadd.f32 %v1374_v14, %v4017_v35  ;;  %2208 = vmatprep.mubr.f32.mxu1 %v3571_v0 }
 0x1fd   : > { %2753 = vst [vmem:[%s4026_s25 + $0xc50] sm:$0xff] %v1373_v12  ;;  %2752 = vst [vmem:[%s4026_s25 + $0xc48] sm:$0xff] %v926_v13  ;;  %v929_v16 = vpop.f32.mrb[100].mxu0 }
 0x1fe   : > { %2754 = vst [vmem:[%s4026_s25 + $0xc58] sm:$0xff] %v1375_v15  ;;  %v930_v17 = vadd.f32 %v929_v16, %v4007_v31  ;;  %v1378_v18 = vpop.f32.mrb[100].mxu1  ;;  %v931_v19 = vpop.f32.mrb[101].mxu0  ;;  %3148 = vmatmul.mubr.msk.f32.gmra.mrb[206].mxu0 %vm370_vm0, %v3413_v20  ;;  %v3419_v16 = vld [vmem:[%s3734_s17 + $0x168] sm:$0xff] }
 0x1ff   : > { %v1379_v21 = vadd.f32 %v1378_v18, %v4011_v32  ;;  %v932_v22 = vadd.f32 %v931_v19, %v4013_v33  ;;  %v1380_v24 = vpop.f32.mrb[101].mxu1  ;;  %3212 = vmatmul.mubr.msk.f32.gmra.mrb[206].mxu1 %vm370_vm0, %v3413_v20  ;;  %1765 = vmatprep.mubr.f32.mxu0 %v3571_v0 }
 0x200   : > { %2759 = vst [vmem:[%s4026_s25 + $0xc80] sm:$0xff] %v930_v17  ;;  %v1381_v25 = vadd.f32 %v1380_v24, %v4017_v35  ;;  %2214 = vmatprep.mubr.f32.mxu1 %v3571_v0 }
 0x201   : > { %2761 = vst [vmem:[%s4026_s25 + $0xc90] sm:$0xff] %v1379_v21  ;;  %2760 = vst [vmem:[%s4026_s25 + $0xc88] sm:$0xff] %v932_v22  ;;  %v935_v26 = vpop.f32.mrb[102].mxu0 }
 0x202   : > { %2762 = vst [vmem:[%s4026_s25 + $0xc98] sm:$0xff] %v1381_v25  ;;  %v936_v27 = vadd.f32 %v935_v26, %v4007_v31  ;;  %v1384_v28 = vpop.f32.mrb[102].mxu1  ;;  %v937_v29 = vpop.f32.mrb[103].mxu0  ;;  %3149 = vmatmul.mubr.msk.f32.gmra.mrb[208].mxu0 %vm370_vm0, %v3414_v30  ;;  %v3420_v26 = vld [vmem:[%s3734_s17 + $0x170] sm:$0xff] }
 0x203   : > { %v1385_v34 = vadd.f32 %v1384_v28, %v4011_v32  ;;  %v938_v36 = vadd.f32 %v937_v29, %v4013_v33  ;;  %v1386_v37 = vpop.f32.mrb[103].mxu1  ;;  %3213 = vmatmul.mubr.msk.f32.gmra.mrb[208].mxu1 %vm370_vm0, %v3414_v30  ;;  %1771 = vmatprep.mubr.f32.mxu0 %v3571_v0 }
 0x204   : > { %2767 = vst [vmem:[%s4026_s25 + $0xcc0] sm:$0xff] %v936_v27  ;;  %v1387_v38 = vadd.f32 %v1386_v37, %v4017_v35  ;;  %2220 = vmatprep.mubr.f32.mxu1 %v3571_v0 }
 0x205   : > { %2769 = vst [vmem:[%s4026_s25 + $0xcd0] sm:$0xff] %v1385_v34  ;;  %2768 = vst [vmem:[%s4026_s25 + $0xcc8] sm:$0xff] %v938_v36  ;;  %v941_v39 = vpop.f32.mrb[104].mxu0 }
 0x206   : > { %2770 = vst [vmem:[%s4026_s25 + $0xcd8] sm:$0xff] %v1387_v38  ;;  %v942_v40 = vadd.f32 %v941_v39, %v4007_v31  ;;  %v1390_v41 = vpop.f32.mrb[104].mxu1  ;;  %v943_v42 = vpop.f32.mrb[105].mxu0  ;;  %3150 = vmatmul.mubr.msk.f32.gmra.mrb[210].mxu0 %vm370_vm0, %v3415_v43  ;;  %v3421_v39 = vld [vmem:[%s3734_s17 + $0x178] sm:$0xff] }
 0x207   : > { %v1391_v44 = vadd.f32 %v1390_v41, %v4011_v32  ;;  %v944_v45 = vadd.f32 %v943_v42, %v4013_v33  ;;  %v1392_v46 = vpop.f32.mrb[105].mxu1  ;;  %3214 = vmatmul.mubr.msk.f32.gmra.mrb[210].mxu1 %vm370_vm0, %v3415_v43  ;;  %1777 = vmatprep.mubr.f32.mxu0 %v3571_v0 }
 0x208   : > { %2775 = vst [vmem:[%s4026_s25 + $0xd00] sm:$0xff] %v942_v40  ;;  %v1393_v47 = vadd.f32 %v1392_v46, %v4017_v35  ;;  %2226 = vmatprep.mubr.f32.mxu1 %v3571_v0 }
 0x209   : > { %2777 = vst [vmem:[%s4026_s25 + $0xd10] sm:$0xff] %v1391_v44  ;;  %2776 = vst [vmem:[%s4026_s25 + $0xd08] sm:$0xff] %v944_v45  ;;  %v947_v48 = vpop.f32.mrb[106].mxu0 }
 0x20a   : > { %2778 = vst [vmem:[%s4026_s25 + $0xd18] sm:$0xff] %v1393_v47  ;;  %v948_v49 = vadd.f32 %v947_v48, %v4007_v31  ;;  %v1396_v50 = vpop.f32.mrb[106].mxu1  ;;  %v949_v51 = vpop.f32.mrb[107].mxu0  ;;  %3151 = vmatmul.mubr.msk.f32.gmra.mrb[212].mxu0 %vm370_vm0, %v3416_v52  ;;  %v3422_v48 = vld [vmem:[%s3734_s17 + $0x180] sm:$0xff] }
 0x20b   : > { %v1397_v53 = vadd.f32 %v1396_v50, %v4011_v32  ;;  %v950_v54 = vadd.f32 %v949_v51, %v4013_v33  ;;  %v1398_v55 = vpop.f32.mrb[107].mxu1  ;;  %3215 = vmatmul.mubr.msk.f32.gmra.mrb[212].mxu1 %vm370_vm0, %v3416_v52  ;;  %1783 = vmatprep.mubr.f32.mxu0 %v3571_v0 }
 0x20c   : > { %2783 = vst [vmem:[%s4026_s25 + $0xd40] sm:$0xff] %v948_v49  ;;  %v1399_v56 = vadd.f32 %v1398_v55, %v4017_v35  ;;  %2232 = vmatprep.mubr.f32.mxu1 %v3571_v0 }
 0x20d   : > { %2785 = vst [vmem:[%s4026_s25 + $0xd50] sm:$0xff] %v1397_v53  ;;  %2784 = vst [vmem:[%s4026_s25 + $0xd48] sm:$0xff] %v950_v54  ;;  %v953_v57 = vpop.f32.mrb[108].mxu0 }
 0x20e   : > { %2786 = vst [vmem:[%s4026_s25 + $0xd58] sm:$0xff] %v1399_v56  ;;  %v954_v58 = vadd.f32 %v953_v57, %v4007_v31  ;;  %v1402_v59 = vpop.f32.mrb[108].mxu1  ;;  %v955_v60 = vpop.f32.mrb[109].mxu0  ;;  %3152 = vmatmul.mubr.msk.f32.gmra.mrb[214].mxu0 %vm370_vm0, %v3417_v61  ;;  %v3423_v57 = vld [vmem:[%s3734_s17 + $0x188] sm:$0xff] }
 0x20f   : > { %v1403_v62 = vadd.f32 %v1402_v59, %v4011_v32  ;;  %v956_v63 = vadd.f32 %v955_v60, %v4013_v33  ;;  %v1404_v1 = vpop.f32.mrb[109].mxu1  ;;  %3216 = vmatmul.mubr.msk.f32.gmra.mrb[214].mxu1 %vm370_vm0, %v3417_v61  ;;  %1789 = vmatprep.mubr.f32.mxu0 %v3571_v0 }
 0x210   : > { %2791 = vst [vmem:[%s4026_s25 + $0xd80] sm:$0xff] %v954_v58  ;;  %v1405_v2 = vadd.f32 %v1404_v1, %v4017_v35  ;;  %2238 = vmatprep.mubr.f32.mxu1 %v3571_v0 }
 0x211   : > { %2793 = vst [vmem:[%s4026_s25 + $0xd90] sm:$0xff] %v1403_v62  ;;  %2792 = vst [vmem:[%s4026_s25 + $0xd88] sm:$0xff] %v956_v63  ;;  %v959_v3 = vpop.f32.mrb[110].mxu0 }
 0x212   : > { %2794 = vst [vmem:[%s4026_s25 + $0xd98] sm:$0xff] %v1405_v2  ;;  %v960_v4 = vadd.f32 %v959_v3, %v4007_v31  ;;  %v1408_v5 = vpop.f32.mrb[110].mxu1  ;;  %v961_v6 = vpop.f32.mrb[111].mxu0  ;;  %3153 = vmatmul.mubr.msk.f32.gmra.mrb[216].mxu0 %vm370_vm0, %v3418_v7  ;;  %v3424_v3 = vld [vmem:[%s3734_s17 + $0x190] sm:$0xff] }
 0x213   : > { %v1409_v8 = vadd.f32 %v1408_v5, %v4011_v32  ;;  %v962_v9 = vadd.f32 %v961_v6, %v4013_v33  ;;  %v1410_v10 = vpop.f32.mrb[111].mxu1  ;;  %3217 = vmatmul.mubr.msk.f32.gmra.mrb[216].mxu1 %vm370_vm0, %v3418_v7  ;;  %1795 = vmatprep.mubr.f32.mxu0 %v3571_v0 }
 0x214   : > { %2799 = vst [vmem:[%s4026_s25 + $0xdc0] sm:$0xff] %v960_v4  ;;  %v1411_v11 = vadd.f32 %v1410_v10, %v4017_v35  ;;  %2244 = vmatprep.mubr.f32.mxu1 %v3571_v0 }
 0x215   : > { %2801 = vst [vmem:[%s4026_s25 + $0xdd0] sm:$0xff] %v1409_v8  ;;  %2800 = vst [vmem:[%s4026_s25 + $0xdc8] sm:$0xff] %v962_v9  ;;  %v965_v12 = vpop.f32.mrb[112].mxu0 }
 0x216   : > { %2802 = vst [vmem:[%s4026_s25 + $0xdd8] sm:$0xff] %v1411_v11  ;;  %v966_v13 = vadd.f32 %v965_v12, %v4007_v31  ;;  %v1414_v14 = vpop.f32.mrb[112].mxu1  ;;  %v967_v15 = vpop.f32.mrb[113].mxu0  ;;  %3154 = vmatmul.mubr.msk.f32.gmra.mrb[218].mxu0 %vm370_vm0, %v3419_v16  ;;  %v3425_v12 = vld [vmem:[%s3734_s17 + $0x198] sm:$0xff] }
 0x217   : > { %v1415_v17 = vadd.f32 %v1414_v14, %v4011_v32  ;;  %v968_v18 = vadd.f32 %v967_v15, %v4013_v33  ;;  %v1416_v19 = vpop.f32.mrb[113].mxu1  ;;  %3218 = vmatmul.mubr.msk.f32.gmra.mrb[218].mxu1 %vm370_vm0, %v3419_v16  ;;  %1801 = vmatprep.mubr.f32.mxu0 %v3571_v0  ;;  %v356_v14 = vsub.s32 6, %v3988_v23 }
 0x218   : > { %2807 = vst [vmem:[%s4026_s25 + $0xe00] sm:$0xff] %v966_v13  ;;  %v1417_v20 = vadd.f32 %v1416_v19, %v4017_v35  ;;  %2250 = vmatprep.mubr.f32.mxu1 %v3571_v0  ;;  %v348_v13 = vsub.s32 4, %v3988_v23 }
 0x219   : > { %2809 = vst [vmem:[%s4026_s25 + $0xe10] sm:$0xff] %v1415_v17  ;;  %2808 = vst [vmem:[%s4026_s25 + $0xe08] sm:$0xff] %v968_v18  ;;  %v971_v21 = vpop.f32.mrb[114].mxu0  ;;  %v352_v18 = vsub.s32 5, %v3988_v23 }
 0x21a   : > { %2810 = vst [vmem:[%s4026_s25 + $0xe18] sm:$0xff] %v1417_v20  ;;  %v972_v22 = vadd.f32 %v971_v21, %v4007_v31  ;;  %v1420_v24 = vpop.f32.mrb[114].mxu1  ;;  %v973_v25 = vpop.f32.mrb[115].mxu0  ;;  %3155 = vmatmul.mubr.msk.f32.gmra.mrb[220].mxu0 %vm370_vm0, %v3420_v26  ;;  %v360_v20 = vsub.s32 7, %v3988_v23 }
 0x21b   : > { %v1421_v27 = vadd.f32 %v1420_v24, %v4011_v32  ;;  %v974_v28 = vadd.f32 %v973_v25, %v4013_v33  ;;  %v1422_v29 = vpop.f32.mrb[115].mxu1  ;;  %3219 = vmatmul.mubr.msk.f32.gmra.mrb[220].mxu1 %vm370_vm0, %v3420_v26  ;;  %1807 = vmatprep.mubr.f32.mxu0 %v3571_v0  ;;  %v3426_v26 = vld [vmem:[%s3734_s17 + $0x1a0] sm:$0xff] }
 0x21c   : > { %2815 = vst [vmem:[%s4026_s25 + $0xe40] sm:$0xff] %v972_v22  ;;  %v1423_v30 = vadd.f32 %v1422_v29, %v4017_v35  ;;  %2256 = vmatprep.mubr.f32.mxu1 %v3571_v0 }
 0x21d   : > { %2817 = vst [vmem:[%s4026_s25 + $0xe50] sm:$0xff] %v1421_v27  ;;  %2816 = vst [vmem:[%s4026_s25 + $0xe48] sm:$0xff] %v974_v28  ;;  %v977_v34 = vpop.f32.mrb[116].mxu0  ;;  %v3427_v27 = vld [vmem:[#allocation5] sm:$0xff] }
 0x21e   : > { %2818 = vst [vmem:[%s4026_s25 + $0xe58] sm:$0xff] %v1423_v30  ;;  %v978_v36 = vadd.f32 %v977_v34, %v4007_v31  ;;  %v1426_v37 = vpop.f32.mrb[116].mxu1  ;;  %v979_v38 = vpop.f32.mrb[117].mxu0  ;;  %3156 = vmatmul.mubr.msk.f32.gmra.mrb[222].mxu0 %vm370_vm0, %v3421_v39  ;;  %v4846_v28 = vrot.slane %v3427_v27, %v348_v13  ;;  %v4848_v29 = vrot.slane %v3427_v27, %v356_v14 }
 0x21f   : > { %v1427_v40 = vadd.f32 %v1426_v37, %v4011_v32  ;;  %v980_v41 = vadd.f32 %v979_v38, %v4013_v33  ;;  %v1428_v42 = vpop.f32.mrb[117].mxu1  ;;  %3220 = vmatmul.mubr.msk.f32.gmra.mrb[222].mxu1 %vm370_vm0, %v3421_v39  ;;  %1813 = vmatprep.mubr.f32.mxu0 %v3571_v0  ;;  %v4859_v37 = vrot.slane %v3427_v27, %v360_v20 }
 0x220   : > { %2823 = vst [vmem:[%s4026_s25 + $0xe80] sm:$0xff] %v978_v36  ;;  %v1429_v43 = vadd.f32 %v1428_v42, %v4017_v35  ;;  %2262 = vmatprep.mubr.f32.mxu1 %v3571_v0 }
 0x221   : > { %2825 = vst [vmem:[%s4026_s25 + $0xe90] sm:$0xff] %v1427_v40  ;;  %2824 = vst [vmem:[%s4026_s25 + $0xe88] sm:$0xff] %v980_v41  ;;  %v983_v44 = vpop.f32.mrb[118].mxu0  ;;  %v3428_v40 = vld [vmem:[%s3734_s17 + $0x1a8] sm:$0xff] }
 0x222   : > { %2826 = vst [vmem:[%s4026_s25 + $0xe98] sm:$0xff] %v1429_v43  ;;  %v984_v45 = vadd.f32 %v983_v44, %v4007_v31  ;;  %v1432_v46 = vpop.f32.mrb[118].mxu1  ;;  %v985_v47 = vpop.f32.mrb[119].mxu0  ;;  %3157 = vmatmul.mubr.msk.f32.gmra.mrb[224].mxu0 %vm370_vm0, %v3422_v48 }
 0x223   : > { %v1433_v49 = vadd.f32 %v1432_v46, %v4011_v32  ;;  %v986_v50 = vadd.f32 %v985_v47, %v4013_v33  ;;  %v1434_v51 = vpop.f32.mrb[119].mxu1  ;;  %3221 = vmatmul.mubr.msk.f32.gmra.mrb[224].mxu1 %vm370_vm0, %v3422_v48  ;;  %1819 = vmatprep.mubr.f32.mxu0 %v3571_v0  ;;  %v3429_v48 = vld [vmem:[%s3734_s17 + $0x1b0] sm:$0xff] }
 0x224   : > { %2831 = vst [vmem:[%s4026_s25 + $0xec0] sm:$0xff] %v984_v45  ;;  %v1435_v52 = vadd.f32 %v1434_v51, %v4017_v35  ;;  %2268 = vmatprep.mubr.f32.mxu1 %v3571_v0 }
 0x225   : > { %2833 = vst [vmem:[%s4026_s25 + $0xed0] sm:$0xff] %v1433_v49  ;;  %2832 = vst [vmem:[%s4026_s25 + $0xec8] sm:$0xff] %v986_v50  ;;  %v989_v53 = vpop.f32.mrb[120].mxu0 }
 0x226   : > { %2834 = vst [vmem:[%s4026_s25 + $0xed8] sm:$0xff] %v1435_v52  ;;  %v990_v54 = vadd.f32 %v989_v53, %v4007_v31  ;;  %v1438_v55 = vpop.f32.mrb[120].mxu1  ;;  %v991_v56 = vpop.f32.mrb[121].mxu0  ;;  %3158 = vmatmul.mubr.msk.f32.gmra.mrb[226].mxu0 %vm370_vm0, %v3423_v57 }
 0x227   : > { %v1439_v58 = vadd.f32 %v1438_v55, %v4011_v32  ;;  %v992_v59 = vadd.f32 %v991_v56, %v4013_v33  ;;  %v1440_v60 = vpop.f32.mrb[121].mxu1  ;;  %3222 = vmatmul.mubr.msk.f32.gmra.mrb[226].mxu1 %vm370_vm0, %v3423_v57  ;;  %1825 = vmatprep.mubr.f32.mxu0 %v3571_v0  ;;  %v3430_v57 = vld [vmem:[%s3734_s17 + $0x1b8] sm:$0xff] }
 0x228   : > { %2839 = vst [vmem:[%s4026_s25 + $0xf00] sm:$0xff] %v990_v54  ;;  %v1441_v61 = vadd.f32 %v1440_v60, %v4017_v35  ;;  %2274 = vmatprep.mubr.f32.mxu1 %v3571_v0 }
 0x229   : > { %2841 = vst [vmem:[%s4026_s25 + $0xf10] sm:$0xff] %v1439_v58  ;;  %2840 = vst [vmem:[%s4026_s25 + $0xf08] sm:$0xff] %v992_v59  ;;  %v995_v62 = vpop.f32.mrb[122].mxu0 }
 0x22a   : > { %2842 = vst [vmem:[%s4026_s25 + $0xf18] sm:$0xff] %v1441_v61  ;;  %v996_v63 = vadd.f32 %v995_v62, %v4007_v31  ;;  %v1444_v1 = vpop.f32.mrb[122].mxu1  ;;  %v997_v2 = vpop.f32.mrb[123].mxu0  ;;  %3159 = vmatmul.mubr.msk.f32.gmra.mrb[228].mxu0 %vm370_vm0, %v3424_v3 }
 0x22b   : > { %v1445_v4 = vadd.f32 %v1444_v1, %v4011_v32  ;;  %v998_v5 = vadd.f32 %v997_v2, %v4013_v33  ;;  %v1446_v6 = vpop.f32.mrb[123].mxu1  ;;  %3223 = vmatmul.mubr.msk.f32.gmra.mrb[228].mxu1 %vm370_vm0, %v3424_v3  ;;  %1831 = vmatprep.mubr.f32.mxu0 %v3571_v0  ;;  %v3431_v3 = vld [vmem:[%s3734_s17 + $0x1c0] sm:$0xff] }
 0x22c   : > { %2847 = vst [vmem:[%s4026_s25 + $0xf40] sm:$0xff] %v996_v63  ;;  %v1447_v7 = vadd.f32 %v1446_v6, %v4017_v35  ;;  %2280 = vmatprep.mubr.f32.mxu1 %v3571_v0 }
 0x22d   : > { %2849 = vst [vmem:[%s4026_s25 + $0xf50] sm:$0xff] %v1445_v4  ;;  %2848 = vst [vmem:[%s4026_s25 + $0xf48] sm:$0xff] %v998_v5  ;;  %v1001_v8 = vpop.f32.mrb[124].mxu0 }
 0x22e   : > { %2850 = vst [vmem:[%s4026_s25 + $0xf58] sm:$0xff] %v1447_v7  ;;  %v1002_v9 = vadd.f32 %v1001_v8, %v4007_v31  ;;  %v1450_v10 = vpop.f32.mrb[124].mxu1  ;;  %v1003_v11 = vpop.f32.mrb[125].mxu0  ;;  %3160 = vmatmul.mubr.msk.f32.gmra.mrb[230].mxu0 %vm370_vm0, %v3425_v12 }
 0x22f   : > { %v1451_v15 = vadd.f32 %v1450_v10, %v4011_v32  ;;  %v1004_v16 = vadd.f32 %v1003_v11, %v4013_v33  ;;  %v1452_v17 = vpop.f32.mrb[125].mxu1  ;;  %3224 = vmatmul.mubr.msk.f32.gmra.mrb[230].mxu1 %vm370_vm0, %v3425_v12  ;;  %1837 = vmatprep.mubr.f32.mxu0 %v3571_v0  ;;  %v3432_v12 = vld [vmem:[%s3734_s17 + $0x1c8] sm:$0xff] }
 0x230   : > { %2855 = vst [vmem:[%s4026_s25 + $0xf80] sm:$0xff] %v1002_v9  ;;  %v1453_v19 = vadd.f32 %v1452_v17, %v4017_v35  ;;  %2286 = vmatprep.mubr.f32.mxu1 %v3571_v0 }
 0x231   : > { %2857 = vst [vmem:[%s4026_s25 + $0xf90] sm:$0xff] %v1451_v15  ;;  %2856 = vst [vmem:[%s4026_s25 + $0xf88] sm:$0xff] %v1004_v16  ;;  %v1007_v21 = vpop.f32.mrb[126].mxu0 }
 0x232   : > { %2858 = vst [vmem:[%s4026_s25 + $0xf98] sm:$0xff] %v1453_v19  ;;  %v1008_v22 = vadd.f32 %v1007_v21, %v4007_v31  ;;  %v1456_v24 = vpop.f32.mrb[126].mxu1  ;;  %v1009_v25 = vpop.f32.mrb[127].mxu0  ;;  %3161 = vmatmul.mubr.msk.f32.gmra.mrb[232].mxu0 %vm370_vm0, %v3426_v26  ;;  %v4854_v31 = vrot.slane %v3427_v27, %v352_v18  ;;  %v3433_v21 = vld [vmem:[%s3734_s17 + $0x1d0] sm:$0xff] }
 0x233   : > { %v1457_v23 = vadd.f32 %v1456_v24, %v4011_v32  ;;  %v1010_v30 = vadd.f32 %v1009_v25, %v4013_v33  ;;  %v1458_v34 = vpop.f32.mrb[127].mxu1  ;;  %3225 = vmatmul.mubr.msk.f32.gmra.mrb[232].mxu1 %vm370_vm0, %v3426_v26  ;;  %1843 = vmatprep.mubr.f32.mxu0 %v3571_v0 }
 0x234   : > { %2863 = vst [vmem:[%s4026_s25 + $0xfc0] sm:$0xff] %v1008_v22  ;;  %v1459_v36 = vadd.f32 %v1458_v34, %v4017_v35  ;;  %2292 = vmatprep.mubr.f32.mxu1 %v3571_v0 }
 0x235   : > { %2865 = vst [vmem:[%s4026_s25 + $0xfd0] sm:$0xff] %v1457_v23  ;;  %2864 = vst [vmem:[%s4026_s25 + $0xfc8] sm:$0xff] %v1010_v30  ;;  %v1527_v32 = vpop.f32.mrb[128].mxu0 }
 0x236   : > { %2866 = vst [vmem:[%s4026_s25 + $0xfd8] sm:$0xff] %v1459_v36  ;;  %v1528_v33 = vadd.f32 %v1527_v32, %v4846_v28  ;;  %v1976_v38 = vpop.f32.mrb[128].mxu1  ;;  %v1529_v39 = vpop.f32.mrb[129].mxu0  ;;  %3162 = vmatmul.mubr.msk.f32.gmra.mrb[234].mxu0 %vm370_vm0, %v3428_v40  ;;  %v3434_v36 = vld [vmem:[%s3734_s17 + $0x1d8] sm:$0xff] }
 0x237   : > { %v1977_v35 = vadd.f32 %v1976_v38, %v4848_v29  ;;  %v1530_v41 = vadd.f32 %v1529_v39, %v4854_v31  ;;  %v1978_v42 = vpop.f32.mrb[129].mxu1  ;;  %3226 = vmatmul.mubr.msk.f32.gmra.mrb[234].mxu1 %vm370_vm0, %v3428_v40  ;;  %1849 = vmatprep.mubr.f32.mxu0 %v3571_v0 }
 0x238   : > { %2363 = vst [vmem:[%s4026_s25 + $0x20] sm:$0xff] %v1528_v33  ;;  %v1979_v43 = vadd.f32 %v1978_v42, %v4859_v37  ;;  %2298 = vmatprep.mubr.f32.mxu1 %v3571_v0 }
 0x239   : > { %2365 = vst [vmem:[%s4026_s25 + $0x30] sm:$0xff] %v1977_v35  ;;  %2364 = vst [vmem:[%s4026_s25 + $0x28] sm:$0xff] %v1530_v41  ;;  %v1533_v44 = vpop.f32.mrb[130].mxu0 }
 0x23a   : > { %2366 = vst [vmem:[%s4026_s25 + $0x38] sm:$0xff] %v1979_v43  ;;  %v1534_v45 = vadd.f32 %v1533_v44, %v4846_v28  ;;  %v1982_v46 = vpop.f32.mrb[130].mxu1  ;;  %v1535_v47 = vpop.f32.mrb[131].mxu0  ;;  %3163 = vmatmul.mubr.msk.f32.gmra.mrb[236].mxu0 %vm370_vm0, %v3429_v48  ;;  %v3435_v43 = vld [vmem:[%s3734_s17 + $0x1e0] sm:$0xff] }
 0x23b   : > { %v1983_v49 = vadd.f32 %v1982_v46, %v4848_v29  ;;  %v1536_v50 = vadd.f32 %v1535_v47, %v4854_v31  ;;  %v1984_v51 = vpop.f32.mrb[131].mxu1  ;;  %3227 = vmatmul.mubr.msk.f32.gmra.mrb[236].mxu1 %vm370_vm0, %v3429_v48  ;;  %1855 = vmatprep.mubr.f32.mxu0 %v3571_v0 }
 0x23c   : > { %2371 = vst [vmem:[%s4026_s25 + $0x60] sm:$0xff] %v1534_v45  ;;  %v1985_v52 = vadd.f32 %v1984_v51, %v4859_v37  ;;  %2304 = vmatprep.mubr.f32.mxu1 %v3571_v0 }
 0x23d   : > { %2373 = vst [vmem:[%s4026_s25 + $0x70] sm:$0xff] %v1983_v49  ;;  %2372 = vst [vmem:[%s4026_s25 + $0x68] sm:$0xff] %v1536_v50  ;;  %v1539_v53 = vpop.f32.mrb[132].mxu0 }
 0x23e   : > { %2374 = vst [vmem:[%s4026_s25 + $0x78] sm:$0xff] %v1985_v52  ;;  %v1540_v54 = vadd.f32 %v1539_v53, %v4846_v28  ;;  %v1988_v55 = vpop.f32.mrb[132].mxu1  ;;  %v1541_v56 = vpop.f32.mrb[133].mxu0  ;;  %3164 = vmatmul.mubr.msk.f32.gmra.mrb[238].mxu0 %vm370_vm0, %v3430_v57  ;;  %v3436_v52 = vld [vmem:[%s3734_s17 + $0x1e8] sm:$0xff] }
 0x23f   : > { %v1989_v58 = vadd.f32 %v1988_v55, %v4848_v29  ;;  %v1542_v59 = vadd.f32 %v1541_v56, %v4854_v31  ;;  %v1990_v60 = vpop.f32.mrb[133].mxu1  ;;  %3228 = vmatmul.mubr.msk.f32.gmra.mrb[238].mxu1 %vm370_vm0, %v3430_v57  ;;  %1861 = vmatprep.mubr.f32.mxu0 %v3571_v0 }
 0x240   : > { %2379 = vst [vmem:[%s4026_s25 + $0xa0] sm:$0xff] %v1540_v54  ;;  %v1991_v61 = vadd.f32 %v1990_v60, %v4859_v37  ;;  %2310 = vmatprep.mubr.f32.mxu1 %v3571_v0 }
 0x241   : > { %2381 = vst [vmem:[%s4026_s25 + $0xb0] sm:$0xff] %v1989_v58  ;;  %2380 = vst [vmem:[%s4026_s25 + $0xa8] sm:$0xff] %v1542_v59  ;;  %v1545_v62 = vpop.f32.mrb[134].mxu0 }
 0x242   : > { %2382 = vst [vmem:[%s4026_s25 + $0xb8] sm:$0xff] %v1991_v61  ;;  %v1546_v63 = vadd.f32 %v1545_v62, %v4846_v28  ;;  %v1994_v1 = vpop.f32.mrb[134].mxu1  ;;  %v1547_v2 = vpop.f32.mrb[135].mxu0  ;;  %3165 = vmatmul.mubr.msk.f32.gmra.mrb[240].mxu0 %vm370_vm0, %v3431_v3  ;;  %v3437_v61 = vld [vmem:[%s3734_s17 + $0x1f0] sm:$0xff] }
 0x243   : > { %v1995_v4 = vadd.f32 %v1994_v1, %v4848_v29  ;;  %v1548_v5 = vadd.f32 %v1547_v2, %v4854_v31  ;;  %v1996_v6 = vpop.f32.mrb[135].mxu1  ;;  %3229 = vmatmul.mubr.msk.f32.gmra.mrb[240].mxu1 %vm370_vm0, %v3431_v3  ;;  %1867 = vmatprep.mubr.f32.mxu0 %v3571_v0 }
 0x244   : > { %2387 = vst [vmem:[%s4026_s25 + $0xe0] sm:$0xff] %v1546_v63  ;;  %v1997_v7 = vadd.f32 %v1996_v6, %v4859_v37  ;;  %2316 = vmatprep.mubr.f32.mxu1 %v3571_v0 }
 0x245   : > { %2389 = vst [vmem:[%s4026_s25 + $0xf0] sm:$0xff] %v1995_v4  ;;  %2388 = vst [vmem:[%s4026_s25 + $0xe8] sm:$0xff] %v1548_v5  ;;  %v1551_v8 = vpop.f32.mrb[136].mxu0 }
 0x246   : > { %2390 = vst [vmem:[%s4026_s25 + $0xf8] sm:$0xff] %v1997_v7  ;;  %v1552_v9 = vadd.f32 %v1551_v8, %v4846_v28  ;;  %v2000_v10 = vpop.f32.mrb[136].mxu1  ;;  %v1553_v11 = vpop.f32.mrb[137].mxu0  ;;  %3166 = vmatmul.mubr.msk.f32.gmra.mrb[242].mxu0 %vm370_vm0, %v3432_v12  ;;  %v3438_v7 = vld [vmem:[%s3734_s17 + $0x1f8] sm:$0xff] }
 0x247   : > { %v2001_v13 = vadd.f32 %v2000_v10, %v4848_v29  ;;  %v1554_v14 = vadd.f32 %v1553_v11, %v4854_v31  ;;  %v2002_v15 = vpop.f32.mrb[137].mxu1  ;;  %3230 = vmatmul.mubr.msk.f32.gmra.mrb[242].mxu1 %vm370_vm0, %v3432_v12  ;;  %1873 = vmatprep.mubr.f32.mxu0 %v3571_v0 }
 0x248   : > { %2395 = vst [vmem:[%s4026_s25 + $0x120] sm:$0xff] %v1552_v9  ;;  %v2003_v16 = vadd.f32 %v2002_v15, %v4859_v37  ;;  %2322 = vmatprep.mubr.f32.mxu1 %v3571_v0 }
 0x249   : > { %2397 = vst [vmem:[%s4026_s25 + $0x130] sm:$0xff] %v2001_v13  ;;  %2396 = vst [vmem:[%s4026_s25 + $0x128] sm:$0xff] %v1554_v14  ;;  %v1557_v17 = vpop.f32.mrb[138].mxu0 }
 0x24a   : > { %2398 = vst [vmem:[%s4026_s25 + $0x138] sm:$0xff] %v2003_v16  ;;  %v1558_v18 = vadd.f32 %v1557_v17, %v4846_v28  ;;  %v2006_v19 = vpop.f32.mrb[138].mxu1  ;;  %v1559_v20 = vpop.f32.mrb[139].mxu0  ;;  %3167 = vmatmul.mubr.msk.f32.gmra.mrb[244].mxu0 %vm370_vm0, %v3433_v21 }
 0x24b   : > { %v2007_v22 = vadd.f32 %v2006_v19, %v4848_v29  ;;  %v1560_v24 = vadd.f32 %v1559_v20, %v4854_v31  ;;  %v2008_v25 = vpop.f32.mrb[139].mxu1  ;;  %3231 = vmatmul.mubr.msk.f32.gmra.mrb[244].mxu1 %vm370_vm0, %v3433_v21  ;;  %1879 = vmatprep.mubr.f32.mxu0 %v3571_v0 }
 0x24c   : > { %2403 = vst [vmem:[%s4026_s25 + $0x160] sm:$0xff] %v1558_v18  ;;  %v2009_v26 = vadd.f32 %v2008_v25, %v4859_v37  ;;  %2328 = vmatprep.mubr.f32.mxu1 %v3571_v0 }
 0x24d   : > { %2405 = vst [vmem:[%s4026_s25 + $0x170] sm:$0xff] %v2007_v22  ;;  %2404 = vst [vmem:[%s4026_s25 + $0x168] sm:$0xff] %v1560_v24  ;;  %v1563_v27 = vpop.f32.mrb[140].mxu0 }
 0x24e   : > { %2406 = vst [vmem:[%s4026_s25 + $0x178] sm:$0xff] %v2009_v26  ;;  %v1564_v23 = vadd.f32 %v1563_v27, %v4846_v28  ;;  %v2012_v30 = vpop.f32.mrb[140].mxu1  ;;  %v1565_v34 = vpop.f32.mrb[141].mxu0  ;;  %3168 = vmatmul.mubr.msk.f32.gmra.mrb[246].mxu0 %vm370_vm0, %v3434_v36 }
 0x24f   : > { %v2013_v32 = vadd.f32 %v2012_v30, %v4848_v29  ;;  %v1566_v33 = vadd.f32 %v1565_v34, %v4854_v31  ;;  %v2014_v38 = vpop.f32.mrb[141].mxu1  ;;  %3232 = vmatmul.mubr.msk.f32.gmra.mrb[246].mxu1 %vm370_vm0, %v3434_v36  ;;  %1885 = vmatprep.mubr.f32.mxu0 %v3571_v0 }
 0x250   : > { %2411 = vst [vmem:[%s4026_s25 + $0x1a0] sm:$0xff] %v1564_v23  ;;  %v2015_v39 = vadd.f32 %v2014_v38, %v4859_v37  ;;  %2334 = vmatprep.mubr.f32.mxu1 %v3571_v0 }
 0x251   : > { %2413 = vst [vmem:[%s4026_s25 + $0x1b0] sm:$0xff] %v2013_v32  ;;  %2412 = vst [vmem:[%s4026_s25 + $0x1a8] sm:$0xff] %v1566_v33  ;;  %v1569_v40 = vpop.f32.mrb[142].mxu0 }
 0x252   : > { %2414 = vst [vmem:[%s4026_s25 + $0x1b8] sm:$0xff] %v2015_v39  ;;  %v1570_v35 = vadd.f32 %v1569_v40, %v4846_v28  ;;  %v2018_v41 = vpop.f32.mrb[142].mxu1  ;;  %v1571_v42 = vpop.f32.mrb[143].mxu0  ;;  %3169 = vmatmul.mubr.msk.f32.gmra.mrb[248].mxu0 %vm370_vm0, %v3435_v43 }
 0x253   : > { %v2019_v44 = vadd.f32 %v2018_v41, %v4848_v29  ;;  %v1572_v45 = vadd.f32 %v1571_v42, %v4854_v31  ;;  %v2020_v46 = vpop.f32.mrb[143].mxu1  ;;  %3233 = vmatmul.mubr.msk.f32.gmra.mrb[248].mxu1 %vm370_vm0, %v3435_v43  ;;  %1891 = vmatprep.mubr.f32.mxu0 %v3571_v0 }
 0x254   : > { %2419 = vst [vmem:[%s4026_s25 + $0x1e0] sm:$0xff] %v1570_v35  ;;  %v2021_v47 = vadd.f32 %v2020_v46, %v4859_v37  ;;  %2340 = vmatprep.mubr.f32.mxu1 %v3571_v0 }
 0x255   : > { %2421 = vst [vmem:[%s4026_s25 + $0x1f0] sm:$0xff] %v2019_v44  ;;  %2420 = vst [vmem:[%s4026_s25 + $0x1e8] sm:$0xff] %v1572_v45  ;;  %v1575_v48 = vpop.f32.mrb[144].mxu0 }
 0x256   : > { %2422 = vst [vmem:[%s4026_s25 + $0x1f8] sm:$0xff] %v2021_v47  ;;  %v1576_v49 = vadd.f32 %v1575_v48, %v4846_v28  ;;  %v2024_v50 = vpop.f32.mrb[144].mxu1  ;;  %v1577_v51 = vpop.f32.mrb[145].mxu0  ;;  %3170 = vmatmul.mubr.msk.f32.gmra.mrb[250].mxu0 %vm370_vm0, %v3436_v52 }
 0x257   : > { %v2025_v53 = vadd.f32 %v2024_v50, %v4848_v29  ;;  %v1578_v54 = vadd.f32 %v1577_v51, %v4854_v31  ;;  %v2026_v55 = vpop.f32.mrb[145].mxu1  ;;  %3234 = vmatmul.mubr.msk.f32.gmra.mrb[250].mxu1 %vm370_vm0, %v3436_v52  ;;  %1897 = vmatprep.mubr.f32.mxu0 %v3571_v0 }
 0x258   : > { %2427 = vst [vmem:[%s4026_s25 + $0x220] sm:$0xff] %v1576_v49  ;;  %v2027_v56 = vadd.f32 %v2026_v55, %v4859_v37  ;;  %2346 = vmatprep.mubr.f32.mxu1 %v3571_v0 }
 0x259   : > { %2429 = vst [vmem:[%s4026_s25 + $0x230] sm:$0xff] %v2025_v53  ;;  %2428 = vst [vmem:[%s4026_s25 + $0x228] sm:$0xff] %v1578_v54  ;;  %v1581_v57 = vpop.f32.mrb[146].mxu0 }
 0x25a   : > { %2430 = vst [vmem:[%s4026_s25 + $0x238] sm:$0xff] %v2027_v56  ;;  %v1582_v58 = vadd.f32 %v1581_v57, %v4846_v28  ;;  %v2030_v59 = vpop.f32.mrb[146].mxu1  ;;  %v1583_v60 = vpop.f32.mrb[147].mxu0  ;;  %3171 = vmatmul.mubr.msk.f32.gmra.mrb[252].mxu0 %vm370_vm0, %v3437_v61 }
 0x25b   : > { %v2031_v62 = vadd.f32 %v2030_v59, %v4848_v29  ;;  %v1584_v63 = vadd.f32 %v1583_v60, %v4854_v31  ;;  %v2032_v1 = vpop.f32.mrb[147].mxu1  ;;  %3235 = vmatmul.mubr.msk.f32.gmra.mrb[252].mxu1 %vm370_vm0, %v3437_v61  ;;  %1903 = vmatprep.mubr.f32.mxu0 %v3571_v0 }
 0x25c   : > { %2435 = vst [vmem:[%s4026_s25 + $0x260] sm:$0xff] %v1582_v58  ;;  %v2033_v2 = vadd.f32 %v2032_v1, %v4859_v37  ;;  %2352 = vmatprep.mubr.f32.mxu1 %v3571_v0 }
 0x25d   : > { %2437 = vst [vmem:[%s4026_s25 + $0x270] sm:$0xff] %v2031_v62  ;;  %2436 = vst [vmem:[%s4026_s25 + $0x268] sm:$0xff] %v1584_v63  ;;  %v1587_v3 = vpop.f32.mrb[148].mxu0 }
 0x25e   : > { %2438 = vst [vmem:[%s4026_s25 + $0x278] sm:$0xff] %v2033_v2  ;;  %v1588_v4 = vadd.f32 %v1587_v3, %v4846_v28  ;;  %v2036_v5 = vpop.f32.mrb[148].mxu1  ;;  %v1589_v6 = vpop.f32.mrb[149].mxu0  ;;  %3172 = vmatmul.mubr.msk.f32.gmra.mrb[254].mxu0 %vm370_vm0, %v3438_v7 }
 0x25f   : > { %v2037_v8 = vadd.f32 %v2036_v5, %v4848_v29  ;;  %v1590_v9 = vadd.f32 %v1589_v6, %v4854_v31  ;;  %v2038_v0 = vpop.f32.mrb[149].mxu1  ;;  %3236 = vmatmul.mubr.msk.f32.gmra.mrb[254].mxu1 %vm370_vm0, %v3438_v7 }
 0x260   : > { %2443 = vst [vmem:[%s4026_s25 + $0x2a0] sm:$0xff] %v1588_v4  ;;  %v2039_v10 = vadd.f32 %v2038_v0, %v4859_v37 }
 0x261   : > { %2445 = vst [vmem:[%s4026_s25 + $0x2b0] sm:$0xff] %v2037_v8  ;;  %2444 = vst [vmem:[%s4026_s25 + $0x2a8] sm:$0xff] %v1590_v9  ;;  %v1593_v11 = vpop.f32.mrb[150].mxu0 }
 0x262   : > { %2446 = vst [vmem:[%s4026_s25 + $0x2b8] sm:$0xff] %v2039_v10  ;;  %v1594_v12 = vadd.f32 %v1593_v11, %v4846_v28  ;;  %v2042_v13 = vpop.f32.mrb[150].mxu1  ;;  %v1595_v14 = vpop.f32.mrb[151].mxu0 }
 0x263   : > { %v2043_v15 = vadd.f32 %v2042_v13, %v4848_v29  ;;  %v1596_v16 = vadd.f32 %v1595_v14, %v4854_v31  ;;  %v2044_v17 = vpop.f32.mrb[151].mxu1 }
 0x264   : > { %2451 = vst [vmem:[%s4026_s25 + $0x2e0] sm:$0xff] %v1594_v12  ;;  %v2045_v18 = vadd.f32 %v2044_v17, %v4859_v37 }
 0x265   : > { %2453 = vst [vmem:[%s4026_s25 + $0x2f0] sm:$0xff] %v2043_v15  ;;  %2452 = vst [vmem:[%s4026_s25 + $0x2e8] sm:$0xff] %v1596_v16  ;;  %v1599_v19 = vpop.f32.mrb[152].mxu0 }
 0x266   : > { %2454 = vst [vmem:[%s4026_s25 + $0x2f8] sm:$0xff] %v2045_v18  ;;  %v1600_v20 = vadd.f32 %v1599_v19, %v4846_v28  ;;  %v2048_v21 = vpop.f32.mrb[152].mxu1  ;;  %v1601_v22 = vpop.f32.mrb[153].mxu0 }
 0x267   : > { %v2049_v24 = vadd.f32 %v2048_v21, %v4848_v29  ;;  %v1602_v25 = vadd.f32 %v1601_v22, %v4854_v31  ;;  %v2050_v26 = vpop.f32.mrb[153].mxu1 }
 0x268   : > { %2459 = vst [vmem:[%s4026_s25 + $0x320] sm:$0xff] %v1600_v20  ;;  %v2051_v27 = vadd.f32 %v2050_v26, %v4859_v37 }
 0x269   : > { %2461 = vst [vmem:[%s4026_s25 + $0x330] sm:$0xff] %v2049_v24  ;;  %2460 = vst [vmem:[%s4026_s25 + $0x328] sm:$0xff] %v1602_v25  ;;  %v1605_v23 = vpop.f32.mrb[154].mxu0 }
 0x26a   : > { %2462 = vst [vmem:[%s4026_s25 + $0x338] sm:$0xff] %v2051_v27  ;;  %v1606_v30 = vadd.f32 %v1605_v23, %v4846_v28  ;;  %v2054_v34 = vpop.f32.mrb[154].mxu1  ;;  %v1607_v36 = vpop.f32.mrb[155].mxu0 }
 0x26b   : > { %v2055_v32 = vadd.f32 %v2054_v34, %v4848_v29  ;;  %v1608_v33 = vadd.f32 %v1607_v36, %v4854_v31  ;;  %v2056_v38 = vpop.f32.mrb[155].mxu1 }
 0x26c   : > { %2467 = vst [vmem:[%s4026_s25 + $0x360] sm:$0xff] %v1606_v30  ;;  %v2057_v39 = vadd.f32 %v2056_v38, %v4859_v37 }
 0x26d   : > { %2469 = vst [vmem:[%s4026_s25 + $0x370] sm:$0xff] %v2055_v32  ;;  %2468 = vst [vmem:[%s4026_s25 + $0x368] sm:$0xff] %v1608_v33  ;;  %v1611_v40 = vpop.f32.mrb[156].mxu0 }
 0x26e   : > { %2470 = vst [vmem:[%s4026_s25 + $0x378] sm:$0xff] %v2057_v39  ;;  %v1612_v35 = vadd.f32 %v1611_v40, %v4846_v28  ;;  %v2060_v41 = vpop.f32.mrb[156].mxu1  ;;  %v1613_v42 = vpop.f32.mrb[157].mxu0 }
 0x26f   : > { %v2061_v43 = vadd.f32 %v2060_v41, %v4848_v29  ;;  %v1614_v44 = vadd.f32 %v1613_v42, %v4854_v31  ;;  %v2062_v45 = vpop.f32.mrb[157].mxu1 }
 0x270   : > { %2475 = vst [vmem:[%s4026_s25 + $0x3a0] sm:$0xff] %v1612_v35  ;;  %v2063_v46 = vadd.f32 %v2062_v45, %v4859_v37 }
 0x271   : > { %2477 = vst [vmem:[%s4026_s25 + $0x3b0] sm:$0xff] %v2061_v43  ;;  %2476 = vst [vmem:[%s4026_s25 + $0x3a8] sm:$0xff] %v1614_v44  ;;  %v1617_v47 = vpop.f32.mrb[158].mxu0 }
 0x272   : > { %2478 = vst [vmem:[%s4026_s25 + $0x3b8] sm:$0xff] %v2063_v46  ;;  %v1618_v48 = vadd.f32 %v1617_v47, %v4846_v28  ;;  %v2066_v49 = vpop.f32.mrb[158].mxu1  ;;  %v1619_v50 = vpop.f32.mrb[159].mxu0 }
 0x273   : > { %v2067_v51 = vadd.f32 %v2066_v49, %v4848_v29  ;;  %v1620_v52 = vadd.f32 %v1619_v50, %v4854_v31  ;;  %v2068_v53 = vpop.f32.mrb[159].mxu1 }
 0x274   : > { %2483 = vst [vmem:[%s4026_s25 + $0x3e0] sm:$0xff] %v1618_v48  ;;  %v2069_v54 = vadd.f32 %v2068_v53, %v4859_v37 }
 0x275   : > { %2485 = vst [vmem:[%s4026_s25 + $0x3f0] sm:$0xff] %v2067_v51  ;;  %2484 = vst [vmem:[%s4026_s25 + $0x3e8] sm:$0xff] %v1620_v52  ;;  %v1623_v55 = vpop.f32.mrb[160].mxu0 }
 0x276   : > { %2486 = vst [vmem:[%s4026_s25 + $0x3f8] sm:$0xff] %v2069_v54  ;;  %v1624_v56 = vadd.f32 %v1623_v55, %v4846_v28  ;;  %v2072_v57 = vpop.f32.mrb[160].mxu1  ;;  %v1625_v58 = vpop.f32.mrb[161].mxu0 }
 0x277   : > { %v2073_v59 = vadd.f32 %v2072_v57, %v4848_v29  ;;  %v1626_v60 = vadd.f32 %v1625_v58, %v4854_v31  ;;  %v2074_v61 = vpop.f32.mrb[161].mxu1 }
 0x278   : > { %2491 = vst [vmem:[%s4026_s25 + $0x420] sm:$0xff] %v1624_v56  ;;  %v2075_v62 = vadd.f32 %v2074_v61, %v4859_v37 }
 0x279   : > { %2493 = vst [vmem:[%s4026_s25 + $0x430] sm:$0xff] %v2073_v59  ;;  %2492 = vst [vmem:[%s4026_s25 + $0x428] sm:$0xff] %v1626_v60  ;;  %v1629_v63 = vpop.f32.mrb[162].mxu0 }
 0x27a   : > { %2494 = vst [vmem:[%s4026_s25 + $0x438] sm:$0xff] %v2075_v62  ;;  %v1630_v1 = vadd.f32 %v1629_v63, %v4846_v28  ;;  %v2078_v2 = vpop.f32.mrb[162].mxu1  ;;  %v1631_v3 = vpop.f32.mrb[163].mxu0 }
 0x27b   : > { %v2079_v4 = vadd.f32 %v2078_v2, %v4848_v29  ;;  %v1632_v5 = vadd.f32 %v1631_v3, %v4854_v31  ;;  %v2080_v6 = vpop.f32.mrb[163].mxu1 }
 0x27c   : > { %2499 = vst [vmem:[%s4026_s25 + $0x460] sm:$0xff] %v1630_v1  ;;  %v2081_v7 = vadd.f32 %v2080_v6, %v4859_v37 }
 0x27d   : > { %2501 = vst [vmem:[%s4026_s25 + $0x470] sm:$0xff] %v2079_v4  ;;  %2500 = vst [vmem:[%s4026_s25 + $0x468] sm:$0xff] %v1632_v5  ;;  %v1635_v8 = vpop.f32.mrb[164].mxu0 }
 0x27e   : > { %2502 = vst [vmem:[%s4026_s25 + $0x478] sm:$0xff] %v2081_v7  ;;  %v1636_v9 = vadd.f32 %v1635_v8, %v4846_v28  ;;  %v2084_v0 = vpop.f32.mrb[164].mxu1  ;;  %v1637_v10 = vpop.f32.mrb[165].mxu0 }
 0x27f   : > { %v2085_v11 = vadd.f32 %v2084_v0, %v4848_v29  ;;  %v1638_v12 = vadd.f32 %v1637_v10, %v4854_v31  ;;  %v2086_v13 = vpop.f32.mrb[165].mxu1 }
 0x280   : > { %2507 = vst [vmem:[%s4026_s25 + $0x4a0] sm:$0xff] %v1636_v9  ;;  %v2087_v14 = vadd.f32 %v2086_v13, %v4859_v37 }
 0x281   : > { %2509 = vst [vmem:[%s4026_s25 + $0x4b0] sm:$0xff] %v2085_v11  ;;  %2508 = vst [vmem:[%s4026_s25 + $0x4a8] sm:$0xff] %v1638_v12  ;;  %v1641_v15 = vpop.f32.mrb[166].mxu0 }
 0x282   : > { %2510 = vst [vmem:[%s4026_s25 + $0x4b8] sm:$0xff] %v2087_v14  ;;  %v1642_v16 = vadd.f32 %v1641_v15, %v4846_v28  ;;  %v2090_v17 = vpop.f32.mrb[166].mxu1  ;;  %v1643_v18 = vpop.f32.mrb[167].mxu0 }
 0x283   : > { %v2091_v19 = vadd.f32 %v2090_v17, %v4848_v29  ;;  %v1644_v20 = vadd.f32 %v1643_v18, %v4854_v31  ;;  %v2092_v21 = vpop.f32.mrb[167].mxu1 }
 0x284   : > { %2515 = vst [vmem:[%s4026_s25 + $0x4e0] sm:$0xff] %v1642_v16  ;;  %v2093_v22 = vadd.f32 %v2092_v21, %v4859_v37 }
 0x285   : > { %2517 = vst [vmem:[%s4026_s25 + $0x4f0] sm:$0xff] %v2091_v19  ;;  %2516 = vst [vmem:[%s4026_s25 + $0x4e8] sm:$0xff] %v1644_v20  ;;  %v1647_v24 = vpop.f32.mrb[168].mxu0 }
 0x286   : > { %2518 = vst [vmem:[%s4026_s25 + $0x4f8] sm:$0xff] %v2093_v22  ;;  %v1648_v25 = vadd.f32 %v1647_v24, %v4846_v28  ;;  %v2096_v26 = vpop.f32.mrb[168].mxu1  ;;  %v1649_v27 = vpop.f32.mrb[169].mxu0 }
 0x287   : > { %v2097_v23 = vadd.f32 %v2096_v26, %v4848_v29  ;;  %v1650_v30 = vadd.f32 %v1649_v27, %v4854_v31  ;;  %v2098_v34 = vpop.f32.mrb[169].mxu1 }
 0x288   : > { %2523 = vst [vmem:[%s4026_s25 + $0x520] sm:$0xff] %v1648_v25  ;;  %v2099_v36 = vadd.f32 %v2098_v34, %v4859_v37 }
 0x289   : > { %2525 = vst [vmem:[%s4026_s25 + $0x530] sm:$0xff] %v2097_v23  ;;  %2524 = vst [vmem:[%s4026_s25 + $0x528] sm:$0xff] %v1650_v30  ;;  %v1653_v32 = vpop.f32.mrb[170].mxu0 }
 0x28a   : > { %2526 = vst [vmem:[%s4026_s25 + $0x538] sm:$0xff] %v2099_v36  ;;  %v1654_v33 = vadd.f32 %v1653_v32, %v4846_v28  ;;  %v2102_v38 = vpop.f32.mrb[170].mxu1  ;;  %v1655_v39 = vpop.f32.mrb[171].mxu0 }
 0x28b   : > { %v2103_v40 = vadd.f32 %v2102_v38, %v4848_v29  ;;  %v1656_v35 = vadd.f32 %v1655_v39, %v4854_v31  ;;  %v2104_v41 = vpop.f32.mrb[171].mxu1 }
 0x28c   : > { %2531 = vst [vmem:[%s4026_s25 + $0x560] sm:$0xff] %v1654_v33  ;;  %v2105_v42 = vadd.f32 %v2104_v41, %v4859_v37 }
 0x28d   : > { %2533 = vst [vmem:[%s4026_s25 + $0x570] sm:$0xff] %v2103_v40  ;;  %2532 = vst [vmem:[%s4026_s25 + $0x568] sm:$0xff] %v1656_v35  ;;  %v1659_v43 = vpop.f32.mrb[172].mxu0 }
 0x28e   : > { %2534 = vst [vmem:[%s4026_s25 + $0x578] sm:$0xff] %v2105_v42  ;;  %v1660_v44 = vadd.f32 %v1659_v43, %v4846_v28  ;;  %v2108_v45 = vpop.f32.mrb[172].mxu1  ;;  %v1661_v46 = vpop.f32.mrb[173].mxu0 }
 0x28f   : > { %v2109_v47 = vadd.f32 %v2108_v45, %v4848_v29  ;;  %v1662_v48 = vadd.f32 %v1661_v46, %v4854_v31  ;;  %v2110_v49 = vpop.f32.mrb[173].mxu1 }
 0x290   : > { %2539 = vst [vmem:[%s4026_s25 + $0x5a0] sm:$0xff] %v1660_v44  ;;  %v2111_v50 = vadd.f32 %v2110_v49, %v4859_v37 }
 0x291   : > { %2541 = vst [vmem:[%s4026_s25 + $0x5b0] sm:$0xff] %v2109_v47  ;;  %2540 = vst [vmem:[%s4026_s25 + $0x5a8] sm:$0xff] %v1662_v48  ;;  %v1665_v51 = vpop.f32.mrb[174].mxu0 }
 0x292   : > { %2542 = vst [vmem:[%s4026_s25 + $0x5b8] sm:$0xff] %v2111_v50  ;;  %v1666_v52 = vadd.f32 %v1665_v51, %v4846_v28  ;;  %v2114_v53 = vpop.f32.mrb[174].mxu1  ;;  %v1667_v54 = vpop.f32.mrb[175].mxu0 }
 0x293   : > { %v2115_v55 = vadd.f32 %v2114_v53, %v4848_v29  ;;  %v1668_v56 = vadd.f32 %v1667_v54, %v4854_v31  ;;  %v2116_v57 = vpop.f32.mrb[175].mxu1 }
 0x294   : > { %2547 = vst [vmem:[%s4026_s25 + $0x5e0] sm:$0xff] %v1666_v52  ;;  %v2117_v58 = vadd.f32 %v2116_v57, %v4859_v37 }
 0x295   : > { %2549 = vst [vmem:[%s4026_s25 + $0x5f0] sm:$0xff] %v2115_v55  ;;  %2548 = vst [vmem:[%s4026_s25 + $0x5e8] sm:$0xff] %v1668_v56  ;;  %v1671_v59 = vpop.f32.mrb[176].mxu0 }
 0x296   : > { %2550 = vst [vmem:[%s4026_s25 + $0x5f8] sm:$0xff] %v2117_v58  ;;  %v1672_v60 = vadd.f32 %v1671_v59, %v4846_v28  ;;  %v2120_v61 = vpop.f32.mrb[176].mxu1  ;;  %v1673_v62 = vpop.f32.mrb[177].mxu0 }
 0x297   : > { %v2121_v63 = vadd.f32 %v2120_v61, %v4848_v29  ;;  %v1674_v1 = vadd.f32 %v1673_v62, %v4854_v31  ;;  %v2122_v2 = vpop.f32.mrb[177].mxu1 }
 0x298   : > { %2555 = vst [vmem:[%s4026_s25 + $0x620] sm:$0xff] %v1672_v60  ;;  %v2123_v3 = vadd.f32 %v2122_v2, %v4859_v37 }
 0x299   : > { %2557 = vst [vmem:[%s4026_s25 + $0x630] sm:$0xff] %v2121_v63  ;;  %2556 = vst [vmem:[%s4026_s25 + $0x628] sm:$0xff] %v1674_v1  ;;  %v1677_v4 = vpop.f32.mrb[178].mxu0 }
 0x29a   : > { %2558 = vst [vmem:[%s4026_s25 + $0x638] sm:$0xff] %v2123_v3  ;;  %v1678_v5 = vadd.f32 %v1677_v4, %v4846_v28  ;;  %v2126_v6 = vpop.f32.mrb[178].mxu1  ;;  %v1679_v7 = vpop.f32.mrb[179].mxu0 }
 0x29b   : > { %v2127_v8 = vadd.f32 %v2126_v6, %v4848_v29  ;;  %v1680_v9 = vadd.f32 %v1679_v7, %v4854_v31  ;;  %v2128_v0 = vpop.f32.mrb[179].mxu1 }
 0x29c   : > { %2563 = vst [vmem:[%s4026_s25 + $0x660] sm:$0xff] %v1678_v5  ;;  %v2129_v10 = vadd.f32 %v2128_v0, %v4859_v37 }
 0x29d   : > { %2565 = vst [vmem:[%s4026_s25 + $0x670] sm:$0xff] %v2127_v8  ;;  %2564 = vst [vmem:[%s4026_s25 + $0x668] sm:$0xff] %v1680_v9  ;;  %v1683_v11 = vpop.f32.mrb[180].mxu0 }
 0x29e   : > { %2566 = vst [vmem:[%s4026_s25 + $0x678] sm:$0xff] %v2129_v10  ;;  %v1684_v12 = vadd.f32 %v1683_v11, %v4846_v28  ;;  %v2132_v13 = vpop.f32.mrb[180].mxu1  ;;  %v1685_v14 = vpop.f32.mrb[181].mxu0 }
 0x29f   : > { %v2133_v15 = vadd.f32 %v2132_v13, %v4848_v29  ;;  %v1686_v16 = vadd.f32 %v1685_v14, %v4854_v31  ;;  %v2134_v17 = vpop.f32.mrb[181].mxu1 }
 0x2a0   : > { %2571 = vst [vmem:[%s4026_s25 + $0x6a0] sm:$0xff] %v1684_v12  ;;  %v2135_v18 = vadd.f32 %v2134_v17, %v4859_v37 }
 0x2a1   : > { %2573 = vst [vmem:[%s4026_s25 + $0x6b0] sm:$0xff] %v2133_v15  ;;  %2572 = vst [vmem:[%s4026_s25 + $0x6a8] sm:$0xff] %v1686_v16  ;;  %v1689_v19 = vpop.f32.mrb[182].mxu0 }
 0x2a2   : > { %2574 = vst [vmem:[%s4026_s25 + $0x6b8] sm:$0xff] %v2135_v18  ;;  %v1690_v20 = vadd.f32 %v1689_v19, %v4846_v28  ;;  %v2138_v21 = vpop.f32.mrb[182].mxu1  ;;  %v1691_v22 = vpop.f32.mrb[183].mxu0 }
 0x2a3   : > { %v2139_v24 = vadd.f32 %v2138_v21, %v4848_v29  ;;  %v1692_v25 = vadd.f32 %v1691_v22, %v4854_v31  ;;  %v2140_v26 = vpop.f32.mrb[183].mxu1 }
 0x2a4   : > { %2579 = vst [vmem:[%s4026_s25 + $0x6e0] sm:$0xff] %v1690_v20  ;;  %v2141_v27 = vadd.f32 %v2140_v26, %v4859_v37 }
 0x2a5   : > { %2581 = vst [vmem:[%s4026_s25 + $0x6f0] sm:$0xff] %v2139_v24  ;;  %2580 = vst [vmem:[%s4026_s25 + $0x6e8] sm:$0xff] %v1692_v25  ;;  %v1695_v23 = vpop.f32.mrb[184].mxu0 }
 0x2a6   : > { %2582 = vst [vmem:[%s4026_s25 + $0x6f8] sm:$0xff] %v2141_v27  ;;  %v1696_v30 = vadd.f32 %v1695_v23, %v4846_v28  ;;  %v2144_v34 = vpop.f32.mrb[184].mxu1  ;;  %v1697_v36 = vpop.f32.mrb[185].mxu0 }
 0x2a7   : > { %v2145_v32 = vadd.f32 %v2144_v34, %v4848_v29  ;;  %v1698_v33 = vadd.f32 %v1697_v36, %v4854_v31  ;;  %v2146_v38 = vpop.f32.mrb[185].mxu1 }
 0x2a8   : > { %2587 = vst [vmem:[%s4026_s25 + $0x720] sm:$0xff] %v1696_v30  ;;  %v2147_v39 = vadd.f32 %v2146_v38, %v4859_v37 }
 0x2a9   : > { %2589 = vst [vmem:[%s4026_s25 + $0x730] sm:$0xff] %v2145_v32  ;;  %2588 = vst [vmem:[%s4026_s25 + $0x728] sm:$0xff] %v1698_v33  ;;  %v1701_v40 = vpop.f32.mrb[186].mxu0 }
 0x2aa   : > { %2590 = vst [vmem:[%s4026_s25 + $0x738] sm:$0xff] %v2147_v39  ;;  %v1702_v35 = vadd.f32 %v1701_v40, %v4846_v28  ;;  %v2150_v41 = vpop.f32.mrb[186].mxu1  ;;  %v1703_v42 = vpop.f32.mrb[187].mxu0 }
 0x2ab   : > { %v2151_v43 = vadd.f32 %v2150_v41, %v4848_v29  ;;  %v1704_v44 = vadd.f32 %v1703_v42, %v4854_v31  ;;  %v2152_v45 = vpop.f32.mrb[187].mxu1 }
 0x2ac   : > { %2595 = vst [vmem:[%s4026_s25 + $0x760] sm:$0xff] %v1702_v35  ;;  %v2153_v46 = vadd.f32 %v2152_v45, %v4859_v37 }
 0x2ad   : > { %2597 = vst [vmem:[%s4026_s25 + $0x770] sm:$0xff] %v2151_v43  ;;  %2596 = vst [vmem:[%s4026_s25 + $0x768] sm:$0xff] %v1704_v44  ;;  %v1707_v47 = vpop.f32.mrb[188].mxu0 }
 0x2ae   : > { %2598 = vst [vmem:[%s4026_s25 + $0x778] sm:$0xff] %v2153_v46  ;;  %v1708_v48 = vadd.f32 %v1707_v47, %v4846_v28  ;;  %v2156_v49 = vpop.f32.mrb[188].mxu1  ;;  %v1709_v50 = vpop.f32.mrb[189].mxu0 }
 0x2af   : > { %v2157_v51 = vadd.f32 %v2156_v49, %v4848_v29  ;;  %v1710_v52 = vadd.f32 %v1709_v50, %v4854_v31  ;;  %v2158_v53 = vpop.f32.mrb[189].mxu1 }
 0x2b0   : > { %2603 = vst [vmem:[%s4026_s25 + $0x7a0] sm:$0xff] %v1708_v48  ;;  %v2159_v54 = vadd.f32 %v2158_v53, %v4859_v37 }
 0x2b1   : > { %2605 = vst [vmem:[%s4026_s25 + $0x7b0] sm:$0xff] %v2157_v51  ;;  %2604 = vst [vmem:[%s4026_s25 + $0x7a8] sm:$0xff] %v1710_v52  ;;  %v1713_v55 = vpop.f32.mrb[190].mxu0 }
 0x2b2   : > { %2606 = vst [vmem:[%s4026_s25 + $0x7b8] sm:$0xff] %v2159_v54  ;;  %v1714_v56 = vadd.f32 %v1713_v55, %v4846_v28  ;;  %v2162_v57 = vpop.f32.mrb[190].mxu1  ;;  %v1715_v58 = vpop.f32.mrb[191].mxu0 }
 0x2b3   : > { %v2163_v59 = vadd.f32 %v2162_v57, %v4848_v29  ;;  %v1716_v60 = vadd.f32 %v1715_v58, %v4854_v31  ;;  %v2164_v61 = vpop.f32.mrb[191].mxu1 }
 0x2b4   : > { %2611 = vst [vmem:[%s4026_s25 + $0x7e0] sm:$0xff] %v1714_v56  ;;  %v2165_v62 = vadd.f32 %v2164_v61, %v4859_v37 }
 0x2b5   : > { %2613 = vst [vmem:[%s4026_s25 + $0x7f0] sm:$0xff] %v2163_v59  ;;  %2612 = vst [vmem:[%s4026_s25 + $0x7e8] sm:$0xff] %v1716_v60  ;;  %v1719_v63 = vpop.f32.mrb[192].mxu0 }
 0x2b6   : > { %2614 = vst [vmem:[%s4026_s25 + $0x7f8] sm:$0xff] %v2165_v62  ;;  %v1720_v1 = vadd.f32 %v1719_v63, %v4846_v28  ;;  %v2168_v2 = vpop.f32.mrb[192].mxu1  ;;  %v1721_v3 = vpop.f32.mrb[193].mxu0 }
 0x2b7   : > { %v2169_v4 = vadd.f32 %v2168_v2, %v4848_v29  ;;  %v1722_v5 = vadd.f32 %v1721_v3, %v4854_v31  ;;  %v2170_v6 = vpop.f32.mrb[193].mxu1 }
 0x2b8   : > { %2619 = vst [vmem:[%s4026_s25 + $0x820] sm:$0xff] %v1720_v1  ;;  %v2171_v7 = vadd.f32 %v2170_v6, %v4859_v37 }
 0x2b9   : > { %2621 = vst [vmem:[%s4026_s25 + $0x830] sm:$0xff] %v2169_v4  ;;  %2620 = vst [vmem:[%s4026_s25 + $0x828] sm:$0xff] %v1722_v5  ;;  %v1725_v8 = vpop.f32.mrb[194].mxu0 }
 0x2ba   : > { %2622 = vst [vmem:[%s4026_s25 + $0x838] sm:$0xff] %v2171_v7  ;;  %v1726_v9 = vadd.f32 %v1725_v8, %v4846_v28  ;;  %v2174_v0 = vpop.f32.mrb[194].mxu1  ;;  %v1727_v10 = vpop.f32.mrb[195].mxu0 }
 0x2bb   : > { %v2175_v11 = vadd.f32 %v2174_v0, %v4848_v29  ;;  %v1728_v12 = vadd.f32 %v1727_v10, %v4854_v31  ;;  %v2176_v13 = vpop.f32.mrb[195].mxu1 }
 0x2bc   : > { %2627 = vst [vmem:[%s4026_s25 + $0x860] sm:$0xff] %v1726_v9  ;;  %v2177_v14 = vadd.f32 %v2176_v13, %v4859_v37 }
 0x2bd   : > { %2629 = vst [vmem:[%s4026_s25 + $0x870] sm:$0xff] %v2175_v11  ;;  %2628 = vst [vmem:[%s4026_s25 + $0x868] sm:$0xff] %v1728_v12  ;;  %v1731_v15 = vpop.f32.mrb[196].mxu0 }
 0x2be   : > { %2630 = vst [vmem:[%s4026_s25 + $0x878] sm:$0xff] %v2177_v14  ;;  %v1732_v16 = vadd.f32 %v1731_v15, %v4846_v28  ;;  %v2180_v17 = vpop.f32.mrb[196].mxu1  ;;  %v1733_v18 = vpop.f32.mrb[197].mxu0 }
 0x2bf   : > { %v2181_v19 = vadd.f32 %v2180_v17, %v4848_v29  ;;  %v1734_v20 = vadd.f32 %v1733_v18, %v4854_v31  ;;  %v2182_v21 = vpop.f32.mrb[197].mxu1 }
 0x2c0   : > { %2635 = vst [vmem:[%s4026_s25 + $0x8a0] sm:$0xff] %v1732_v16  ;;  %v2183_v22 = vadd.f32 %v2182_v21, %v4859_v37 }
 0x2c1   : > { %2637 = vst [vmem:[%s4026_s25 + $0x8b0] sm:$0xff] %v2181_v19  ;;  %2636 = vst [vmem:[%s4026_s25 + $0x8a8] sm:$0xff] %v1734_v20  ;;  %v1737_v24 = vpop.f32.mrb[198].mxu0 }
 0x2c2   : > { %2638 = vst [vmem:[%s4026_s25 + $0x8b8] sm:$0xff] %v2183_v22  ;;  %v1738_v25 = vadd.f32 %v1737_v24, %v4846_v28  ;;  %v2186_v26 = vpop.f32.mrb[198].mxu1  ;;  %v1739_v27 = vpop.f32.mrb[199].mxu0 }
 0x2c3   : > { %v2187_v23 = vadd.f32 %v2186_v26, %v4848_v29  ;;  %v1740_v30 = vadd.f32 %v1739_v27, %v4854_v31  ;;  %v2188_v34 = vpop.f32.mrb[199].mxu1 }
 0x2c4   : > { %2643 = vst [vmem:[%s4026_s25 + $0x8e0] sm:$0xff] %v1738_v25  ;;  %v2189_v36 = vadd.f32 %v2188_v34, %v4859_v37 }
 0x2c5   : > { %2645 = vst [vmem:[%s4026_s25 + $0x8f0] sm:$0xff] %v2187_v23  ;;  %2644 = vst [vmem:[%s4026_s25 + $0x8e8] sm:$0xff] %v1740_v30  ;;  %v1743_v32 = vpop.f32.mrb[200].mxu0 }
 0x2c6   : > { %2646 = vst [vmem:[%s4026_s25 + $0x8f8] sm:$0xff] %v2189_v36  ;;  %v1744_v33 = vadd.f32 %v1743_v32, %v4846_v28  ;;  %v2192_v38 = vpop.f32.mrb[200].mxu1  ;;  %v1745_v39 = vpop.f32.mrb[201].mxu0 }
 0x2c7   : > { %v2193_v40 = vadd.f32 %v2192_v38, %v4848_v29  ;;  %v1746_v35 = vadd.f32 %v1745_v39, %v4854_v31  ;;  %v2194_v41 = vpop.f32.mrb[201].mxu1 }
 0x2c8   : > { %2651 = vst [vmem:[%s4026_s25 + $0x920] sm:$0xff] %v1744_v33  ;;  %v2195_v42 = vadd.f32 %v2194_v41, %v4859_v37 }
 0x2c9   : > { %2653 = vst [vmem:[%s4026_s25 + $0x930] sm:$0xff] %v2193_v40  ;;  %2652 = vst [vmem:[%s4026_s25 + $0x928] sm:$0xff] %v1746_v35  ;;  %v1749_v43 = vpop.f32.mrb[202].mxu0 }
 0x2ca   : > { %2654 = vst [vmem:[%s4026_s25 + $0x938] sm:$0xff] %v2195_v42  ;;  %v1750_v44 = vadd.f32 %v1749_v43, %v4846_v28  ;;  %v2198_v45 = vpop.f32.mrb[202].mxu1  ;;  %v1751_v46 = vpop.f32.mrb[203].mxu0 }
 0x2cb   : > { %v2199_v47 = vadd.f32 %v2198_v45, %v4848_v29  ;;  %v1752_v48 = vadd.f32 %v1751_v46, %v4854_v31  ;;  %v2200_v49 = vpop.f32.mrb[203].mxu1 }
 0x2cc   : > { %2659 = vst [vmem:[%s4026_s25 + $0x960] sm:$0xff] %v1750_v44  ;;  %v2201_v50 = vadd.f32 %v2200_v49, %v4859_v37 }
 0x2cd   : > { %2661 = vst [vmem:[%s4026_s25 + $0x970] sm:$0xff] %v2199_v47  ;;  %2660 = vst [vmem:[%s4026_s25 + $0x968] sm:$0xff] %v1752_v48  ;;  %v1755_v51 = vpop.f32.mrb[204].mxu0 }
 0x2ce   : > { %2662 = vst [vmem:[%s4026_s25 + $0x978] sm:$0xff] %v2201_v50  ;;  %v1756_v52 = vadd.f32 %v1755_v51, %v4846_v28  ;;  %v2204_v53 = vpop.f32.mrb[204].mxu1  ;;  %v1757_v54 = vpop.f32.mrb[205].mxu0 }
 0x2cf   : > { %v2205_v55 = vadd.f32 %v2204_v53, %v4848_v29  ;;  %v1758_v56 = vadd.f32 %v1757_v54, %v4854_v31  ;;  %v2206_v57 = vpop.f32.mrb[205].mxu1 }
 0x2d0   : > { %2667 = vst [vmem:[%s4026_s25 + $0x9a0] sm:$0xff] %v1756_v52  ;;  %v2207_v58 = vadd.f32 %v2206_v57, %v4859_v37 }
 0x2d1   : > { %2669 = vst [vmem:[%s4026_s25 + $0x9b0] sm:$0xff] %v2205_v55  ;;  %2668 = vst [vmem:[%s4026_s25 + $0x9a8] sm:$0xff] %v1758_v56  ;;  %v1761_v59 = vpop.f32.mrb[206].mxu0 }
 0x2d2   : > { %2670 = vst [vmem:[%s4026_s25 + $0x9b8] sm:$0xff] %v2207_v58  ;;  %v1762_v60 = vadd.f32 %v1761_v59, %v4846_v28  ;;  %v2210_v61 = vpop.f32.mrb[206].mxu1  ;;  %v1763_v62 = vpop.f32.mrb[207].mxu0 }
 0x2d3   : > { %v2211_v63 = vadd.f32 %v2210_v61, %v4848_v29  ;;  %v1764_v1 = vadd.f32 %v1763_v62, %v4854_v31  ;;  %v2212_v2 = vpop.f32.mrb[207].mxu1 }
 0x2d4   : > { %2675 = vst [vmem:[%s4026_s25 + $0x9e0] sm:$0xff] %v1762_v60  ;;  %v2213_v3 = vadd.f32 %v2212_v2, %v4859_v37 }
 0x2d5   : > { %2677 = vst [vmem:[%s4026_s25 + $0x9f0] sm:$0xff] %v2211_v63  ;;  %2676 = vst [vmem:[%s4026_s25 + $0x9e8] sm:$0xff] %v1764_v1  ;;  %v1767_v4 = vpop.f32.mrb[208].mxu0 }
 0x2d6   : > { %2678 = vst [vmem:[%s4026_s25 + $0x9f8] sm:$0xff] %v2213_v3  ;;  %v1768_v5 = vadd.f32 %v1767_v4, %v4846_v28  ;;  %v2216_v6 = vpop.f32.mrb[208].mxu1  ;;  %v1769_v7 = vpop.f32.mrb[209].mxu0 }
 0x2d7   : > { %v2217_v8 = vadd.f32 %v2216_v6, %v4848_v29  ;;  %v1770_v9 = vadd.f32 %v1769_v7, %v4854_v31  ;;  %v2218_v0 = vpop.f32.mrb[209].mxu1 }
 0x2d8   : > { %2683 = vst [vmem:[%s4026_s25 + $0xa20] sm:$0xff] %v1768_v5  ;;  %v2219_v10 = vadd.f32 %v2218_v0, %v4859_v37 }
 0x2d9   : > { %2685 = vst [vmem:[%s4026_s25 + $0xa30] sm:$0xff] %v2217_v8  ;;  %2684 = vst [vmem:[%s4026_s25 + $0xa28] sm:$0xff] %v1770_v9  ;;  %v1773_v11 = vpop.f32.mrb[210].mxu0 }
 0x2da   : > { %2686 = vst [vmem:[%s4026_s25 + $0xa38] sm:$0xff] %v2219_v10  ;;  %v1774_v12 = vadd.f32 %v1773_v11, %v4846_v28  ;;  %v2222_v13 = vpop.f32.mrb[210].mxu1  ;;  %v1775_v14 = vpop.f32.mrb[211].mxu0 }
 0x2db   : > { %v2223_v15 = vadd.f32 %v2222_v13, %v4848_v29  ;;  %v1776_v16 = vadd.f32 %v1775_v14, %v4854_v31  ;;  %v2224_v17 = vpop.f32.mrb[211].mxu1 }
 0x2dc   : > { %2691 = vst [vmem:[%s4026_s25 + $0xa60] sm:$0xff] %v1774_v12  ;;  %v2225_v18 = vadd.f32 %v2224_v17, %v4859_v37 }
 0x2dd   : > { %2693 = vst [vmem:[%s4026_s25 + $0xa70] sm:$0xff] %v2223_v15  ;;  %2692 = vst [vmem:[%s4026_s25 + $0xa68] sm:$0xff] %v1776_v16  ;;  %v1779_v19 = vpop.f32.mrb[212].mxu0 }
 0x2de   : > { %2694 = vst [vmem:[%s4026_s25 + $0xa78] sm:$0xff] %v2225_v18  ;;  %v1780_v20 = vadd.f32 %v1779_v19, %v4846_v28  ;;  %v2228_v21 = vpop.f32.mrb[212].mxu1  ;;  %v1781_v22 = vpop.f32.mrb[213].mxu0 }
 0x2df   : > { %v2229_v24 = vadd.f32 %v2228_v21, %v4848_v29  ;;  %v1782_v25 = vadd.f32 %v1781_v22, %v4854_v31  ;;  %v2230_v26 = vpop.f32.mrb[213].mxu1 }
 0x2e0   : > { %2699 = vst [vmem:[%s4026_s25 + $0xaa0] sm:$0xff] %v1780_v20  ;;  %v2231_v27 = vadd.f32 %v2230_v26, %v4859_v37 }
 0x2e1   : > { %2701 = vst [vmem:[%s4026_s25 + $0xab0] sm:$0xff] %v2229_v24  ;;  %2700 = vst [vmem:[%s4026_s25 + $0xaa8] sm:$0xff] %v1782_v25  ;;  %v1785_v23 = vpop.f32.mrb[214].mxu0 }
 0x2e2   : > { %2702 = vst [vmem:[%s4026_s25 + $0xab8] sm:$0xff] %v2231_v27  ;;  %v1786_v30 = vadd.f32 %v1785_v23, %v4846_v28  ;;  %v2234_v34 = vpop.f32.mrb[214].mxu1  ;;  %v1787_v36 = vpop.f32.mrb[215].mxu0 }
 0x2e3   : > { %v2235_v32 = vadd.f32 %v2234_v34, %v4848_v29  ;;  %v1788_v33 = vadd.f32 %v1787_v36, %v4854_v31  ;;  %v2236_v38 = vpop.f32.mrb[215].mxu1 }
 0x2e4   : > { %2707 = vst [vmem:[%s4026_s25 + $0xae0] sm:$0xff] %v1786_v30  ;;  %v2237_v39 = vadd.f32 %v2236_v38, %v4859_v37 }
 0x2e5   : > { %2709 = vst [vmem:[%s4026_s25 + $0xaf0] sm:$0xff] %v2235_v32  ;;  %2708 = vst [vmem:[%s4026_s25 + $0xae8] sm:$0xff] %v1788_v33  ;;  %v1791_v40 = vpop.f32.mrb[216].mxu0 }
 0x2e6   : > { %2710 = vst [vmem:[%s4026_s25 + $0xaf8] sm:$0xff] %v2237_v39  ;;  %v1792_v35 = vadd.f32 %v1791_v40, %v4846_v28  ;;  %v2240_v41 = vpop.f32.mrb[216].mxu1  ;;  %v1793_v42 = vpop.f32.mrb[217].mxu0 }
 0x2e7   : > { %v2241_v43 = vadd.f32 %v2240_v41, %v4848_v29  ;;  %v1794_v44 = vadd.f32 %v1793_v42, %v4854_v31  ;;  %v2242_v45 = vpop.f32.mrb[217].mxu1 }
 0x2e8   : > { %2715 = vst [vmem:[%s4026_s25 + $0xb20] sm:$0xff] %v1792_v35  ;;  %v2243_v46 = vadd.f32 %v2242_v45, %v4859_v37 }
 0x2e9   : > { %2717 = vst [vmem:[%s4026_s25 + $0xb30] sm:$0xff] %v2241_v43  ;;  %2716 = vst [vmem:[%s4026_s25 + $0xb28] sm:$0xff] %v1794_v44  ;;  %v1797_v47 = vpop.f32.mrb[218].mxu0 }
 0x2ea   : > { %2718 = vst [vmem:[%s4026_s25 + $0xb38] sm:$0xff] %v2243_v46  ;;  %v1798_v48 = vadd.f32 %v1797_v47, %v4846_v28  ;;  %v2246_v49 = vpop.f32.mrb[218].mxu1  ;;  %v1799_v50 = vpop.f32.mrb[219].mxu0 }
 0x2eb   : > { %v2247_v51 = vadd.f32 %v2246_v49, %v4848_v29  ;;  %v1800_v52 = vadd.f32 %v1799_v50, %v4854_v31  ;;  %v2248_v53 = vpop.f32.mrb[219].mxu1 }
 0x2ec   : > { %2723 = vst [vmem:[%s4026_s25 + $0xb60] sm:$0xff] %v1798_v48  ;;  %v2249_v54 = vadd.f32 %v2248_v53, %v4859_v37 }
 0x2ed   : > { %2725 = vst [vmem:[%s4026_s25 + $0xb70] sm:$0xff] %v2247_v51  ;;  %2724 = vst [vmem:[%s4026_s25 + $0xb68] sm:$0xff] %v1800_v52  ;;  %v1803_v55 = vpop.f32.mrb[220].mxu0 }
 0x2ee   : > { %2726 = vst [vmem:[%s4026_s25 + $0xb78] sm:$0xff] %v2249_v54  ;;  %v1804_v56 = vadd.f32 %v1803_v55, %v4846_v28  ;;  %v2252_v57 = vpop.f32.mrb[220].mxu1  ;;  %v1805_v58 = vpop.f32.mrb[221].mxu0 }
 0x2ef   : > { %v2253_v59 = vadd.f32 %v2252_v57, %v4848_v29  ;;  %v1806_v60 = vadd.f32 %v1805_v58, %v4854_v31  ;;  %v2254_v61 = vpop.f32.mrb[221].mxu1 }
 0x2f0   : > { %2731 = vst [vmem:[%s4026_s25 + $0xba0] sm:$0xff] %v1804_v56  ;;  %v2255_v62 = vadd.f32 %v2254_v61, %v4859_v37 }
 0x2f1   : > { %2733 = vst [vmem:[%s4026_s25 + $0xbb0] sm:$0xff] %v2253_v59  ;;  %2732 = vst [vmem:[%s4026_s25 + $0xba8] sm:$0xff] %v1806_v60  ;;  %v1809_v63 = vpop.f32.mrb[222].mxu0 }
 0x2f2   : > { %2734 = vst [vmem:[%s4026_s25 + $0xbb8] sm:$0xff] %v2255_v62  ;;  %v1810_v1 = vadd.f32 %v1809_v63, %v4846_v28  ;;  %v2258_v2 = vpop.f32.mrb[222].mxu1  ;;  %v1811_v3 = vpop.f32.mrb[223].mxu0 }
 0x2f3   : > { %v2259_v4 = vadd.f32 %v2258_v2, %v4848_v29  ;;  %v1812_v5 = vadd.f32 %v1811_v3, %v4854_v31  ;;  %v2260_v6 = vpop.f32.mrb[223].mxu1 }
 0x2f4   : > { %2739 = vst [vmem:[%s4026_s25 + $0xbe0] sm:$0xff] %v1810_v1  ;;  %v2261_v7 = vadd.f32 %v2260_v6, %v4859_v37 }
 0x2f5   : > { %2741 = vst [vmem:[%s4026_s25 + $0xbf0] sm:$0xff] %v2259_v4  ;;  %2740 = vst [vmem:[%s4026_s25 + $0xbe8] sm:$0xff] %v1812_v5  ;;  %v1815_v8 = vpop.f32.mrb[224].mxu0 }
 0x2f6   : > { %2742 = vst [vmem:[%s4026_s25 + $0xbf8] sm:$0xff] %v2261_v7  ;;  %v1816_v9 = vadd.f32 %v1815_v8, %v4846_v28  ;;  %v2264_v0 = vpop.f32.mrb[224].mxu1  ;;  %v1817_v10 = vpop.f32.mrb[225].mxu0 }
 0x2f7   : > { %v2265_v11 = vadd.f32 %v2264_v0, %v4848_v29  ;;  %v1818_v12 = vadd.f32 %v1817_v10, %v4854_v31  ;;  %v2266_v13 = vpop.f32.mrb[225].mxu1 }
 0x2f8   : > { %2747 = vst [vmem:[%s4026_s25 + $0xc20] sm:$0xff] %v1816_v9  ;;  %v2267_v14 = vadd.f32 %v2266_v13, %v4859_v37 }
 0x2f9   : > { %2749 = vst [vmem:[%s4026_s25 + $0xc30] sm:$0xff] %v2265_v11  ;;  %2748 = vst [vmem:[%s4026_s25 + $0xc28] sm:$0xff] %v1818_v12  ;;  %v1821_v15 = vpop.f32.mrb[226].mxu0 }
 0x2fa   : > { %2750 = vst [vmem:[%s4026_s25 + $0xc38] sm:$0xff] %v2267_v14  ;;  %v1822_v16 = vadd.f32 %v1821_v15, %v4846_v28  ;;  %v2270_v17 = vpop.f32.mrb[226].mxu1  ;;  %v1823_v18 = vpop.f32.mrb[227].mxu0 }
 0x2fb   : > { %v2271_v19 = vadd.f32 %v2270_v17, %v4848_v29  ;;  %v1824_v20 = vadd.f32 %v1823_v18, %v4854_v31  ;;  %v2272_v21 = vpop.f32.mrb[227].mxu1 }
 0x2fc   : > { %2755 = vst [vmem:[%s4026_s25 + $0xc60] sm:$0xff] %v1822_v16  ;;  %v2273_v22 = vadd.f32 %v2272_v21, %v4859_v37 }
 0x2fd   : > { %2757 = vst [vmem:[%s4026_s25 + $0xc70] sm:$0xff] %v2271_v19  ;;  %2756 = vst [vmem:[%s4026_s25 + $0xc68] sm:$0xff] %v1824_v20  ;;  %v1827_v24 = vpop.f32.mrb[228].mxu0 }
 0x2fe   : > { %2758 = vst [vmem:[%s4026_s25 + $0xc78] sm:$0xff] %v2273_v22  ;;  %v1828_v25 = vadd.f32 %v1827_v24, %v4846_v28  ;;  %v2276_v26 = vpop.f32.mrb[228].mxu1  ;;  %v1829_v27 = vpop.f32.mrb[229].mxu0 }
 0x2ff   : > { %v2277_v23 = vadd.f32 %v2276_v26, %v4848_v29  ;;  %v1830_v30 = vadd.f32 %v1829_v27, %v4854_v31  ;;  %v2278_v34 = vpop.f32.mrb[229].mxu1 }
 0x300   : > { %2763 = vst [vmem:[%s4026_s25 + $0xca0] sm:$0xff] %v1828_v25  ;;  %v2279_v36 = vadd.f32 %v2278_v34, %v4859_v37 }
 0x301   : > { %2765 = vst [vmem:[%s4026_s25 + $0xcb0] sm:$0xff] %v2277_v23  ;;  %2764 = vst [vmem:[%s4026_s25 + $0xca8] sm:$0xff] %v1830_v30  ;;  %v1833_v32 = vpop.f32.mrb[230].mxu0 }
 0x302   : > { %2766 = vst [vmem:[%s4026_s25 + $0xcb8] sm:$0xff] %v2279_v36  ;;  %v1834_v33 = vadd.f32 %v1833_v32, %v4846_v28  ;;  %v2282_v38 = vpop.f32.mrb[230].mxu1  ;;  %v1835_v39 = vpop.f32.mrb[231].mxu0 }
 0x303   : > { %v2283_v40 = vadd.f32 %v2282_v38, %v4848_v29  ;;  %v1836_v35 = vadd.f32 %v1835_v39, %v4854_v31  ;;  %v2284_v41 = vpop.f32.mrb[231].mxu1 }
 0x304   : > { %2771 = vst [vmem:[%s4026_s25 + $0xce0] sm:$0xff] %v1834_v33  ;;  %v2285_v42 = vadd.f32 %v2284_v41, %v4859_v37 }
 0x305   : > { %2773 = vst [vmem:[%s4026_s25 + $0xcf0] sm:$0xff] %v2283_v40  ;;  %2772 = vst [vmem:[%s4026_s25 + $0xce8] sm:$0xff] %v1836_v35  ;;  %v1839_v43 = vpop.f32.mrb[232].mxu0 }
 0x306   : > { %2774 = vst [vmem:[%s4026_s25 + $0xcf8] sm:$0xff] %v2285_v42  ;;  %v1840_v44 = vadd.f32 %v1839_v43, %v4846_v28  ;;  %v2288_v45 = vpop.f32.mrb[232].mxu1  ;;  %v1841_v46 = vpop.f32.mrb[233].mxu0 }
 0x307   : > { %v2289_v47 = vadd.f32 %v2288_v45, %v4848_v29  ;;  %v1842_v48 = vadd.f32 %v1841_v46, %v4854_v31  ;;  %v2290_v49 = vpop.f32.mrb[233].mxu1 }
 0x308   : > { %2779 = vst [vmem:[%s4026_s25 + $0xd20] sm:$0xff] %v1840_v44  ;;  %v2291_v50 = vadd.f32 %v2290_v49, %v4859_v37 }
 0x309   : > { %2781 = vst [vmem:[%s4026_s25 + $0xd30] sm:$0xff] %v2289_v47  ;;  %2780 = vst [vmem:[%s4026_s25 + $0xd28] sm:$0xff] %v1842_v48  ;;  %v1845_v51 = vpop.f32.mrb[234].mxu0 }
 0x30a   : > { %2782 = vst [vmem:[%s4026_s25 + $0xd38] sm:$0xff] %v2291_v50  ;;  %v1846_v52 = vadd.f32 %v1845_v51, %v4846_v28  ;;  %v2294_v53 = vpop.f32.mrb[234].mxu1  ;;  %v1847_v54 = vpop.f32.mrb[235].mxu0 }
 0x30b   : > { %v2295_v55 = vadd.f32 %v2294_v53, %v4848_v29  ;;  %v1848_v56 = vadd.f32 %v1847_v54, %v4854_v31  ;;  %v2296_v57 = vpop.f32.mrb[235].mxu1 }
 0x30c   : > { %2787 = vst [vmem:[%s4026_s25 + $0xd60] sm:$0xff] %v1846_v52  ;;  %v2297_v58 = vadd.f32 %v2296_v57, %v4859_v37 }
 0x30d   : > { %2789 = vst [vmem:[%s4026_s25 + $0xd70] sm:$0xff] %v2295_v55  ;;  %2788 = vst [vmem:[%s4026_s25 + $0xd68] sm:$0xff] %v1848_v56  ;;  %v1851_v59 = vpop.f32.mrb[236].mxu0 }
 0x30e   : > { %2790 = vst [vmem:[%s4026_s25 + $0xd78] sm:$0xff] %v2297_v58  ;;  %v1852_v60 = vadd.f32 %v1851_v59, %v4846_v28  ;;  %v2300_v61 = vpop.f32.mrb[236].mxu1  ;;  %v1853_v62 = vpop.f32.mrb[237].mxu0 }
 0x30f   : > { %v2301_v63 = vadd.f32 %v2300_v61, %v4848_v29  ;;  %v1854_v1 = vadd.f32 %v1853_v62, %v4854_v31  ;;  %v2302_v2 = vpop.f32.mrb[237].mxu1 }
 0x310   : > { %2795 = vst [vmem:[%s4026_s25 + $0xda0] sm:$0xff] %v1852_v60  ;;  %v2303_v3 = vadd.f32 %v2302_v2, %v4859_v37 }
 0x311   : > { %2797 = vst [vmem:[%s4026_s25 + $0xdb0] sm:$0xff] %v2301_v63  ;;  %2796 = vst [vmem:[%s4026_s25 + $0xda8] sm:$0xff] %v1854_v1  ;;  %v1857_v4 = vpop.f32.mrb[238].mxu0 }
 0x312   : > { %2798 = vst [vmem:[%s4026_s25 + $0xdb8] sm:$0xff] %v2303_v3  ;;  %v1858_v5 = vadd.f32 %v1857_v4, %v4846_v28  ;;  %v2306_v6 = vpop.f32.mrb[238].mxu1  ;;  %v1859_v7 = vpop.f32.mrb[239].mxu0 }
 0x313   : > { %v2307_v8 = vadd.f32 %v2306_v6, %v4848_v29  ;;  %v1860_v9 = vadd.f32 %v1859_v7, %v4854_v31  ;;  %v2308_v0 = vpop.f32.mrb[239].mxu1 }
 0x314   : > { %2803 = vst [vmem:[%s4026_s25 + $0xde0] sm:$0xff] %v1858_v5  ;;  %v2309_v10 = vadd.f32 %v2308_v0, %v4859_v37 }
 0x315   : > { %2805 = vst [vmem:[%s4026_s25 + $0xdf0] sm:$0xff] %v2307_v8  ;;  %2804 = vst [vmem:[%s4026_s25 + $0xde8] sm:$0xff] %v1860_v9  ;;  %v1863_v11 = vpop.f32.mrb[240].mxu0 }
 0x316   : > { %2806 = vst [vmem:[%s4026_s25 + $0xdf8] sm:$0xff] %v2309_v10  ;;  %v1864_v12 = vadd.f32 %v1863_v11, %v4846_v28  ;;  %v2312_v13 = vpop.f32.mrb[240].mxu1  ;;  %v1865_v14 = vpop.f32.mrb[241].mxu0 }
 0x317   : > { %v2313_v15 = vadd.f32 %v2312_v13, %v4848_v29  ;;  %v1866_v16 = vadd.f32 %v1865_v14, %v4854_v31  ;;  %v2314_v17 = vpop.f32.mrb[241].mxu1 }
 0x318   : > { %2811 = vst [vmem:[%s4026_s25 + $0xe20] sm:$0xff] %v1864_v12  ;;  %v2315_v18 = vadd.f32 %v2314_v17, %v4859_v37 }
 0x319   : > { %2813 = vst [vmem:[%s4026_s25 + $0xe30] sm:$0xff] %v2313_v15  ;;  %2812 = vst [vmem:[%s4026_s25 + $0xe28] sm:$0xff] %v1866_v16  ;;  %v1869_v19 = vpop.f32.mrb[242].mxu0 }
 0x31a   : > { %2814 = vst [vmem:[%s4026_s25 + $0xe38] sm:$0xff] %v2315_v18  ;;  %v1870_v20 = vadd.f32 %v1869_v19, %v4846_v28  ;;  %v2318_v21 = vpop.f32.mrb[242].mxu1  ;;  %v1871_v22 = vpop.f32.mrb[243].mxu0 }
 0x31b   : > { %v2319_v24 = vadd.f32 %v2318_v21, %v4848_v29  ;;  %v1872_v25 = vadd.f32 %v1871_v22, %v4854_v31  ;;  %v2320_v26 = vpop.f32.mrb[243].mxu1 }
 0x31c   : > { %2819 = vst [vmem:[%s4026_s25 + $0xe60] sm:$0xff] %v1870_v20  ;;  %v2321_v27 = vadd.f32 %v2320_v26, %v4859_v37 }
 0x31d   : > { %2821 = vst [vmem:[%s4026_s25 + $0xe70] sm:$0xff] %v2319_v24  ;;  %2820 = vst [vmem:[%s4026_s25 + $0xe68] sm:$0xff] %v1872_v25  ;;  %v1875_v23 = vpop.f32.mrb[244].mxu0 }
 0x31e   : > { %2822 = vst [vmem:[%s4026_s25 + $0xe78] sm:$0xff] %v2321_v27  ;;  %v1876_v30 = vadd.f32 %v1875_v23, %v4846_v28  ;;  %v2324_v34 = vpop.f32.mrb[244].mxu1  ;;  %v1877_v36 = vpop.f32.mrb[245].mxu0 }
 0x31f   : > { %v2325_v32 = vadd.f32 %v2324_v34, %v4848_v29  ;;  %v1878_v33 = vadd.f32 %v1877_v36, %v4854_v31  ;;  %v2326_v38 = vpop.f32.mrb[245].mxu1 }
 0x320   : > { %2827 = vst [vmem:[%s4026_s25 + $0xea0] sm:$0xff] %v1876_v30  ;;  %v2327_v39 = vadd.f32 %v2326_v38, %v4859_v37 }
 0x321   : > { %2829 = vst [vmem:[%s4026_s25 + $0xeb0] sm:$0xff] %v2325_v32  ;;  %2828 = vst [vmem:[%s4026_s25 + $0xea8] sm:$0xff] %v1878_v33  ;;  %v1881_v40 = vpop.f32.mrb[246].mxu0 }
 0x322   : > { %2830 = vst [vmem:[%s4026_s25 + $0xeb8] sm:$0xff] %v2327_v39  ;;  %v1882_v35 = vadd.f32 %v1881_v40, %v4846_v28  ;;  %v2330_v41 = vpop.f32.mrb[246].mxu1  ;;  %v1883_v42 = vpop.f32.mrb[247].mxu0 }
 0x323   : > { %v2331_v43 = vadd.f32 %v2330_v41, %v4848_v29  ;;  %v1884_v44 = vadd.f32 %v1883_v42, %v4854_v31  ;;  %v2332_v45 = vpop.f32.mrb[247].mxu1 }
 0x324   : > { %2835 = vst [vmem:[%s4026_s25 + $0xee0] sm:$0xff] %v1882_v35  ;;  %v2333_v46 = vadd.f32 %v2332_v45, %v4859_v37 }
 0x325   : > { %2837 = vst [vmem:[%s4026_s25 + $0xef0] sm:$0xff] %v2331_v43  ;;  %2836 = vst [vmem:[%s4026_s25 + $0xee8] sm:$0xff] %v1884_v44  ;;  %v1887_v47 = vpop.f32.mrb[248].mxu0 }
 0x326   : > { %2838 = vst [vmem:[%s4026_s25 + $0xef8] sm:$0xff] %v2333_v46  ;;  %v1888_v48 = vadd.f32 %v1887_v47, %v4846_v28  ;;  %v2336_v49 = vpop.f32.mrb[248].mxu1  ;;  %v1889_v50 = vpop.f32.mrb[249].mxu0 }
 0x327   : > { %v2337_v51 = vadd.f32 %v2336_v49, %v4848_v29  ;;  %v1890_v52 = vadd.f32 %v1889_v50, %v4854_v31  ;;  %v2338_v53 = vpop.f32.mrb[249].mxu1 }
 0x328   : > { %2843 = vst [vmem:[%s4026_s25 + $0xf20] sm:$0xff] %v1888_v48  ;;  %v2339_v54 = vadd.f32 %v2338_v53, %v4859_v37 }
 0x329   : > { %2845 = vst [vmem:[%s4026_s25 + $0xf30] sm:$0xff] %v2337_v51  ;;  %2844 = vst [vmem:[%s4026_s25 + $0xf28] sm:$0xff] %v1890_v52  ;;  %v1893_v55 = vpop.f32.mrb[250].mxu0 }
 0x32a   : > { %2846 = vst [vmem:[%s4026_s25 + $0xf38] sm:$0xff] %v2339_v54  ;;  %v1894_v56 = vadd.f32 %v1893_v55, %v4846_v28  ;;  %v2342_v57 = vpop.f32.mrb[250].mxu1  ;;  %v1895_v58 = vpop.f32.mrb[251].mxu0 }
 0x32b   : > { %v2343_v59 = vadd.f32 %v2342_v57, %v4848_v29  ;;  %v1896_v60 = vadd.f32 %v1895_v58, %v4854_v31  ;;  %v2344_v61 = vpop.f32.mrb[251].mxu1 }
 0x32c   : > { %2851 = vst [vmem:[%s4026_s25 + $0xf60] sm:$0xff] %v1894_v56  ;;  %v2345_v62 = vadd.f32 %v2344_v61, %v4859_v37 }
 0x32d   : > { %2853 = vst [vmem:[%s4026_s25 + $0xf70] sm:$0xff] %v2343_v59  ;;  %2852 = vst [vmem:[%s4026_s25 + $0xf68] sm:$0xff] %v1896_v60  ;;  %v1899_v63 = vpop.f32.mrb[252].mxu0 }
 0x32e   : > { %2854 = vst [vmem:[%s4026_s25 + $0xf78] sm:$0xff] %v2345_v62  ;;  %v1900_v1 = vadd.f32 %v1899_v63, %v4846_v28  ;;  %v2348_v2 = vpop.f32.mrb[252].mxu1  ;;  %v1901_v3 = vpop.f32.mrb[253].mxu0 }
 0x32f   : > { %v2349_v4 = vadd.f32 %v2348_v2, %v4848_v29  ;;  %v1902_v5 = vadd.f32 %v1901_v3, %v4854_v31  ;;  %v2350_v6 = vpop.f32.mrb[253].mxu1 }
 0x330   : > { %2859 = vst [vmem:[%s4026_s25 + $0xfa0] sm:$0xff] %v1900_v1  ;;  %v2351_v7 = vadd.f32 %v2350_v6, %v4859_v37 }
 0x331   : > { %2861 = vst [vmem:[%s4026_s25 + $0xfb0] sm:$0xff] %v2349_v4  ;;  %2860 = vst [vmem:[%s4026_s25 + $0xfa8] sm:$0xff] %v1902_v5  ;;  %v1905_v8 = vpop.f32.mrb[254].mxu0 }
 0x332   : > { %2862 = vst [vmem:[%s4026_s25 + $0xfb8] sm:$0xff] %v2351_v7  ;;  %v1906_v9 = vadd.f32 %v1905_v8, %v4846_v28  ;;  %v2354_v0 = vpop.f32.mrb[254].mxu1  ;;  %v1907_v10 = vpop.f32.mrb[255].mxu0 }
 0x333   : > { %v2355_v11 = vadd.f32 %v2354_v0, %v4848_v29  ;;  %v1908_v12 = vadd.f32 %v1907_v10, %v4854_v31  ;;  %v2356_v13 = vpop.f32.mrb[255].mxu1 }
 0x334   : > { %2867 = vst [vmem:[%s4026_s25 + $0xfe0] sm:$0xff] %v1906_v9  ;;  %v2357_v28 = vadd.f32 %v2356_v13, %v4859_v37 }
 0x335   : > { %2869 = vst [vmem:[%s4026_s25 + $0xff0] sm:$0xff] %v2355_v11  ;;  %2868 = vst [vmem:[%s4026_s25 + $0xfe8] sm:$0xff] %v1908_v12 }
 0x336   : > { %2870 = vst [vmem:[%s4026_s25 + $0xff8] sm:$0xff] %v2357_v28 }
 0x337   : > { %3508 = shalt.err (!%p3505_p11)
}
 0x338   : > { %s3509_s24 = scalar_lea.hbm %s5429_s5, 65536  ;;  %s3513_s10 = scalar_lea.hbm %s5484_s3, 262144 }
 0x339   : > { %p3510_p13 = scmp.ne.s32.totalorder %s5429_s5, %s3509_s24  ;;  %p3514_p6 = scmp.lt.u32.totalorder %s5429_s5, %s5484_s3 }
 0x33a   : > { %p3515_p9 = scmp.lt.u32.totalorder %s3513_s10, %s3509_s24  ;;  %p3517_p10 = scmp.lt.u32.totalorder %s3509_s24, %s5429_s5 }
 0x33b   : > { %p3511_p5 = pnand %p3510_p13, %p5498_p1 }
 0x33c   : > { %p3516_p12 = por %p3515_p9, %p3514_p6 }
 0x33d   : > { %p3512_p0 = pneg %p3511_p5 }
 0x33e   : > { %p3518_p2 = por %p3517_p10, %p3516_p12 }
 0x340   : > { %p3519_p3 = pnand %p3518_p2, %p3512_p0 }
 0x342   : > { %3522 = shalt.err (!%p3519_p3)
}
 0x343   : > { %s3573_s19 = smov 1024   ;;  %s3574_s20 = smov 64  }
 0x344   : > { %3317 = dma.vmem_to_hbm [thread:$0]  (%p5498_p1), %s5431_s30, 65536, %s5429_s5, %s5440_s6, %s3573_s19, %s3573_s19, %s3574_s20  }
 0x345 PF: > { %p3334_p4 = scmp.ge.s32.totalorder %s3565_s15, 2  ;;  %s2901_s25 = sand.u32 1, %s3553_s12  }
 0x346   : > { %p5499_p7 = scmp.ne.s32.totalorder %s5489_s23, 0  ;;  %s2902_s28 = scalar_lea.sflag [#allocation4], %s2901_s25 }
 0x348   : > { %p3327_p8 = pnand %p3334_p4, %p5499_p7 }
 0x34a   : > { %3548 = dma.done.wait (!%p3327_p8), %s2902_s28, 65536  }
 0x34b   : > { %3550 = vsyncadd (!%p3327_p8), %s2902_s28, 4294901760  ;;  %p15_p11 = scmp.ge.s32.totalorder %s3620_s18, 6   ;;  %s5500_s12 = smov %s3557_s13 }
 0x34c   : > { %s5501_s13 = smov %s3561_s14  ;;  %s5502_s14 = smov %s3631_s21 }
 0x34d   : > { %s5503_s15 = smov %s3620_s18  ;;  %17 = sbr.rel (!%p15_p11) target bundleno = 5 (0x5), region = 76 }
 0x354   :  { %2907 = vsyncpa [#allocation3], 1 }
 0x355   :  { %2909 = vsyncpa [#allocation3 + $0x1], 1 }
 0x356   :  { %2910 = vsyncpa [#allocation6], 1 }
 0x357   :  { %2911 = vsyncpa [#allocation4], 1 }
 0x358   :  { %2913 = vsyncpa [#allocation4 + $0x1], 1 }

</bundles_post_ra>
